<compile_context>
chip_gen: v5e
topology: v5e:2x2
jax: 0.10.0
libtpu: 0.0.40
codegen_flags: <defaults>
</compile_context>

<pallas_src>
import functools
import numpy as np
import jax
import jax.numpy as jnp
from jax.experimental import pallas as pl
from jax.experimental.pallas import tpu as pltpu

ATT_MAP_SIZE = {4: (56, 56), 13: (56, 56), 19: (56, 56)}


# ----------------------------------------------------------------------- host helpers
def _bilinear_matrix(n_in, n_out):
    """(n_out, n_in) matrix for 1-D bilinear resize, align_corners=True (as in MaskHead)."""
    M = np.zeros((n_out, n_in), dtype=np.float32)
    if n_out == 1:
        M[0, 0] = 1.0
        return M
    scale = (n_in - 1) / (n_out - 1)
    for i in range(n_out):
        src = i * scale
        i0 = min(int(np.floor(src)), n_in - 1)
        i1 = min(i0 + 1, n_in - 1)
        w1 = src - i0
        M[i, i0] += 1.0 - w1
        M[i, i1] += w1
    return M


def _pick_tq(hw, cap):
    """Largest divisor of hw that is a multiple of 8 and <= cap."""
    best = 8
    for t in range(8, min(cap, hw) + 1, 8):
        if hw % t == 0:
            best = t
    return best


def _pam_device_config():
    """(tq_cap, vmem_limit_bytes, exp_in_bf16) per TPU generation.
    v5e/v6e: 128 MiB VMEM/TC -> big query tiles; v5e keeps f32 exp (no bf16 EUP).
    v7x: 64 MiB/TC, but after the VMEM trims (no f32 attention copy, no second matmul)
         the 784-row tile fits; bf16 EUP available.
    Unknown / very old chips fall back to conservative tilings."""
    try:
        kind = jax.devices()[0].device_kind.lower()
    except Exception:
        kind = ""
    if "v2" in kind or "v3" in kind:
        return 112, 12 * 1024 * 1024, False
    if "v5" in kind:
        return 784, 100 * 1024 * 1024, False
    if "v6" in kind:
        return 784, 100 * 1024 * 1024, True
    if "v7" in kind:
        return 784, 56 * 1024 * 1024, True
    return 448, 48 * 1024 * 1024, False


# --------------------------------------- kernel 1: bilinear resize + channel softmax
# The separable resize y = Mh @ x[c] @ Mw^T is folded on the host into a single
# (Hin*Win, Hout*Wout) matrix, so the kernel is one lane-dense MXU matmul per batch
# element followed by the channel softmax, emitting (B, C, Hout*Wout) directly
# (the layout the PAM kernel consumes -> no reshape glue, lane-dense 3136-wide stores).
def _resize_softmax_kernel(x_ref, k_ref, s_ref):
    # x_ref: (1, C, Hin*Win)   k_ref: (Hin*Win, Hout*Wout)   s_ref: (1, C, Hout*Wout)
    t = jnp.dot(x_ref[0], k_ref[...], preferred_element_type=jnp.float32)   # (C, HWout)
    m = jnp.max(t, axis=0, keepdims=True)
    e = jnp.exp(t - m)
    inv = 1.0 / jnp.sum(e, axis=0, keepdims=True)        # one reciprocal, C multiplies
    s_ref[0] = (e * inv).astype(s_ref.dtype)


def resize_and_channel_softmax(x, out_size):
    """x: (B, C, Hin, Win) -> channel-softmaxed resized features (B, C, Hout*Wout), f32."""
    B, C, Hin, Win = x.shape
    Hout, Wout = out_size
    mh = _bilinear_matrix(Hin, Hout)                      # (Hout, Hin)
    mw = _bilinear_matrix(Win, Wout)                      # (Wout, Win)
    # vec_rowmajor(Mh X Mw^T) = kron(Mh, Mw) @ vec_rowmajor(X)
    kmat = jnp.asarray(np.kron(mh, mw).T)                 # (Hin*Win, Hout*Wout)
    x_flat = x.reshape(B, C, Hin * Win).astype(jnp.float32)
    return pl.pallas_call(
        _resize_softmax_kernel,
        out_shape=jax.ShapeDtypeStruct((B, C, Hout * Wout), jnp.float32),
        grid_spec=pltpu.PrefetchScalarGridSpec(
            num_scalar_prefetch=0,
            grid=(B,),
            in_specs=[pl.BlockSpec((1, C, Hin * Win), lambda b: (b, 0, 0)),
                      pl.BlockSpec((Hin * Win, Hout * Wout), lambda b: (0, 0))],
            out_specs=pl.BlockSpec((1, C, Hout * Wout), lambda b: (b, 0, 0))),
        compiler_params=pltpu.CompilerParams(
            dimension_semantics=("parallel",),
            vmem_limit_bytes=32 * 1024 * 1024),
    )(x_flat, kmat)


# ------------------- kernel 2: PAM attention + residual + 1x1-conv mask head (fused)
def _pam_tile(q, k, w_row, w_col, gamma, bias, exp_bf16):
    """Shared per-tile PAM math.
    q: (TQ, C) query tile, f32.  k: (C, HW) keys/values (channel-softmaxed, in [0,1]).
    Returns (e, inv, mask_col) with e (TQ, HW) f32, inv (TQ, 1), mask_col (TQ, 1)."""
    # The only MXU matmul: bf16 operands (post-softmax probabilities), f32 accumulation.
    energy = jnp.dot(q.astype(jnp.bfloat16), k.astype(jnp.bfloat16),
                     preferred_element_type=jnp.float32)               # (TQ, HW)
    # 0 <= energy <= 1 for channel-softmaxed inputs, so exp cannot overflow:
    # skip the usual max-subtraction (saves one XLU reduce + one VPU pass per tile).
    if exp_bf16:                                                        # v6e / v7x bf16 EUP
        e = jnp.exp(energy.astype(jnp.bfloat16)).astype(jnp.float32)
    else:                                                               # v5e: f32 EUP only
        e = jnp.exp(energy)
    inv = pl.reciprocal(jnp.sum(e, axis=-1, keepdims=True), approx=True)  # EUP, (TQ, 1)
    # 1x1-conv folded into the softmax row reduction -> no (TQ,HW)x(HW,C) matmul:
    #   mask[i] = gamma * (sum_j e[i,j]*kw[j]) * inv[i] + (w . q)[i] + bias
    kw = jnp.sum(w_col * k, axis=0, keepdims=True)                      # (1, HW), VPU
    num = jnp.sum(e * kw, axis=-1, keepdims=True)                       # (TQ, 1)
    wq = jnp.sum(q * w_row, axis=-1, keepdims=True)                     # (TQ, 1)
    mask = gamma * (num * inv) + wq + bias                              # (TQ, 1)
    return e, inv, mask


def _pam_mask_kernel(scal_ref, s_ref, q_ref, wr_ref, wc_ref, att_ref, mask_ref,
                     *, exp_bf16):
    # scal_ref : SMEM (2,) = [gamma, conv_bias]
    # s_ref    : (1, C, HW)   softmaxed features (keys/values) for this batch element
    # q_ref    : (1, TQ, C)   query tile ( == s[:, :, tile].T )
    # wr_ref   : (1, C)  wc_ref : (C, 1)   1x1-conv weight (both orientations)
    # att_ref  : (1, TQ, HW)  attention rows for this tile (stored bf16)
    # mask_ref : (1, TQ, 1)   mask-head output for this tile
    e, inv, mask = _pam_tile(q_ref[0], s_ref[0], wr_ref[...], wc_ref[...],
                             scal_ref[0], scal_ref[1], exp_bf16)
    # Single bf16 cast straight into the (double-buffered) output block; no separate
    # f32 attention copy is kept alive afterwards.
    att_ref[0] = (e * inv).astype(att_ref.dtype)
    mask_ref[0] = mask.astype(mask_ref.dtype)


def _pam_mask_only_kernel(scal_ref, s_ref, q_ref, wr_ref, wc_ref, mask_ref, *, exp_bf16):
    # Attention-free variant: the (TQ, HW) rows never leave VMEM and the att = e*inv
    # elementwise pass is skipped entirely (only the two row reductions remain).
    _, _, mask = _pam_tile(q_ref[0], s_ref[0], wr_ref[...], wc_ref[...],
                           scal_ref[0], scal_ref[1], exp_bf16)
    mask_ref[0] = mask.astype(mask_ref.dtype)


def pam_mask(s_flat, gamma, conv_w, conv_b, *, tq=None, att_dtype=jnp.bfloat16,
             return_attention=True, vmem_limit_bytes=None, exp_bf16=None):
    """s_flat: (B, C, HW) channel-softmaxed features.
    Returns (attention (B, HW, HW) in att_dtype or None, mask (B, HW, 1) f32)."""
    B, C, HW = s_flat.shape
    cap, vmem_default, exp_default = _pam_device_config()
    tq = _pick_tq(HW, cap) if tq is None else tq
    vmem_limit_bytes = vmem_default if vmem_limit_bytes is None else vmem_limit_bytes
    exp_bf16 = exp_default if exp_bf16 is None else exp_bf16
    assert HW % tq == 0 and tq % 8 == 0
    nq = HW // tq

    s32 = s_flat.astype(jnp.float32)
    # Tiny (B, HW, C) copy (C=4 -> ~100 KB total) so the query tile arrives in (TQ, C)
    # layout; this keeps every per-query reduction sublane-major (no in-kernel relayouts).
    sT = jnp.transpose(s32, (0, 2, 1))
    scal = jnp.stack([jnp.asarray(gamma, jnp.float32),
                      jnp.asarray(conv_b, jnp.float32)])
    w_row = jnp.reshape(conv_w.astype(jnp.float32), (1, C))
    w_col = jnp.reshape(conv_w.astype(jnp.float32), (C, 1))

    cparams = pltpu.CompilerParams(
        dimension_semantics=("parallel", "parallel"),   # megacore shards B*nq on v7x
        vmem_limit_bytes=vmem_limit_bytes)
    args = (scal, s32, sT, w_row, w_col)
    in_specs = [pl.BlockSpec(memory_space=pltpu.MemorySpace.SMEM),
                pl.BlockSpec((1, C, HW), lambda b, q: (b, 0, 0)),
                pl.BlockSpec((1, tq, C), lambda b, q: (b, q, 0)),
                pl.BlockSpec((1, C), lambda b, q: (0, 0)),
                pl.BlockSpec((C, 1), lambda b, q: (0, 0))]
    mask_spec = pl.BlockSpec((1, tq, 1), lambda b, q: (b, q, 0))
    mask_shape = jax.ShapeDtypeStruct((B, HW, 1), jnp.float32)

    if return_attention:
        att, mask = pl.pallas_call(
            functools.partial(_pam_mask_kernel, exp_bf16=exp_bf16),
            out_shape=(jax.ShapeDtypeStruct((B, HW, HW), att_dtype), mask_shape),
            grid_spec=pltpu.PrefetchScalarGridSpec(
                num_scalar_prefetch=0, grid=(B, nq),
                in_specs=in_specs,
                out_specs=[pl.BlockSpec((1, tq, HW), lambda b, q: (b, q, 0)),
                           mask_spec]),
            compiler_params=cparams,
        )(*args)
        return att, mask

    mask = pl.pallas_call(
        functools.partial(_pam_mask_only_kernel, exp_bf16=exp_bf16),
        out_shape=mask_shape,
        grid_spec=pltpu.PrefetchScalarGridSpec(
            num_scalar_prefetch=0, grid=(B, nq),
            in_specs=in_specs, out_specs=mask_spec),
        compiler_params=cparams,
    )(*args)
    return None, mask


# ------------------------------------- kernel 3: plain 1x1-conv mask head (VPU only)
def _conv1x1_kernel(scal_ref, x_ref, w_ref, out_ref):
    # x_ref: (1, C, HW)  w_ref: (C, 1)  out_ref: (1, 1, HW)   (lane-dense store)
    bias = scal_ref[0]
    out_ref[0] = (jnp.sum(x_ref[0] * w_ref[...], axis=0, keepdims=True) + bias
                  ).astype(out_ref.dtype)


def conv1x1_flat(x_flat, conv_w, conv_b):
    """x_flat: (B, C, HW) -> (B, 1, HW)."""
    B, C, HW = x_flat.shape
    scal = jnp.reshape(jnp.asarray(conv_b, jnp.float32), (1,))
    w_col = jnp.reshape(conv_w.astype(jnp.float32), (C, 1))
    return pl.pallas_call(
        _conv1x1_kernel,
        out_shape=jax.ShapeDtypeStruct((B, 1, HW), jnp.float32),
        grid_spec=pltpu.PrefetchScalarGridSpec(
            num_scalar_prefetch=0, grid=(B,),
            in_specs=[pl.BlockSpec(memory_space=pltpu.MemorySpace.SMEM),
                      pl.BlockSpec((1, C, HW), lambda b: (b, 0, 0)),
                      pl.BlockSpec((C, 1), lambda b: (0, 0))],
            out_specs=pl.BlockSpec((1, 1, HW), lambda b: (b, 0, 0))),
        compiler_params=pltpu.CompilerParams(dimension_semantics=("parallel",)),
    )(scal, x_flat.astype(jnp.float32), w_col)


def conv1x1(x, conv_w, conv_b):
    B, C, H, W = x.shape
    out = conv1x1_flat(x.reshape(B, C, H * W), conv_w, conv_b)
    return out.reshape(B, 1, H, W)


# ------------------------------------------------------------------- module wrapper
class MaskHeadPallas:
    def __init__(self, num_classes, with_pam=False, gamma=0.0, key=None,
                 att_dtype=jnp.bfloat16):
        self.att_size = ATT_MAP_SIZE[num_classes]
        self.with_pam = with_pam
        self.att_dtype = att_dtype   # bf16 halves the dominant attention HBM writeback
        key = jax.random.PRNGKey(42) if key is None else key
        kw_, kb_ = jax.random.split(key)
        # nn.Conv2d(num_classes, 1, kernel_size=1, bias=True): weight (1,C,1,1), bias (1,)
        bound = 1.0 / np.sqrt(num_classes)
        self.conv_w = jax.random.uniform(kw_, (num_classes,), jnp.float32, -bound, bound)
        self.conv_b = jax.random.uniform(kb_, (), jnp.float32, -bound, bound)
        # PAM.gamma is nn.Parameter(torch.zeros(1)) in PyTorch -> default 0.0 here;
        # the demo overrides it to a trained-like value to exercise the attention path.
        self.gamma = float(gamma)

    def __call__(self, x, need_attention=True):
        if not self.with_pam:
            return conv1x1(x, self.conv_w, self.conv_b), None

        B = x.shape[0]
        Hout, Wout = self.att_size
        # bilinear (align_corners=True) resize + softmax(dim=1) -> (B, C, Hout*Wout)
        s_flat = resize_and_channel_softmax(x, self.att_size)

        # PAM's `if self.gamma < -0.01` is a trace-time branch on a concrete parameter.
        # TODO(synk): if gamma ever becomes a traced/learned tensor, switch to lax.cond.
        if self.gamma < -0.01:
            mask = conv1x1_flat(s_flat, self.conv_w, self.conv_b).reshape(B, 1, Hout, Wout)
            return mask, None

        att, mask_flat = pam_mask(s_flat, self.gamma, self.conv_w, self.conv_b,
                                  att_dtype=self.att_dtype,
                                  return_attention=need_attention)
        mask = mask_flat.reshape(B, 1, Hout, Wout)
        return mask, att


# ---------------------------------------------------------------- pure-JAX reference
def reference_with_pam(x, att_size, gamma, conv_w, conv_b):
    B, C, H, W = x.shape
    Hout, Wout = att_size
    mh = jnp.asarray(_bilinear_matrix(H, Hout))
    mw = jnp.asarray(_bilinear_matrix(W, Wout))
    xi = jnp.einsum('oh,bchw,pw->bcop', mh, x, mw)
    s = jax.nn.softmax(xi, axis=1)
    HW = Hout * Wout
    v = s.reshape(B, C, HW)
    energy = jnp.einsum('bci,bcj->bij', v, v)
    att = jax.nn.softmax(energy, axis=-1)
    out = jnp.einsum('bcj,bij->bci', v, att).reshape(B, C, Hout, Wout)
    feat = gamma * out + s
    mask = jnp.einsum('c,bchw->bhw', conv_w, feat)[:, None] + conv_b
    return mask, att


if __name__ == "__main__":
    key = jax.random.PRNGKey(0)
    x = jax.random.normal(key, (2, 4, 16, 16), dtype=jnp.float32)   # B=2, C=num_classes=4

    # --- with_pam=True path: resize -> PAM attention -> fused 1x1-conv mask head ---
    # PyTorch initializes gamma to 0 (attention contributes nothing to the mask); use a
    # trained-like nonzero gamma so the fused attention-weighted residual is exercised.
    head_pam = MaskHeadPallas(num_classes=4, with_pam=True, gamma=0.5)
    mask, att = head_pam(x)
    mask, att = jax.block_until_ready((mask, att))

    assert mask.shape == (2, 1, 56, 56)
    assert att.shape == (2, 56 * 56, 56 * 56)
    att32 = att.astype(jnp.float32)
    assert bool(jnp.all(jnp.isfinite(mask))) and bool(jnp.all(jnp.isfinite(att32)))
    assert bool(jnp.allclose(jnp.sum(att32, axis=-1), 1.0, atol=1e-2))

    ref_mask, ref_att = reference_with_pam(x, head_pam.att_size, head_pam.gamma,
                                           head_pam.conv_w, head_pam.conv_b)
    # attention is stored in bf16 (halves the dominant HBM writeback) -> bf16 tolerance
    assert bool(jnp.allclose(att32, ref_att, atol=1e-2))
    assert bool(jnp.allclose(mask, ref_mask, atol=5e-2, rtol=5e-2))

    # --- attention-free fast path (caller does not need the full attention map) ---
    mask_nf, att_nf = head_pam(x, need_attention=False)
    mask_nf = jax.block_until_ready(mask_nf)
    assert att_nf is None and mask_nf.shape == (2, 1, 56, 56)
    assert bool(jnp.allclose(mask_nf, ref_mask, atol=5e-2, rtol=5e-2))

    # --- with_pam=False path: just the 1x1-conv mask head ---
    head_plain = MaskHeadPallas(num_classes=4, with_pam=False)
    mask2, att2 = head_plain(x)
    mask2 = jax.block_until_ready(mask2)
    assert mask2.shape == (2, 1, 16, 16) and att2 is None
    ref_mask2 = jnp.einsum('c,bchw->bhw', head_plain.conv_w, x)[:, None] + head_plain.conv_b
    assert bool(jnp.allclose(mask2, ref_mask2, atol=5e-2, rtol=5e-2))

    print("KERNEL_OK")
</pallas_src>

<mosaic_0001>
module attributes {stable_mosaic.version = 11 : i64} {
  func.func @_resize_softmax_kernel(%arg0: i32, %arg1: memref<1x4x256xf32, #tpu.memory_space<vmem>>, %arg2: memref<256x3136xf32, #tpu.memory_space<vmem>>, %arg3: memref<1x4x3136xf32, #tpu.memory_space<vmem>>) attributes {dimension_semantics = [#tpu.dimension_semantics<parallel>], iteration_bounds = array<i64: 2>, scalar_prefetch = 0 : i64, scratch_operands = 0 : i64, tpu.core_type = #tpu.core_type<tc>, window_params = [{transform_indices = @transform_0, window_bounds = array<i64: 1, 4, 256>}, {pipeline_mode = #tpu.pipeline_mode<synchronous>, transform_indices = @transform_1, window_bounds = array<i64: 256, 3136>}, {transform_indices = @transform_2, window_bounds = array<i64: 1, 4, 3136>}]} {
    %c0 = arith.constant 0 : index
    %c0_0 = arith.constant 0 : index
    %c0_1 = arith.constant 0 : index
    %0 = vector.load %arg1[%c0, %c0_0, %c0_1] : memref<1x4x256xf32, #tpu.memory_space<vmem>>, vector<1x4x256xf32>
    %1 = vector.shape_cast %0 : vector<1x4x256xf32> to vector<4x256xf32>
    %c0_2 = arith.constant 0 : index
    %c0_3 = arith.constant 0 : index
    %2 = vector.load %arg2[%c0_2, %c0_3] : memref<256x3136xf32, #tpu.memory_space<vmem>>, vector<256x3136xf32>
    %cst = arith.constant dense<0.000000e+00> : vector<4x3136xf32>
    %3 = tpu.matmul %1, %2, %cst {dimension_numbers = #tpu.dot_dimension_numbers<[1], [0], [0], [1], [0, 0, 1, 1], [], []>} : vector<4x256xf32>, vector<256x3136xf32>, vector<4x3136xf32> -> vector<4x3136xf32>
    %cst_4 = arith.constant dense<0xFF800000> : vector<3136xf32>
    %4 = vector.multi_reduction <maximumf>, %3, %cst_4 [0] : vector<4x3136xf32> to vector<3136xf32>
    %5 = vector.shape_cast %4 : vector<3136xf32> to vector<1x3136xf32>
    %6 = vector.broadcast %5 : vector<1x3136xf32> to vector<4x3136xf32>
    %7 = arith.subf %3, %6 : vector<4x3136xf32>
    %8 = math.exp %7 : vector<4x3136xf32>
    %cst_5 = arith.constant dense<0.000000e+00> : vector<3136xf32>
    %9 = vector.multi_reduction <add>, %8, %cst_5 [0] : vector<4x3136xf32> to vector<3136xf32>
    %10 = vector.shape_cast %9 : vector<3136xf32> to vector<1x3136xf32>
    %cst_6 = arith.constant 1.000000e+00 : f32
    %11 = vector.broadcast %cst_6 : f32 to vector<1x3136xf32>
    %12 = arith.divf %11, %10 : vector<1x3136xf32>
    %13 = vector.broadcast %12 : vector<1x3136xf32> to vector<4x3136xf32>
    %14 = arith.mulf %8, %13 : vector<4x3136xf32>
    %c0_7 = arith.constant 0 : index
    %c0_8 = arith.constant 0 : index
    %c0_9 = arith.constant 0 : index
    %15 = vector.load %arg3[%c0_7, %c0_8, %c0_9] : memref<1x4x3136xf32, #tpu.memory_space<vmem>>, vector<1x4x3136xf32>
    %16 = vector.shape_cast %15 : vector<1x4x3136xf32> to vector<4x3136xf32>
    %17 = vector.shape_cast %14 : vector<4x3136xf32> to vector<1x4x3136xf32>
    tpu.vector_store %arg3[%c0_7, %c0_8, %c0_9], %17 {strides = array<i32>} : memref<1x4x3136xf32, #tpu.memory_space<vmem>>, vector<1x4x3136xf32>,
    return
  }
  func.func @transform_0(%arg0: i32) -> (i32, i32, i32) {
    %c0_i32 = arith.constant 0 : i32
    %c0_i32_0 = arith.constant 0 : i32
    %c0_i32_1 = arith.constant 0 : i32
    return %arg0, %c0_i32, %c0_i32_0 : i32, i32, i32
  }
  func.func @transform_1(%arg0: i32) -> (i32, i32) {
    %c0_i32 = arith.constant 0 : i32
    %c0_i32_0 = arith.constant 0 : i32
    %c0_i32_1 = arith.constant 0 : i32
    return %c0_i32, %c0_i32_0 : i32, i32
  }
  func.func @transform_2(%arg0: i32) -> (i32, i32, i32) {
    %c0_i32 = arith.constant 0 : i32
    %c0_i32_0 = arith.constant 0 : i32
    %c0_i32_1 = arith.constant 0 : i32
    return %arg0, %c0_i32, %c0_i32_0 : i32, i32, i32
  }
}

</mosaic_0001>

<bundles_post_ra>
// kernel: tpu_custom_call.1
= control target key start
LH: loop header
LB: loop body
LE: loop exit
PB: predicated region body
PF: predicated region fallthrough
CT: control target
= control target key end

     0   :  { %7 = vsyncpa [#allocation3], 0  ;;  %s6388_s0 = inlined_call_operand.vmem [shape: f32[2,4,256], index: 0, kind: input, shape index: {}]   ;;  %s6389_s1 = inlined_call_operand.vmem [shape: f32[256,3136], index: 1, kind: input, shape index: {}]   ;;  %s6390_s2 = inlined_call_operand.hbm [shape: f32[2,4,3136], index: 2, kind: output, shape index: {}]  }
   0x1   :  { %9 = vsyncpa [#allocation3 + $0x1], 0  ;;  %s3161_s9 = smov 0   ;;  %s3163_s10 = smov 0  }
   0x2   :  { %s3165_s11 = smov 0   ;;  %s3167_s12 = smov 0  }
   0x3 LB: > { %s3182_s13 = sadd.s32 4294967295, %s3144_s12   ;;  %s2925_s14 = sadd.s32 4294967294, %s3144_s12   ;;  %s3144_s12 = sphi %s3167_s12, %s6458_s12   ;;  %s3140_s11 = sphi %s3165_s11, %s6457_s11   ;;  %s3136_s10 = sphi %s3163_s10, %s6456_s10   ;;  %s3132_s9 = sphi %s3161_s9, %s6455_s9  }
   0x4   : > { %s3186_s15 = sadd.s32 1, %s3144_s12   ;;  %s69_s16 = sadd.s32 1, %s3140_s11 }
   0x5   : > { %s66_s17 = ssub.s32 %s3144_s12, %s3186_s15  ;;  %p79_p0 = scmp.ne.s32.totalorder %s3140_s11, %s3136_s10 }
   0x6   : > { %p67_p1 = scmp.eq.s32.totalorder %s66_s17, 0  ;;  %p80_p2 = scmp.eq.s32.totalorder %s3182_s13, 1 }
   0x7   : > { %p85_p3 = scmp.ne.s32.totalorder %s3136_s10, %s3132_s9  ;;  %p86_p4 = scmp.eq.s32.totalorder %s2925_s14, 1 }
   0x8   : > { %s3197_s18 = scalar_select %p67_p1, %s3140_s11, %s69_s16  }
   0x9   : > { %p3199_p5 = por %p80_p2, %p79_p0  ;;  %p3203_p6 = por %p86_p4, %p85_p3 }
   0xa   : > { %p2928_p7 = scmp.ge.s32.totalorder %s3144_s12, 1  ;;  %p115_p8 = scmp.lt.s32.totalorder %s3144_s12, 3 }
   0xc   : > { %p116_p9 = pnand %p2928_p7, %p115_p8 }
   0xd   : > { %p137_p10 = scmp.lt.s32.totalorder (!%p116_p9), %s3182_s13, 1  ;;  %s134_s16 = sand.u32 (!%p116_p9), 1, %s3136_s10  }
   0xe   : > { %119 = sbr.rel (%p116_p9) target bundleno = 646 (0x286), region = 28  ;;  %s3102_s21 = scalar_lea.hbm (!%p116_p9), %s6390_s2, 200 }
   0xf   : > { %s4597_s3 = smul.u32 (!%p116_p9), 100, %s134_s16 }
  0x11   : > { %s4656_s26 = scalar_lea.vmem (!%p116_p9), [#allocation2], %s4597_s3 }
  0x12   : > { %s2863_s30 = sshll.u32 (!%p116_p9), %s4656_s26, 4  ;;  %s2864_s30 = int_to_ptr.vmem [resolvable:$true] %s2863_s30 }
  0x13   : > { %v518_v0 = vld [vmem:[%s6389_s1 + $0xbb8] sm:$0xff]  ;;  %v519_v2 = vld [vmem:[%s6389_s1 + $0xbc0] sm:$0xff]  ;;  %v493_v4 = vld [vmem:[%s6389_s1 + $0xaf0] sm:$0xff]  ;;  %s3297_s17 = scalar_select %p137_p10, %s3182_s13, 1  ;;  %vm1949_vm0 = vcmask 1043456  }
  0x14   : > { %v918_v1 = vld [vmem:[%s6389_s1 + $0x1838] sm:$0xff]  ;;  %949 = vmatpush.msra.mxu0 %v518_v0  ;;  %v919_v3 = vld [vmem:[%s6389_s1 + $0x1840] sm:$0xff]  ;;  %v893_v5 = vld [vmem:[%s6389_s1 + $0x1770] sm:$0xff]  ;;  %989 = vmatpush.msra.mxu2 %v519_v2 }
  0x15   : > { %969 = vmatpush.msra.mxu1 %v918_v1  ;;  %1009 = vmatpush.msra.mxu3 %v919_v3  ;;  %v494_v6 = vld [vmem:[%s6389_s1 + $0xaf8] sm:$0xff]  ;;  %v468_v8 = vld [vmem:[%s6389_s1 + $0xa28] sm:$0xff]  ;;  %v469_v10 = vld [vmem:[%s6389_s1 + $0xa30] sm:$0xff]  ;;  %s2934_s14 = sshll.u32 %s3297_s17, 3  ;;  %s2936_s17 = smul.u32 100, %s3182_s13 }
  0x16   : > { %v894_v7 = vld [vmem:[%s6389_s1 + $0x1778] sm:$0xff]  ;;  %950 = vmatpush.msra.mxu0 %v493_v4  ;;  %v868_v9 = vld [vmem:[%s6389_s1 + $0x16a8] sm:$0xff]  ;;  %v869_v11 = vld [vmem:[%s6389_s1 + $0x16b0] sm:$0xff]  ;;  %990 = vmatpush.msra.mxu2 %v494_v6  ;;  %s141_s5 = scalar_lea.vmem %s6388_s0, %s2934_s14  ;;  %s2850_s13 = scalar_lea.sflag [#allocation3], %s134_s16 }
  0x17   : > { %970 = vmatpush.msra.mxu1 %v893_v5  ;;  %1010 = vmatpush.msra.mxu3 %v894_v7  ;;  %v443_v12 = vld [vmem:[%s6389_s1 + $0x960] sm:$0xff]  ;;  %v444_v14 = vld [vmem:[%s6389_s1 + $0x968] sm:$0xff]  ;;  %v418_v16 = vld [vmem:[%s6389_s1 + $0x898] sm:$0xff]  ;;  %s2861_s3 = scalar_lea.hbm %s6390_s2, %s2936_s17 }
  0x18   : > { %v843_v13 = vld [vmem:[%s6389_s1 + $0x15e0] sm:$0xff]  ;;  %951 = vmatpush.msra.mxu0 %v468_v8  ;;  %v844_v15 = vld [vmem:[%s6389_s1 + $0x15e8] sm:$0xff]  ;;  %991 = vmatpush.msra.mxu2 %v469_v10  ;;  %v818_v17 = vld [vmem:[%s6389_s1 + $0x1518] sm:$0xff]  ;;  %s2865_s4 = sshll.u32 %s2861_s3, 4  ;;  %s2866_s4 = int_to_ptr.hbm [resolvable:$true] %s2865_s4 }
  0x19   : > { %971 = vmatpush.msra.mxu1 %v868_v9  ;;  %1011 = vmatpush.msra.mxu3 %v869_v11  ;;  %v419_v18 = vld [vmem:[%s6389_s1 + $0x8a0] sm:$0xff]  ;;  %v393_v20 = vld [vmem:[%s6389_s1 + $0x7d0] sm:$0xff]  ;;  %v394_v22 = vld [vmem:[%s6389_s1 + $0x7d8] sm:$0xff]  ;;  %s3096_s6 = sshra.s32 %s2866_s4, 4  ;;  %s3097_s6 = int_to_ptr.hbm [resolvable:$true] %s3096_s6 }
  0x1a   : > { %952 = vmatpush.msra.mxu0 %v443_v12  ;;  %v819_v19 = vld [vmem:[%s6389_s1 + $0x1520] sm:$0xff]  ;;  %992 = vmatpush.msra.mxu2 %v444_v14  ;;  %v793_v21 = vld [vmem:[%s6389_s1 + $0x1450] sm:$0xff]  ;;  %v794_v23 = vld [vmem:[%s6389_s1 + $0x1458] sm:$0xff]  ;;  %s3098_s7 = scalar_lea.hbm %s3097_s6, 100  ;;  %p3103_p0 = scmp.lt.s32.totalorder %s3097_s6, %s6390_s2 }
  0x1b   : > { %972 = vmatpush.msra.mxu1 %v843_v13  ;;  %1012 = vmatpush.msra.mxu3 %v844_v15  ;;  %v368_v24 = vld [vmem:[%s6389_s1 + $0x708] sm:$0xff]  ;;  %v369_v26 = vld [vmem:[%s6389_s1 + $0x710] sm:$0xff]  ;;  %v343_v28 = vld [vmem:[%s6389_s1 + $0x640] sm:$0xff]  ;;  %p3099_p11 = scmp.ne.s32.totalorder %s3097_s6, %s3098_s7  ;;  %p3104_p1 = scmp.lt.s32.totalorder %s3102_s21, %s3098_s7 }
  0x1c   : > { %953 = vmatpush.msra.mxu0 %v418_v16  ;;  %993 = vmatpush.msra.mxu2 %v419_v18  ;;  %v768_v25 = vld [vmem:[%s6389_s1 + $0x1388] sm:$0xff]  ;;  %v769_v27 = vld [vmem:[%s6389_s1 + $0x1390] sm:$0xff]  ;;  %v743_v29 = vld [vmem:[%s6389_s1 + $0x12c0] sm:$0xff] }
  0x1d   : > { %973 = vmatpush.msra.mxu1 %v818_v17  ;;  %1013 = vmatpush.msra.mxu3 %v819_v19  ;;  %v344_v30 = vld [vmem:[%s6389_s1 + $0x648] sm:$0xff]  ;;  %v318_v32 = vld [vmem:[%s6389_s1 + $0x578] sm:$0xff]  ;;  %v319_v34 = vld [vmem:[%s6389_s1 + $0x580] sm:$0xff]  ;;  %p3100_p12 = pnand %p3099_p11, %p3199_p5  ;;  %p3105_p2 = por %p3104_p1, %p3103_p0 }
  0x1e   : > { %954 = vmatpush.msra.mxu0 %v393_v20  ;;  %994 = vmatpush.msra.mxu2 %v394_v22  ;;  %v744_v31 = vld [vmem:[%s6389_s1 + $0x12c8] sm:$0xff]  ;;  %v718_v33 = vld [vmem:[%s6389_s1 + $0x11f8] sm:$0xff]  ;;  %v719_v35 = vld [vmem:[%s6389_s1 + $0x1200] sm:$0xff] }
  0x1f   : > { %974 = vmatpush.msra.mxu1 %v793_v21  ;;  %1014 = vmatpush.msra.mxu3 %v794_v23  ;;  %v293_v36 = vld [vmem:[%s6389_s1 + $0x4b0] sm:$0xff]  ;;  %v294_v38 = vld [vmem:[%s6389_s1 + $0x4b8] sm:$0xff]  ;;  %v268_v40 = vld [vmem:[%s6389_s1 + $0x3e8] sm:$0xff]  ;;  %p3101_p13 = pneg %p3100_p12 }
  0x20   : > { %955 = vmatpush.msra.mxu0 %v368_v24  ;;  %995 = vmatpush.msra.mxu2 %v369_v26  ;;  %v693_v37 = vld [vmem:[%s6389_s1 + $0x1130] sm:$0xff]  ;;  %v694_v39 = vld [vmem:[%s6389_s1 + $0x1138] sm:$0xff]  ;;  %v668_v41 = vld [vmem:[%s6389_s1 + $0x1068] sm:$0xff] }
  0x21   : > { %975 = vmatpush.msra.mxu1 %v768_v25  ;;  %1015 = vmatpush.msra.mxu3 %v769_v27  ;;  %v269_v42 = vld [vmem:[%s6389_s1 + $0x3f0] sm:$0xff]  ;;  %v243_v44 = vld [vmem:[%s6389_s1 + $0x320] sm:$0xff]  ;;  %v244_v46 = vld [vmem:[%s6389_s1 + $0x328] sm:$0xff]  ;;  %p3106_p3 = pnand %p3105_p2, %p3101_p13 }
  0x22   : > { %956 = vmatpush.msra.mxu0 %v343_v28  ;;  %996 = vmatpush.msra.mxu2 %v344_v30  ;;  %v669_v43 = vld [vmem:[%s6389_s1 + $0x1070] sm:$0xff]  ;;  %v643_v45 = vld [vmem:[%s6389_s1 + $0xfa0] sm:$0xff]  ;;  %v644_v47 = vld [vmem:[%s6389_s1 + $0xfa8] sm:$0xff] }
  0x23   : > { %976 = vmatpush.msra.mxu1 %v743_v29  ;;  %1016 = vmatpush.msra.mxu3 %v744_v31  ;;  %v142_v48 = vld [vmem:[%s141_s5] sm:$0xff]  ;;  %v218_v49 = vld [vmem:[%s6389_s1 + $0x258] sm:$0xff]  ;;  %v193_v53 = vld [vmem:[%s6389_s1 + $0x190] sm:$0xff] }
  0x24   : > { %957 = vmatpush.msra.mxu0 %v318_v32  ;;  %997 = vmatpush.msra.mxu2 %v319_v34  ;;  %v618_v50 = vld [vmem:[%s6389_s1 + $0xed8] sm:$0xff]  ;;  %944 = vst [vmem:[#allocation1] ss:$2 sm:$0xff] %v142_v48  ;;  %v219_v51 = vld [vmem:[%s6389_s1 + $0x260] sm:$0xff]  ;;  %v593_v54 = vld [vmem:[%s6389_s1 + $0xe10] sm:$0xff] }
  0x25   : > { %977 = vmatpush.msra.mxu1 %v718_v33  ;;  %1017 = vmatpush.msra.mxu3 %v719_v35  ;;  %v619_v52 = vld [vmem:[%s6389_s1 + $0xee0] sm:$0xff]  ;;  %v194_v55 = vld [vmem:[%s6389_s1 + $0x198] sm:$0xff]  ;;  %v168_v57 = vld [vmem:[%s6389_s1 + $0xc8] sm:$0xff] }
  0x26   : > { %958 = vmatpush.msra.mxu0 %v293_v36  ;;  %998 = vmatpush.msra.mxu2 %v294_v38  ;;  %v594_v56 = vld [vmem:[%s6389_s1 + $0xe18] sm:$0xff]  ;;  %v568_v58 = vld [vmem:[%s6389_s1 + $0xd48] sm:$0xff]  ;;  %v169_v59 = vld [vmem:[%s6389_s1 + $0xd0] sm:$0xff] }
  0x27   : > { %978 = vmatpush.msra.mxu1 %v693_v37  ;;  %1018 = vmatpush.msra.mxu3 %v694_v39  ;;  %v569_v60 = vld [vmem:[%s6389_s1 + $0xd50] sm:$0xff]  ;;  %v143_v61 = vld [vmem:[%s6389_s1] sm:$0xff]  ;;  %v144_v63 = vld [vmem:[%s6389_s1 + $0x8] sm:$0xff] }
  0x28   : > { %959 = vmatpush.msra.mxu0 %v268_v40  ;;  %999 = vmatpush.msra.mxu2 %v269_v42  ;;  %v543_v62 = vld [vmem:[%s6389_s1 + $0xc80] sm:$0xff]  ;;  %v544_v0 = vld [vmem:[%s6389_s1 + $0xc88] sm:$0xff]  ;;  %v521_v5 = vld [vmem:[%s6389_s1 + $0xbd0] sm:$0xff] }
  0x29   : > { %979 = vmatpush.msra.mxu1 %v668_v41  ;;  %1019 = vmatpush.msra.mxu3 %v669_v43  ;;  %v520_v3 = vld [vmem:[%s6389_s1 + $0xbc8] sm:$0xff]  ;;  %v921_v6 = vld [vmem:[%s6389_s1 + $0x1850] sm:$0xff]  ;;  %v495_v7 = vld [vmem:[%s6389_s1 + $0xb00] sm:$0xff] }
  0x2a   : > { %960 = vmatpush.msra.mxu0 %v243_v44  ;;  %1000 = vmatpush.msra.mxu2 %v244_v46  ;;  %v920_v4 = vld [vmem:[%s6389_s1 + $0x1848] sm:$0xff]  ;;  %v895_v8 = vld [vmem:[%s6389_s1 + $0x1780] sm:$0xff]  ;;  %v470_v11 = vld [vmem:[%s6389_s1 + $0xa38] sm:$0xff] }
  0x2b   : > { %980 = vmatpush.msra.mxu1 %v643_v45  ;;  %1020 = vmatpush.msra.mxu3 %v644_v47  ;;  %v3411_v1 = vld.sshfl [vmem:[#allocation1] sm:$0xff pattern:$0x75316420]  ;;  %v3413_v2 = vld.sshfl [vmem:[#allocation1 + $0x8] sm:$0xff pattern:$0x75316420] }
  0x2c   : > { %961 = vmatpush.msra.mxu0 %v218_v49  ;;  %1001 = vmatpush.msra.mxu2 %v219_v51  ;;  %v496_v9 = vld [vmem:[%s6389_s1 + $0xb08] sm:$0xff]  ;;  %v870_v12 = vld [vmem:[%s6389_s1 + $0x16b8] sm:$0xff]  ;;  %v471_v13 = vld [vmem:[%s6389_s1 + $0xa40] sm:$0xff] }
  0x2d   : > { %981 = vmatpush.msra.mxu1 %v618_v50  ;;  %1021 = vmatpush.msra.mxu3 %v619_v52  ;;  %v896_v10 = vld [vmem:[%s6389_s1 + $0x1788] sm:$0xff]  ;;  %v871_v14 = vld [vmem:[%s6389_s1 + $0x16c0] sm:$0xff]  ;;  %v445_v15 = vld [vmem:[%s6389_s1 + $0x970] sm:$0xff] }
  0x2e   : > { %962 = vmatpush.msra.mxu0 %v193_v53  ;;  %1002 = vmatpush.msra.mxu2 %v194_v55  ;;  %v845_v16 = vld [vmem:[%s6389_s1 + $0x15f0] sm:$0xff]  ;;  %v446_v17 = vld [vmem:[%s6389_s1 + $0x978] sm:$0xff]  ;;  %v420_v19 = vld [vmem:[%s6389_s1 + $0x8a8] sm:$0xff] }
  0x2f   : > { %982 = vmatpush.msra.mxu1 %v593_v54  ;;  %1022 = vmatpush.msra.mxu3 %v594_v56  ;;  %v846_v18 = vld [vmem:[%s6389_s1 + $0x15f8] sm:$0xff]  ;;  %v820_v20 = vld [vmem:[%s6389_s1 + $0x1528] sm:$0xff]  ;;  %v421_v21 = vld [vmem:[%s6389_s1 + $0x8b0] sm:$0xff] }
  0x30   : > { %963 = vmatpush.msra.mxu0 %v168_v57  ;;  %1003 = vmatpush.msra.mxu2 %v169_v59  ;;  %v821_v22 = vld [vmem:[%s6389_s1 + $0x1530] sm:$0xff]  ;;  %v395_v23 = vld [vmem:[%s6389_s1 + $0x7e0] sm:$0xff]  ;;  %v396_v25 = vld [vmem:[%s6389_s1 + $0x7e8] sm:$0xff] }
  0x31   : > { %983 = vmatpush.msra.mxu1 %v568_v58  ;;  %1023 = vmatpush.msra.mxu3 %v569_v60  ;;  %v795_v24 = vld [vmem:[%s6389_s1 + $0x1460] sm:$0xff]  ;;  %v796_v26 = vld [vmem:[%s6389_s1 + $0x1468] sm:$0xff]  ;;  %v370_v27 = vld [vmem:[%s6389_s1 + $0x718] sm:$0xff] }
  0x32   : > { %964 = vmatpush.msra.mxu0 %v143_v61  ;;  %1004 = vmatpush.msra.mxu2 %v144_v63  ;;  %v770_v28 = vld [vmem:[%s6389_s1 + $0x1398] sm:$0xff]  ;;  %v371_v29 = vld [vmem:[%s6389_s1 + $0x720] sm:$0xff]  ;;  %v345_v31 = vld [vmem:[%s6389_s1 + $0x650] sm:$0xff] }
  0x33   : > { %984 = vmatpush.msra.mxu1 %v543_v62  ;;  %1024 = vmatpush.msra.mxu3 %v544_v0  ;;  %v771_v30 = vld [vmem:[%s6389_s1 + $0x13a0] sm:$0xff]  ;;  %v745_v32 = vld [vmem:[%s6389_s1 + $0x12d0] sm:$0xff]  ;;  %v346_v33 = vld [vmem:[%s6389_s1 + $0x658] sm:$0xff] }
  0x34   : > { %965 = vmatmul.f32.vlgmr.msra.gmra.mxu0 %v3411_v1  ;;  %985 = vmatmul.f32.vlgmr.msra.gmra.mxu1 %v3413_v2  ;;  %v746_v34 = vld [vmem:[%s6389_s1 + $0x12d8] sm:$0xff]  ;;  %v320_v35 = vld [vmem:[%s6389_s1 + $0x588] sm:$0xff]  ;;  %v321_v37 = vld [vmem:[%s6389_s1 + $0x590] sm:$0xff] }
  0x35   : > { %1005 = vmatmul.f32.vlgmr.msra.gmra.mxu2 %v3411_v1  ;;  %1025 = vmatmul.f32.vlgmr.msra.gmra.mxu3 %v3413_v2  ;;  %v720_v36 = vld [vmem:[%s6389_s1 + $0x1208] sm:$0xff]  ;;  %v721_v38 = vld [vmem:[%s6389_s1 + $0x1210] sm:$0xff]  ;;  %v295_v39 = vld [vmem:[%s6389_s1 + $0x4c0] sm:$0xff] }
  0x36   : > { %1029 = vmatpush.msrb.mxu0 %v520_v3  ;;  %1049 = vmatpush.msrb.mxu1 %v920_v4  ;;  %v695_v40 = vld [vmem:[%s6389_s1 + $0x1140] sm:$0xff]  ;;  %v296_v41 = vld [vmem:[%s6389_s1 + $0x4c8] sm:$0xff]  ;;  %v270_v43 = vld [vmem:[%s6389_s1 + $0x3f8] sm:$0xff] }
  0x37   : > { %1069 = vmatpush.msrb.mxu2 %v521_v5  ;;  %1089 = vmatpush.msrb.mxu3 %v921_v6  ;;  %v696_v42 = vld [vmem:[%s6389_s1 + $0x1148] sm:$0xff]  ;;  %v670_v44 = vld [vmem:[%s6389_s1 + $0x1078] sm:$0xff]  ;;  %v271_v45 = vld [vmem:[%s6389_s1 + $0x400] sm:$0xff] }
  0x38   : > { %1030 = vmatpush.msrb.mxu0 %v495_v7  ;;  %1050 = vmatpush.msrb.mxu1 %v895_v8  ;;  %v671_v46 = vld [vmem:[%s6389_s1 + $0x1080] sm:$0xff]  ;;  %v245_v47 = vld [vmem:[%s6389_s1 + $0x330] sm:$0xff]  ;;  %v246_v49 = vld [vmem:[%s6389_s1 + $0x338] sm:$0xff] }
  0x39   : > { %1070 = vmatpush.msrb.mxu2 %v496_v9  ;;  %1090 = vmatpush.msrb.mxu3 %v896_v10  ;;  %v645_v48 = vld [vmem:[%s6389_s1 + $0xfb0] sm:$0xff]  ;;  %v646_v50 = vld [vmem:[%s6389_s1 + $0xfb8] sm:$0xff]  ;;  %v220_v51 = vld [vmem:[%s6389_s1 + $0x268] sm:$0xff] }
  0x3a   : > { %1031 = vmatpush.msrb.mxu0 %v470_v11  ;;  %1051 = vmatpush.msrb.mxu1 %v870_v12  ;;  %v620_v52 = vld [vmem:[%s6389_s1 + $0xee8] sm:$0xff]  ;;  %v221_v53 = vld [vmem:[%s6389_s1 + $0x270] sm:$0xff]  ;;  %v195_v55 = vld [vmem:[%s6389_s1 + $0x1a0] sm:$0xff] }
  0x3b   : > { %1071 = vmatpush.msrb.mxu2 %v471_v13  ;;  %1091 = vmatpush.msrb.mxu3 %v871_v14  ;;  %v621_v54 = vld [vmem:[%s6389_s1 + $0xef0] sm:$0xff]  ;;  %v595_v56 = vld [vmem:[%s6389_s1 + $0xe20] sm:$0xff]  ;;  %v196_v57 = vld [vmem:[%s6389_s1 + $0x1a8] sm:$0xff] }
  0x3c   : > { %1032 = vmatpush.msrb.mxu0 %v445_v15  ;;  %1052 = vmatpush.msrb.mxu1 %v845_v16  ;;  %v596_v58 = vld [vmem:[%s6389_s1 + $0xe28] sm:$0xff]  ;;  %v170_v59 = vld [vmem:[%s6389_s1 + $0xd8] sm:$0xff]  ;;  %v171_v61 = vld [vmem:[%s6389_s1 + $0xe0] sm:$0xff] }
  0x3d   : > { %1072 = vmatpush.msrb.mxu2 %v446_v17  ;;  %1092 = vmatpush.msrb.mxu3 %v846_v18  ;;  %v570_v60 = vld [vmem:[%s6389_s1 + $0xd58] sm:$0xff]  ;;  %v571_v62 = vld [vmem:[%s6389_s1 + $0xd60] sm:$0xff]  ;;  %v145_v63 = vld [vmem:[%s6389_s1 + $0x10] sm:$0xff] }
  0x3e   : > { %1033 = vmatpush.msrb.mxu0 %v420_v19  ;;  %1053 = vmatpush.msrb.mxu1 %v820_v20  ;;  %v545_v0 = vld [vmem:[%s6389_s1 + $0xc90] sm:$0xff]  ;;  %v146_v3 = vld [vmem:[%s6389_s1 + $0x18] sm:$0xff]  ;;  %v523_v7 = vld [vmem:[%s6389_s1 + $0xbe0] sm:$0xff] }
  0x3f   : > { %1073 = vmatpush.msrb.mxu2 %v421_v21  ;;  %1093 = vmatpush.msrb.mxu3 %v821_v22  ;;  %v546_v4 = vld [vmem:[%s6389_s1 + $0xc98] sm:$0xff]  ;;  %v923_v8 = vld [vmem:[%s6389_s1 + $0x1860] sm:$0xff]  ;;  %v497_v9 = vld [vmem:[%s6389_s1 + $0xb10] sm:$0xff] }
  0x40   : > { %1034 = vmatpush.msrb.mxu0 %v395_v23  ;;  %1054 = vmatpush.msrb.mxu1 %v795_v24  ;;  %v522_v5 = vld [vmem:[%s6389_s1 + $0xbd8] sm:$0xff]  ;;  %v897_v10 = vld [vmem:[%s6389_s1 + $0x1790] sm:$0xff]  ;;  %v472_v13 = vld [vmem:[%s6389_s1 + $0xa48] sm:$0xff] }
  0x41   : > { %1074 = vmatpush.msrb.mxu2 %v396_v25  ;;  %1094 = vmatpush.msrb.mxu3 %v796_v26  ;;  %v922_v6 = vld [vmem:[%s6389_s1 + $0x1858] sm:$0xff]  ;;  %v872_v14 = vld [vmem:[%s6389_s1 + $0x16c8] sm:$0xff]  ;;  %v473_v15 = vld [vmem:[%s6389_s1 + $0xa50] sm:$0xff] }
  0x42   : > { %1035 = vmatpush.msrb.mxu0 %v370_v27  ;;  %1055 = vmatpush.msrb.mxu1 %v770_v28  ;;  %v498_v11 = vld [vmem:[%s6389_s1 + $0xb18] sm:$0xff]  ;;  %v873_v16 = vld [vmem:[%s6389_s1 + $0x16d0] sm:$0xff]  ;;  %v447_v17 = vld [vmem:[%s6389_s1 + $0x980] sm:$0xff] }
  0x43   : > { %1075 = vmatpush.msrb.mxu2 %v371_v29  ;;  %1095 = vmatpush.msrb.mxu3 %v771_v30  ;;  %v898_v12 = vld [vmem:[%s6389_s1 + $0x1798] sm:$0xff]  ;;  %v847_v18 = vld [vmem:[%s6389_s1 + $0x1600] sm:$0xff]  ;;  %v448_v19 = vld [vmem:[%s6389_s1 + $0x988] sm:$0xff] }
  0x44   : > { %1036 = vmatpush.msrb.mxu0 %v345_v31  ;;  %1056 = vmatpush.msrb.mxu1 %v745_v32  ;;  %v848_v20 = vld [vmem:[%s6389_s1 + $0x1608] sm:$0xff]  ;;  %v422_v21 = vld [vmem:[%s6389_s1 + $0x8b8] sm:$0xff]  ;;  %v423_v23 = vld [vmem:[%s6389_s1 + $0x8c0] sm:$0xff] }
  0x45   : > { %1076 = vmatpush.msrb.mxu2 %v346_v33  ;;  %1096 = vmatpush.msrb.mxu3 %v746_v34  ;;  %v822_v22 = vld [vmem:[%s6389_s1 + $0x1538] sm:$0xff]  ;;  %v823_v24 = vld [vmem:[%s6389_s1 + $0x1540] sm:$0xff]  ;;  %v397_v25 = vld [vmem:[%s6389_s1 + $0x7f0] sm:$0xff] }
  0x46   : > { %1037 = vmatpush.msrb.mxu0 %v320_v35  ;;  %1057 = vmatpush.msrb.mxu1 %v720_v36  ;;  %v797_v26 = vld [vmem:[%s6389_s1 + $0x1470] sm:$0xff]  ;;  %v398_v27 = vld [vmem:[%s6389_s1 + $0x7f8] sm:$0xff]  ;;  %v372_v29 = vld [vmem:[%s6389_s1 + $0x728] sm:$0xff] }
  0x47   : > { %1077 = vmatpush.msrb.mxu2 %v321_v37  ;;  %1097 = vmatpush.msrb.mxu3 %v721_v38  ;;  %v798_v28 = vld [vmem:[%s6389_s1 + $0x1478] sm:$0xff]  ;;  %v772_v30 = vld [vmem:[%s6389_s1 + $0x13a8] sm:$0xff]  ;;  %v373_v31 = vld [vmem:[%s6389_s1 + $0x730] sm:$0xff] }
  0x48   : > { %1038 = vmatpush.msrb.mxu0 %v295_v39  ;;  %1058 = vmatpush.msrb.mxu1 %v695_v40  ;;  %v773_v32 = vld [vmem:[%s6389_s1 + $0x13b0] sm:$0xff]  ;;  %v347_v33 = vld [vmem:[%s6389_s1 + $0x660] sm:$0xff]  ;;  %v348_v35 = vld [vmem:[%s6389_s1 + $0x668] sm:$0xff] }
  0x49   : > { %1078 = vmatpush.msrb.mxu2 %v296_v41  ;;  %1098 = vmatpush.msrb.mxu3 %v696_v42  ;;  %v747_v34 = vld [vmem:[%s6389_s1 + $0x12e0] sm:$0xff]  ;;  %v748_v36 = vld [vmem:[%s6389_s1 + $0x12e8] sm:$0xff]  ;;  %v322_v37 = vld [vmem:[%s6389_s1 + $0x598] sm:$0xff] }
  0x4a   : > { %1039 = vmatpush.msrb.mxu0 %v270_v43  ;;  %1059 = vmatpush.msrb.mxu1 %v670_v44  ;;  %v722_v38 = vld [vmem:[%s6389_s1 + $0x1218] sm:$0xff]  ;;  %v323_v39 = vld [vmem:[%s6389_s1 + $0x5a0] sm:$0xff]  ;;  %v297_v41 = vld [vmem:[%s6389_s1 + $0x4d0] sm:$0xff] }
  0x4b   : > { %1079 = vmatpush.msrb.mxu2 %v271_v45  ;;  %1099 = vmatpush.msrb.mxu3 %v671_v46  ;;  %v723_v40 = vld [vmem:[%s6389_s1 + $0x1220] sm:$0xff]  ;;  %v697_v42 = vld [vmem:[%s6389_s1 + $0x1150] sm:$0xff]  ;;  %v298_v43 = vld [vmem:[%s6389_s1 + $0x4d8] sm:$0xff] }
  0x4c   : > { %1040 = vmatpush.msrb.mxu0 %v245_v47  ;;  %1060 = vmatpush.msrb.mxu1 %v645_v48  ;;  %v698_v44 = vld [vmem:[%s6389_s1 + $0x1158] sm:$0xff]  ;;  %v272_v45 = vld [vmem:[%s6389_s1 + $0x408] sm:$0xff]  ;;  %v273_v47 = vld [vmem:[%s6389_s1 + $0x410] sm:$0xff] }
  0x4d   : > { %1080 = vmatpush.msrb.mxu2 %v246_v49  ;;  %1100 = vmatpush.msrb.mxu3 %v646_v50  ;;  %v672_v46 = vld [vmem:[%s6389_s1 + $0x1088] sm:$0xff]  ;;  %v673_v48 = vld [vmem:[%s6389_s1 + $0x1090] sm:$0xff]  ;;  %v247_v49 = vld [vmem:[%s6389_s1 + $0x340] sm:$0xff] }
  0x4e   : > { %1041 = vmatpush.msrb.mxu0 %v220_v51  ;;  %1061 = vmatpush.msrb.mxu1 %v620_v52  ;;  %v647_v50 = vld [vmem:[%s6389_s1 + $0xfc0] sm:$0xff]  ;;  %v248_v51 = vld [vmem:[%s6389_s1 + $0x348] sm:$0xff] }
  0x4f   : > { %1081 = vmatpush.msrb.mxu2 %v221_v53  ;;  %1101 = vmatpush.msrb.mxu3 %v621_v54  ;;  %v648_v52 = vld [vmem:[%s6389_s1 + $0xfc8] sm:$0xff]  ;;  %v222_v53 = vld [vmem:[%s6389_s1 + $0x278] sm:$0xff] }
  0x50   : > { %1042 = vmatpush.msrb.mxu0 %v195_v55  ;;  %1062 = vmatpush.msrb.mxu1 %v595_v56  ;;  %v622_v54 = vld [vmem:[%s6389_s1 + $0xef8] sm:$0xff]  ;;  %v223_v55 = vld [vmem:[%s6389_s1 + $0x280] sm:$0xff] }
  0x51   : > { %1082 = vmatpush.msrb.mxu2 %v196_v57  ;;  %1102 = vmatpush.msrb.mxu3 %v596_v58  ;;  %v623_v56 = vld [vmem:[%s6389_s1 + $0xf00] sm:$0xff]  ;;  %v197_v57 = vld [vmem:[%s6389_s1 + $0x1b0] sm:$0xff] }
  0x52   : > { %1043 = vmatpush.msrb.mxu0 %v170_v59  ;;  %1063 = vmatpush.msrb.mxu1 %v570_v60  ;;  %v597_v58 = vld [vmem:[%s6389_s1 + $0xe30] sm:$0xff]  ;;  %v198_v59 = vld [vmem:[%s6389_s1 + $0x1b8] sm:$0xff] }
  0x53   : > { %1083 = vmatpush.msrb.mxu2 %v171_v61  ;;  %1103 = vmatpush.msrb.mxu3 %v571_v62  ;;  %v598_v60 = vld [vmem:[%s6389_s1 + $0xe38] sm:$0xff]  ;;  %v172_v61 = vld [vmem:[%s6389_s1 + $0xe8] sm:$0xff] }
  0x54   : > { %1044 = vmatpush.msrb.mxu0 %v145_v63  ;;  %1064 = vmatpush.msrb.mxu1 %v545_v0  ;;  %v572_v62 = vld [vmem:[%s6389_s1 + $0xd68] sm:$0xff]  ;;  %v173_v63 = vld [vmem:[%s6389_s1 + $0xf0] sm:$0xff] }
  0x55   : > { %1084 = vmatpush.msrb.mxu2 %v146_v3  ;;  %1104 = vmatpush.msrb.mxu3 %v546_v4  ;;  %v573_v0 = vld [vmem:[%s6389_s1 + $0xd70] sm:$0xff]  ;;  %v147_v3 = vld [vmem:[%s6389_s1 + $0x20] sm:$0xff] }
  0x56   : > { %1045 = vmatmul.f32.vlgmr.msrb.gmra.mxu0 %v3411_v1  ;;  %1065 = vmatmul.f32.vlgmr.msrb.gmra.mxu1 %v3413_v2  ;;  %v547_v4 = vld [vmem:[%s6389_s1 + $0xca0] sm:$0xff] }
  0x57   : > { %1085 = vmatmul.f32.vlgmr.msrb.gmra.mxu2 %v3411_v1  ;;  %1105 = vmatmul.f32.vlgmr.msrb.gmra.mxu3 %v3413_v2 }
  0x58   : > { %1109 = vmatpush.msra.mxu0 %v522_v5  ;;  %1129 = vmatpush.msra.mxu1 %v922_v6  ;;  %v148_v5 = vld [vmem:[%s6389_s1 + $0x28] sm:$0xff] }
  0x59   : > { %1149 = vmatpush.msra.mxu2 %v523_v7  ;;  %1169 = vmatpush.msra.mxu3 %v923_v8  ;;  %v548_v6 = vld [vmem:[%s6389_s1 + $0xca8] sm:$0xff] }
  0x5a   : > { %1110 = vmatpush.msra.mxu0 %v497_v9  ;;  %1130 = vmatpush.msra.mxu1 %v897_v10  ;;  %v524_v7 = vld [vmem:[%s6389_s1 + $0xbe8] sm:$0xff]  ;;  %v525_v9 = vld [vmem:[%s6389_s1 + $0xbf0] sm:$0xff] }
  0x5b   : > { %1150 = vmatpush.msra.mxu2 %v498_v11  ;;  %1170 = vmatpush.msra.mxu3 %v898_v12  ;;  %v924_v8 = vld [vmem:[%s6389_s1 + $0x1868] sm:$0xff]  ;;  %v925_v10 = vld [vmem:[%s6389_s1 + $0x1870] sm:$0xff]  ;;  %v499_v11 = vld [vmem:[%s6389_s1 + $0xb20] sm:$0xff] }
  0x5c   : > { %1111 = vmatpush.msra.mxu0 %v472_v13  ;;  %1131 = vmatpush.msra.mxu1 %v872_v14  ;;  %v899_v12 = vld [vmem:[%s6389_s1 + $0x17a0] sm:$0xff]  ;;  %v500_v13 = vld [vmem:[%s6389_s1 + $0xb28] sm:$0xff] }
  0x5d   : > { %1151 = vmatpush.msra.mxu2 %v473_v15  ;;  %1171 = vmatpush.msra.mxu3 %v873_v16  ;;  %v900_v14 = vld [vmem:[%s6389_s1 + $0x17a8] sm:$0xff]  ;;  %v474_v15 = vld [vmem:[%s6389_s1 + $0xa58] sm:$0xff] }
  0x5e   : > { %1112 = vmatpush.msra.mxu0 %v447_v17  ;;  %1132 = vmatpush.msra.mxu1 %v847_v18  ;;  %v874_v16 = vld [vmem:[%s6389_s1 + $0x16d8] sm:$0xff]  ;;  %v475_v17 = vld [vmem:[%s6389_s1 + $0xa60] sm:$0xff] }
  0x5f   : > { %1152 = vmatpush.msra.mxu2 %v448_v19  ;;  %1172 = vmatpush.msra.mxu3 %v848_v20  ;;  %v875_v18 = vld [vmem:[%s6389_s1 + $0x16e0] sm:$0xff]  ;;  %v449_v19 = vld [vmem:[%s6389_s1 + $0x990] sm:$0xff] }
  0x60   : > { %1113 = vmatpush.msra.mxu0 %v422_v21  ;;  %1133 = vmatpush.msra.mxu1 %v822_v22  ;;  %v849_v20 = vld [vmem:[%s6389_s1 + $0x1610] sm:$0xff]  ;;  %v450_v21 = vld [vmem:[%s6389_s1 + $0x998] sm:$0xff] }
  0x61   : > { %1153 = vmatpush.msra.mxu2 %v423_v23  ;;  %1173 = vmatpush.msra.mxu3 %v823_v24  ;;  %v850_v22 = vld [vmem:[%s6389_s1 + $0x1618] sm:$0xff]  ;;  %v424_v23 = vld [vmem:[%s6389_s1 + $0x8c8] sm:$0xff] }
  0x62   : > { %1114 = vmatpush.msra.mxu0 %v397_v25  ;;  %1134 = vmatpush.msra.mxu1 %v797_v26  ;;  %v824_v24 = vld [vmem:[%s6389_s1 + $0x1548] sm:$0xff]  ;;  %v425_v25 = vld [vmem:[%s6389_s1 + $0x8d0] sm:$0xff] }
  0x63   : > { %1154 = vmatpush.msra.mxu2 %v398_v27  ;;  %1174 = vmatpush.msra.mxu3 %v798_v28  ;;  %v825_v26 = vld [vmem:[%s6389_s1 + $0x1550] sm:$0xff]  ;;  %v399_v27 = vld [vmem:[%s6389_s1 + $0x800] sm:$0xff] }
  0x64   : > { %1115 = vmatpush.msra.mxu0 %v372_v29  ;;  %1135 = vmatpush.msra.mxu1 %v772_v30  ;;  %v799_v28 = vld [vmem:[%s6389_s1 + $0x1480] sm:$0xff]  ;;  %v400_v29 = vld [vmem:[%s6389_s1 + $0x808] sm:$0xff] }
  0x65   : > { %1155 = vmatpush.msra.mxu2 %v373_v31  ;;  %1175 = vmatpush.msra.mxu3 %v773_v32  ;;  %v800_v30 = vld [vmem:[%s6389_s1 + $0x1488] sm:$0xff]  ;;  %v374_v31 = vld [vmem:[%s6389_s1 + $0x738] sm:$0xff] }
  0x66   : > { %1116 = vmatpush.msra.mxu0 %v347_v33  ;;  %1136 = vmatpush.msra.mxu1 %v747_v34  ;;  %v774_v32 = vld [vmem:[%s6389_s1 + $0x13b8] sm:$0xff]  ;;  %v375_v33 = vld [vmem:[%s6389_s1 + $0x740] sm:$0xff] }
  0x67   : > { %1156 = vmatpush.msra.mxu2 %v348_v35  ;;  %1176 = vmatpush.msra.mxu3 %v748_v36  ;;  %v775_v34 = vld [vmem:[%s6389_s1 + $0x13c0] sm:$0xff]  ;;  %v349_v35 = vld [vmem:[%s6389_s1 + $0x670] sm:$0xff] }
  0x68   : > { %1117 = vmatpush.msra.mxu0 %v322_v37  ;;  %1137 = vmatpush.msra.mxu1 %v722_v38  ;;  %v749_v36 = vld [vmem:[%s6389_s1 + $0x12f0] sm:$0xff]  ;;  %v350_v37 = vld [vmem:[%s6389_s1 + $0x678] sm:$0xff] }
  0x69   : > { %1157 = vmatpush.msra.mxu2 %v323_v39  ;;  %1177 = vmatpush.msra.mxu3 %v723_v40  ;;  %v750_v38 = vld [vmem:[%s6389_s1 + $0x12f8] sm:$0xff]  ;;  %v324_v39 = vld [vmem:[%s6389_s1 + $0x5a8] sm:$0xff] }
  0x6a   : > { %1118 = vmatpush.msra.mxu0 %v297_v41  ;;  %1138 = vmatpush.msra.mxu1 %v697_v42  ;;  %v724_v40 = vld [vmem:[%s6389_s1 + $0x1228] sm:$0xff]  ;;  %v325_v41 = vld [vmem:[%s6389_s1 + $0x5b0] sm:$0xff] }
  0x6b   : > { %1158 = vmatpush.msra.mxu2 %v298_v43  ;;  %1178 = vmatpush.msra.mxu3 %v698_v44  ;;  %v725_v42 = vld [vmem:[%s6389_s1 + $0x1230] sm:$0xff]  ;;  %v299_v43 = vld [vmem:[%s6389_s1 + $0x4e0] sm:$0xff] }
  0x6c   : > { %1119 = vmatpush.msra.mxu0 %v272_v45  ;;  %1139 = vmatpush.msra.mxu1 %v672_v46  ;;  %v699_v44 = vld [vmem:[%s6389_s1 + $0x1160] sm:$0xff]  ;;  %v300_v45 = vld [vmem:[%s6389_s1 + $0x4e8] sm:$0xff] }
  0x6d   : > { %1159 = vmatpush.msra.mxu2 %v273_v47  ;;  %1179 = vmatpush.msra.mxu3 %v673_v48  ;;  %v700_v46 = vld [vmem:[%s6389_s1 + $0x1168] sm:$0xff]  ;;  %v274_v47 = vld [vmem:[%s6389_s1 + $0x418] sm:$0xff] }
  0x6e   : > { %1120 = vmatpush.msra.mxu0 %v247_v49  ;;  %1140 = vmatpush.msra.mxu1 %v647_v50  ;;  %v674_v48 = vld [vmem:[%s6389_s1 + $0x1098] sm:$0xff]  ;;  %v275_v49 = vld [vmem:[%s6389_s1 + $0x420] sm:$0xff] }
  0x6f   : > { %1160 = vmatpush.msra.mxu2 %v248_v51  ;;  %1180 = vmatpush.msra.mxu3 %v648_v52  ;;  %v675_v50 = vld [vmem:[%s6389_s1 + $0x10a0] sm:$0xff]  ;;  %v249_v51 = vld [vmem:[%s6389_s1 + $0x350] sm:$0xff] }
  0x70   : > { %1121 = vmatpush.msra.mxu0 %v222_v53  ;;  %1141 = vmatpush.msra.mxu1 %v622_v54  ;;  %v649_v52 = vld [vmem:[%s6389_s1 + $0xfd0] sm:$0xff]  ;;  %v250_v53 = vld [vmem:[%s6389_s1 + $0x358] sm:$0xff] }
  0x71   : > { %1161 = vmatpush.msra.mxu2 %v223_v55  ;;  %1181 = vmatpush.msra.mxu3 %v623_v56  ;;  %v650_v54 = vld [vmem:[%s6389_s1 + $0xfd8] sm:$0xff]  ;;  %v224_v55 = vld [vmem:[%s6389_s1 + $0x288] sm:$0xff] }
  0x72   : > { %1122 = vmatpush.msra.mxu0 %v197_v57  ;;  %1142 = vmatpush.msra.mxu1 %v597_v58  ;;  %v624_v56 = vld [vmem:[%s6389_s1 + $0xf08] sm:$0xff]  ;;  %v225_v57 = vld [vmem:[%s6389_s1 + $0x290] sm:$0xff] }
  0x73   : > { %1162 = vmatpush.msra.mxu2 %v198_v59  ;;  %1182 = vmatpush.msra.mxu3 %v598_v60  ;;  %v625_v58 = vld [vmem:[%s6389_s1 + $0xf10] sm:$0xff]  ;;  %v199_v59 = vld [vmem:[%s6389_s1 + $0x1c0] sm:$0xff] }
  0x74   : > { %1123 = vmatpush.msra.mxu0 %v172_v61  ;;  %1143 = vmatpush.msra.mxu1 %v572_v62  ;;  %v599_v60 = vld [vmem:[%s6389_s1 + $0xe40] sm:$0xff]  ;;  %v200_v61 = vld [vmem:[%s6389_s1 + $0x1c8] sm:$0xff] }
  0x75   : > { %1163 = vmatpush.msra.mxu2 %v173_v63  ;;  %1183 = vmatpush.msra.mxu3 %v573_v0  ;;  %v600_v62 = vld [vmem:[%s6389_s1 + $0xe48] sm:$0xff]  ;;  %v174_v63 = vld [vmem:[%s6389_s1 + $0xf8] sm:$0xff] }
  0x76   : > { %1124 = vmatpush.msra.mxu0 %v147_v3  ;;  %1144 = vmatpush.msra.mxu1 %v547_v4  ;;  %v574_v0 = vld [vmem:[%s6389_s1 + $0xd78] sm:$0xff]  ;;  %v175_v3 = vld [vmem:[%s6389_s1 + $0x100] sm:$0xff] }
  0x77   : > { %1164 = vmatpush.msra.mxu2 %v148_v5  ;;  %1184 = vmatpush.msra.mxu3 %v548_v6  ;;  %v575_v4 = vld [vmem:[%s6389_s1 + $0xd80] sm:$0xff]  ;;  %v149_v5 = vld [vmem:[%s6389_s1 + $0x30] sm:$0xff] }
  0x78   : > { %1125 = vmatmul.f32.vlgmr.msra.gmra.mxu0 %v3411_v1  ;;  %1145 = vmatmul.f32.vlgmr.msra.gmra.mxu1 %v3413_v2  ;;  %v549_v6 = vld [vmem:[%s6389_s1 + $0xcb0] sm:$0xff] }
  0x79   : > { %1165 = vmatmul.f32.vlgmr.msra.gmra.mxu2 %v3411_v1  ;;  %1185 = vmatmul.f32.vlgmr.msra.gmra.mxu3 %v3413_v2 }
  0x7a   : > { %1189 = vmatpush.msrb.mxu0 %v524_v7  ;;  %1209 = vmatpush.msrb.mxu1 %v924_v8  ;;  %v150_v7 = vld [vmem:[%s6389_s1 + $0x38] sm:$0xff] }
  0x7b   : > { %1229 = vmatpush.msrb.mxu2 %v525_v9  ;;  %1249 = vmatpush.msrb.mxu3 %v925_v10  ;;  %v550_v8 = vld [vmem:[%s6389_s1 + $0xcb8] sm:$0xff] }
  0x7c   : > { %1190 = vmatpush.msrb.mxu0 %v499_v11  ;;  %1210 = vmatpush.msrb.mxu1 %v899_v12  ;;  %v526_v9 = vld [vmem:[%s6389_s1 + $0xbf8] sm:$0xff]  ;;  %v527_v11 = vld [vmem:[%s6389_s1 + $0xc00] sm:$0xff] }
  0x7d   : > { %1230 = vmatpush.msrb.mxu2 %v500_v13  ;;  %1250 = vmatpush.msrb.mxu3 %v900_v14  ;;  %v926_v10 = vld [vmem:[%s6389_s1 + $0x1878] sm:$0xff]  ;;  %v927_v12 = vld [vmem:[%s6389_s1 + $0x1880] sm:$0xff]  ;;  %v501_v13 = vld [vmem:[%s6389_s1 + $0xb30] sm:$0xff] }
  0x7e   : > { %1191 = vmatpush.msrb.mxu0 %v474_v15  ;;  %1211 = vmatpush.msrb.mxu1 %v874_v16  ;;  %v901_v14 = vld [vmem:[%s6389_s1 + $0x17b0] sm:$0xff]  ;;  %v502_v15 = vld [vmem:[%s6389_s1 + $0xb38] sm:$0xff]  ;;  %v876_v16 = vld [vmem:[%s6389_s1 + $0x16e8] sm:$0xff] }
  0x7f   : > { %1231 = vmatpush.msrb.mxu2 %v475_v17  ;;  %1251 = vmatpush.msrb.mxu3 %v875_v18  ;;  %v477_v17 = vld [vmem:[%s6389_s1 + $0xa70] sm:$0xff] }
  0x80   : > { %1192 = vmatpush.msrb.mxu0 %v449_v19  ;;  %1212 = vmatpush.msrb.mxu1 %v849_v20  ;;  %v877_v18 = vld [vmem:[%s6389_s1 + $0x16f0] sm:$0xff]  ;;  %v451_v19 = vld [vmem:[%s6389_s1 + $0x9a0] sm:$0xff] }
  0x81   : > { %1232 = vmatpush.msrb.mxu2 %v450_v21  ;;  %1252 = vmatpush.msrb.mxu3 %v850_v22  ;;  %v851_v20 = vld [vmem:[%s6389_s1 + $0x1620] sm:$0xff]  ;;  %v452_v21 = vld [vmem:[%s6389_s1 + $0x9a8] sm:$0xff] }
  0x82   : > { %1193 = vmatpush.msrb.mxu0 %v424_v23  ;;  %1213 = vmatpush.msrb.mxu1 %v824_v24  ;;  %v852_v22 = vld [vmem:[%s6389_s1 + $0x1628] sm:$0xff]  ;;  %v426_v23 = vld [vmem:[%s6389_s1 + $0x8d8] sm:$0xff] }
  0x83   : > { %1233 = vmatpush.msrb.mxu2 %v425_v25  ;;  %1253 = vmatpush.msrb.mxu3 %v825_v26  ;;  %v826_v24 = vld [vmem:[%s6389_s1 + $0x1558] sm:$0xff]  ;;  %v427_v25 = vld [vmem:[%s6389_s1 + $0x8e0] sm:$0xff] }
  0x84   : > { %1194 = vmatpush.msrb.mxu0 %v399_v27  ;;  %1214 = vmatpush.msrb.mxu1 %v799_v28  ;;  %v827_v26 = vld [vmem:[%s6389_s1 + $0x1560] sm:$0xff]  ;;  %v401_v27 = vld [vmem:[%s6389_s1 + $0x810] sm:$0xff] }
  0x85   : > { %1234 = vmatpush.msrb.mxu2 %v400_v29  ;;  %1254 = vmatpush.msrb.mxu3 %v800_v30  ;;  %v801_v28 = vld [vmem:[%s6389_s1 + $0x1490] sm:$0xff]  ;;  %v402_v29 = vld [vmem:[%s6389_s1 + $0x818] sm:$0xff] }
  0x86   : > { %1195 = vmatpush.msrb.mxu0 %v374_v31  ;;  %1215 = vmatpush.msrb.mxu1 %v774_v32  ;;  %v802_v30 = vld [vmem:[%s6389_s1 + $0x1498] sm:$0xff]  ;;  %v376_v31 = vld [vmem:[%s6389_s1 + $0x748] sm:$0xff] }
  0x87   : > { %1235 = vmatpush.msrb.mxu2 %v375_v33  ;;  %1255 = vmatpush.msrb.mxu3 %v775_v34  ;;  %v776_v32 = vld [vmem:[%s6389_s1 + $0x13c8] sm:$0xff]  ;;  %v377_v33 = vld [vmem:[%s6389_s1 + $0x750] sm:$0xff] }
  0x88   : > { %1196 = vmatpush.msrb.mxu0 %v349_v35  ;;  %1216 = vmatpush.msrb.mxu1 %v749_v36  ;;  %v777_v34 = vld [vmem:[%s6389_s1 + $0x13d0] sm:$0xff]  ;;  %v351_v35 = vld [vmem:[%s6389_s1 + $0x680] sm:$0xff] }
  0x89   : > { %1236 = vmatpush.msrb.mxu2 %v350_v37  ;;  %1256 = vmatpush.msrb.mxu3 %v750_v38  ;;  %v751_v36 = vld [vmem:[%s6389_s1 + $0x1300] sm:$0xff]  ;;  %v352_v37 = vld [vmem:[%s6389_s1 + $0x688] sm:$0xff] }
  0x8a   : > { %1197 = vmatpush.msrb.mxu0 %v324_v39  ;;  %1217 = vmatpush.msrb.mxu1 %v724_v40  ;;  %v752_v38 = vld [vmem:[%s6389_s1 + $0x1308] sm:$0xff]  ;;  %v326_v39 = vld [vmem:[%s6389_s1 + $0x5b8] sm:$0xff] }
  0x8b   : > { %1237 = vmatpush.msrb.mxu2 %v325_v41  ;;  %1257 = vmatpush.msrb.mxu3 %v725_v42  ;;  %v726_v40 = vld [vmem:[%s6389_s1 + $0x1238] sm:$0xff]  ;;  %v327_v41 = vld [vmem:[%s6389_s1 + $0x5c0] sm:$0xff] }
  0x8c   : > { %1198 = vmatpush.msrb.mxu0 %v299_v43  ;;  %1218 = vmatpush.msrb.mxu1 %v699_v44  ;;  %v727_v42 = vld [vmem:[%s6389_s1 + $0x1240] sm:$0xff]  ;;  %v301_v43 = vld [vmem:[%s6389_s1 + $0x4f0] sm:$0xff] }
  0x8d   : > { %1238 = vmatpush.msrb.mxu2 %v300_v45  ;;  %1258 = vmatpush.msrb.mxu3 %v700_v46  ;;  %v701_v44 = vld [vmem:[%s6389_s1 + $0x1170] sm:$0xff]  ;;  %v302_v45 = vld [vmem:[%s6389_s1 + $0x4f8] sm:$0xff] }
  0x8e   : > { %1199 = vmatpush.msrb.mxu0 %v274_v47  ;;  %1219 = vmatpush.msrb.mxu1 %v674_v48  ;;  %v702_v46 = vld [vmem:[%s6389_s1 + $0x1178] sm:$0xff]  ;;  %v276_v47 = vld [vmem:[%s6389_s1 + $0x428] sm:$0xff] }
  0x8f   : > { %1239 = vmatpush.msrb.mxu2 %v275_v49  ;;  %1259 = vmatpush.msrb.mxu3 %v675_v50  ;;  %v676_v48 = vld [vmem:[%s6389_s1 + $0x10a8] sm:$0xff]  ;;  %v277_v49 = vld [vmem:[%s6389_s1 + $0x430] sm:$0xff] }
  0x90   : > { %1200 = vmatpush.msrb.mxu0 %v249_v51  ;;  %1220 = vmatpush.msrb.mxu1 %v649_v52  ;;  %v677_v50 = vld [vmem:[%s6389_s1 + $0x10b0] sm:$0xff]  ;;  %v251_v51 = vld [vmem:[%s6389_s1 + $0x360] sm:$0xff] }
  0x91   : > { %1240 = vmatpush.msrb.mxu2 %v250_v53  ;;  %1260 = vmatpush.msrb.mxu3 %v650_v54  ;;  %v651_v52 = vld [vmem:[%s6389_s1 + $0xfe0] sm:$0xff]  ;;  %v252_v53 = vld [vmem:[%s6389_s1 + $0x368] sm:$0xff] }
  0x92   : > { %1201 = vmatpush.msrb.mxu0 %v224_v55  ;;  %1221 = vmatpush.msrb.mxu1 %v624_v56  ;;  %v652_v54 = vld [vmem:[%s6389_s1 + $0xfe8] sm:$0xff]  ;;  %v226_v55 = vld [vmem:[%s6389_s1 + $0x298] sm:$0xff] }
  0x93   : > { %1241 = vmatpush.msrb.mxu2 %v225_v57  ;;  %1261 = vmatpush.msrb.mxu3 %v625_v58  ;;  %v626_v56 = vld [vmem:[%s6389_s1 + $0xf18] sm:$0xff] }
  0x94   : > { %1202 = vmatpush.msrb.mxu0 %v199_v59  ;;  %1222 = vmatpush.msrb.mxu1 %v599_v60  ;;  %v227_v59 = vld [vmem:[%s6389_s1 + $0x2a0] sm:$0xff] }
  0x95   : > { %1242 = vmatpush.msrb.mxu2 %v200_v61  ;;  %1262 = vmatpush.msrb.mxu3 %v600_v62  ;;  %v627_v60 = vld [vmem:[%s6389_s1 + $0xf20] sm:$0xff]  ;;  %v201_v62 = vld [vmem:[%s6389_s1 + $0x1d0] sm:$0xff] }
  0x96   : > { %1203 = vmatpush.msrb.mxu0 %v174_v63  ;;  %1223 = vmatpush.msrb.mxu1 %v574_v0  ;;  %v601_v63 = vld [vmem:[%s6389_s1 + $0xe50] sm:$0xff]  ;;  %v202_v0 = vld [vmem:[%s6389_s1 + $0x1d8] sm:$0xff] }
  0x97   : > { %1243 = vmatpush.msrb.mxu2 %v175_v3  ;;  %1263 = vmatpush.msrb.mxu3 %v575_v4  ;;  %v602_v3 = vld [vmem:[%s6389_s1 + $0xe58] sm:$0xff] }
  0x98   : > { %1204 = vmatpush.msrb.mxu0 %v149_v5  ;;  %1224 = vmatpush.msrb.mxu1 %v549_v6  ;;  %v176_v5 = vld [vmem:[%s6389_s1 + $0x108] sm:$0xff] }
  0x99   : > { %1244 = vmatpush.msrb.mxu2 %v150_v7  ;;  %1264 = vmatpush.msrb.mxu3 %v550_v8  ;;  %v576_v6 = vld [vmem:[%s6389_s1 + $0xd88] sm:$0xff]  ;;  %v177_v8 = vld [vmem:[%s6389_s1 + $0x110] sm:$0xff] }
  0x9a   : > { %1205 = vmatmul.f32.vlgmr.msrb.gmra.mxu0 %v3411_v1  ;;  %1225 = vmatmul.f32.vlgmr.msrb.gmra.mxu1 %v3413_v2 }
  0x9b   : > { %1245 = vmatmul.f32.vlgmr.msrb.gmra.mxu2 %v3411_v1  ;;  %1265 = vmatmul.f32.vlgmr.msrb.gmra.mxu3 %v3413_v2  ;;  %v902_v1 = vld [vmem:[%s6389_s1 + $0x17b8] sm:$0xff]  ;;  %v476_v2 = vld [vmem:[%s6389_s1 + $0xa68] sm:$0xff] }
  0x9c   : > { %1269 = vmatpush.msra.mxu0 %v526_v9  ;;  %1289 = vmatpush.msra.mxu1 %v926_v10  ;;  %v577_v9 = vld [vmem:[%s6389_s1 + $0xd90] sm:$0xff]  ;;  %v151_v10 = vld [vmem:[%s6389_s1 + $0x40] sm:$0xff] }
  0x9d   : > { %1309 = vmatpush.msra.mxu2 %v527_v11  ;;  %1329 = vmatpush.msra.mxu3 %v927_v12  ;;  %v551_v11 = vld [vmem:[%s6389_s1 + $0xcc0] sm:$0xff] }
  0x9e   : > { %1270 = vmatpush.msra.mxu0 %v501_v13  ;;  %1290 = vmatpush.msra.mxu1 %v901_v14  ;;  %v152_v13 = vld [vmem:[%s6389_s1 + $0x48] sm:$0xff] }
  0x9f   : > { %1310 = vmatpush.msra.mxu2 %v502_v15  ;;  %1330 = vmatpush.msra.mxu3 %v902_v1  ;;  %v552_v14 = vld [vmem:[%s6389_s1 + $0xcc8] sm:$0xff] }
  0xa0   : > { %1271 = vmatpush.msra.mxu0 %v476_v2  ;;  %1291 = vmatpush.msra.mxu1 %v876_v16 }
  0xa1   : > { %1311 = vmatpush.msra.mxu2 %v477_v17  ;;  %1331 = vmatpush.msra.mxu3 %v877_v18  ;;  %v528_v17 = vld [vmem:[%s6389_s1 + $0xc08] sm:$0xff] }
  0xa2   : > { %1272 = vmatpush.msra.mxu0 %v451_v19  ;;  %1292 = vmatpush.msra.mxu1 %v851_v20  ;;  %v928_v18 = vld [vmem:[%s6389_s1 + $0x1888] sm:$0xff] }
  0xa3   : > { %1312 = vmatpush.msra.mxu2 %v452_v21  ;;  %1332 = vmatpush.msra.mxu3 %v852_v22  ;;  %v4213_v21 = vld.sshfl [vmem:[#allocation1] sm:$0xff pattern:$0x75316420]  ;;  %v4216_v22 = vld.sshfl [vmem:[#allocation1 + $0x8] sm:$0xff pattern:$0x75316420] }
  0xa4   : > { %1273 = vmatpush.msra.mxu0 %v426_v23  ;;  %1293 = vmatpush.msra.mxu1 %v826_v24  ;;  %v529_v23 = vld [vmem:[%s6389_s1 + $0xc10] sm:$0xff] }
  0xa5   : > { %1313 = vmatpush.msra.mxu2 %v427_v25  ;;  %1333 = vmatpush.msra.mxu3 %v827_v26  ;;  %v929_v24 = vld [vmem:[%s6389_s1 + $0x1890] sm:$0xff] }
  0xa6   : > { %1274 = vmatpush.msra.mxu0 %v401_v27  ;;  %1294 = vmatpush.msra.mxu1 %v801_v28  ;;  %v503_v27 = vld [vmem:[%s6389_s1 + $0xb40] sm:$0xff] }
  0xa7   : > { %1314 = vmatpush.msra.mxu2 %v402_v29  ;;  %1334 = vmatpush.msra.mxu3 %v802_v30  ;;  %v903_v28 = vld [vmem:[%s6389_s1 + $0x17c0] sm:$0xff]  ;;  %v504_v29 = vld [vmem:[%s6389_s1 + $0xb48] sm:$0xff] }
  0xa8   : > { %1275 = vmatpush.msra.mxu0 %v376_v31  ;;  %1295 = vmatpush.msra.mxu1 %v776_v32  ;;  %v904_v30 = vld [vmem:[%s6389_s1 + $0x17c8] sm:$0xff] }
  0xa9   : > { %1315 = vmatpush.msra.mxu2 %v377_v33  ;;  %1335 = vmatpush.msra.mxu3 %v777_v34  ;;  %v478_v33 = vld [vmem:[%s6389_s1 + $0xa78] sm:$0xff] }
  0xaa   : > { %1276 = vmatpush.msra.mxu0 %v351_v35  ;;  %1296 = vmatpush.msra.mxu1 %v751_v36  ;;  %v878_v34 = vld [vmem:[%s6389_s1 + $0x16f8] sm:$0xff]  ;;  %v479_v35 = vld [vmem:[%s6389_s1 + $0xa80] sm:$0xff] }
  0xab   : > { %1316 = vmatpush.msra.mxu2 %v352_v37  ;;  %1336 = vmatpush.msra.mxu3 %v752_v38  ;;  %v879_v36 = vld [vmem:[%s6389_s1 + $0x1700] sm:$0xff] }
  0xac   : > { %1277 = vmatpush.msra.mxu0 %v326_v39  ;;  %1297 = vmatpush.msra.mxu1 %v726_v40  ;;  %v453_v39 = vld [vmem:[%s6389_s1 + $0x9b0] sm:$0xff] }
  0xad   : > { %1317 = vmatpush.msra.mxu2 %v327_v41  ;;  %1337 = vmatpush.msra.mxu3 %v727_v42  ;;  %v853_v40 = vld [vmem:[%s6389_s1 + $0x1630] sm:$0xff]  ;;  %v454_v41 = vld [vmem:[%s6389_s1 + $0x9b8] sm:$0xff] }
  0xae   : > { %1278 = vmatpush.msra.mxu0 %v301_v43  ;;  %1298 = vmatpush.msra.mxu1 %v701_v44  ;;  %v854_v42 = vld [vmem:[%s6389_s1 + $0x1638] sm:$0xff] }
  0xaf   : > { %1318 = vmatpush.msra.mxu2 %v302_v45  ;;  %1338 = vmatpush.msra.mxu3 %v702_v46  ;;  %v428_v45 = vld [vmem:[%s6389_s1 + $0x8e8] sm:$0xff] }
  0xb0   : > { %1279 = vmatpush.msra.mxu0 %v276_v47  ;;  %1299 = vmatpush.msra.mxu1 %v676_v48  ;;  %v828_v46 = vld [vmem:[%s6389_s1 + $0x1568] sm:$0xff]  ;;  %v429_v48 = vld [vmem:[%s6389_s1 + $0x8f0] sm:$0xff] }
  0xb1   : > { %1319 = vmatpush.msra.mxu2 %v277_v49  ;;  %1339 = vmatpush.msra.mxu3 %v677_v50  ;;  %v966_v57 = vpop.f32.mrf.mxu0  ;;  %v986_v58 = vpop.f32.mrf.mxu1  ;;  %v829_v49 = vld [vmem:[%s6389_s1 + $0x1570] sm:$0xff]  ;;  %v403_v50 = vld [vmem:[%s6389_s1 + $0x820] sm:$0xff] }
  0xb2   : > { %1280 = vmatpush.msra.mxu0 %v251_v51  ;;  %1300 = vmatpush.msra.mxu1 %v651_v52  ;;  %v4163_v61 = vadd.f32 %v986_v58, %v966_v57  ;;  %v803_v51 = vld [vmem:[%s6389_s1 + $0x14a0] sm:$0xff] }
  0xb3   : > { %1320 = vmatpush.msra.mxu2 %v252_v53  ;;  %1340 = vmatpush.msra.mxu3 %v652_v54  ;;  %v404_v53 = vld [vmem:[%s6389_s1 + $0x828] sm:$0xff]  ;;  %v379_v58 = vld [vmem:[%s6389_s1 + $0x760] sm:$0xff] }
  0xb4   : > { %1281 = vmatpush.msra.mxu0 %v226_v55  ;;  %1301 = vmatpush.msra.mxu1 %v626_v56  ;;  %v1950_v4 = vsel %vm1949_vm0, %v4163_v61, -inf  ;;  %v804_v54 = vld [vmem:[%s6389_s1 + $0x14a8] sm:$0xff]  ;;  %v378_v55 = vld [vmem:[%s6389_s1 + $0x758] sm:$0xff] }
  0xb5   : > { %1321 = vmatpush.msra.mxu2 %v227_v59  ;;  %1341 = vmatpush.msra.mxu3 %v627_v60  ;;  %v1951_v7 = vrot.slane %v1950_v4, 4  ;;  %v778_v56 = vld [vmem:[%s6389_s1 + $0x13d8] sm:$0xff]  ;;  %v779_v59 = vld [vmem:[%s6389_s1 + $0x13e0] sm:$0xff]  ;;  %v353_v60 = vld [vmem:[%s6389_s1 + $0x690] sm:$0xff] }
  0xb6   : > { %1282 = vmatpush.msra.mxu0 %v201_v62  ;;  %1302 = vmatpush.msra.mxu1 %v601_v63  ;;  %v354_v63 = vld [vmem:[%s6389_s1 + $0x698] sm:$0xff] }
  0xb7   : > { %1322 = vmatpush.msra.mxu2 %v202_v0  ;;  %1342 = vmatpush.msra.mxu3 %v602_v3  ;;  %v1952_v12 = vmax.f32 %v1950_v4, %v1951_v7  ;;  %v754_v0 = vld [vmem:[%s6389_s1 + $0x1318] sm:$0xff]  ;;  %v328_v4 = vld [vmem:[%s6389_s1 + $0x5c8] sm:$0xff]  ;;  %v329_v7 = vld [vmem:[%s6389_s1 + $0x5d0] sm:$0xff] }
  0xb8   : > { %1283 = vmatpush.msra.mxu0 %v176_v5  ;;  %1303 = vmatpush.msra.mxu1 %v576_v6  ;;  %v1006_v15 = vpop.f32.mrf.mxu2  ;;  %v1026_v1 = vpop.f32.mrf.mxu3  ;;  %v728_v5 = vld [vmem:[%s6389_s1 + $0x1248] sm:$0xff] }
  0xb9   : > { %1323 = vmatpush.msra.mxu2 %v177_v8  ;;  %1343 = vmatpush.msra.mxu3 %v577_v9  ;;  %v1953_v2 = vrot.slane %v1952_v12, 2  ;;  %v4203_v16 = vadd.f32 %v1026_v1, %v1006_v15  ;;  %v729_v8 = vld [vmem:[%s6389_s1 + $0x1250] sm:$0xff]  ;;  %v278_v15 = vld [vmem:[%s6389_s1 + $0x438] sm:$0xff] }
  0xba   : > { %1284 = vmatpush.msra.mxu0 %v151_v10  ;;  %1304 = vmatpush.msra.mxu1 %v551_v11  ;;  %v303_v10 = vld [vmem:[%s6389_s1 + $0x500] sm:$0xff]  ;;  %v678_v1 = vld [vmem:[%s6389_s1 + $0x10b8] sm:$0xff] }
  0xbb   : > { %1324 = vmatpush.msra.mxu2 %v152_v13  ;;  %1344 = vmatpush.msra.mxu3 %v552_v14  ;;  %v1954_v19 = vmax.f32 %v1952_v12, %v1953_v2  ;;  %v1957_v20 = vsel %vm1949_vm0, %v4203_v16, -inf  ;;  %v703_v11 = vld [vmem:[%s6389_s1 + $0x1180] sm:$0xff]  ;;  %v304_v12 = vld [vmem:[%s6389_s1 + $0x508] sm:$0xff] }
  0xbc   : > { %1285 = vmatmul.f32.vlgmr.msra.gmra.mxu0 %v4213_v21  ;;  %1305 = vmatmul.f32.vlgmr.msra.gmra.mxu1 %v4216_v22  ;;  %v1958_v25 = vrot.slane %v1957_v20, 4  ;;  %v704_v13 = vld [vmem:[%s6389_s1 + $0x1188] sm:$0xff]  ;;  %v279_v2 = vld [vmem:[%s6389_s1 + $0x440] sm:$0xff] }
  0xbd   : > { %1325 = vmatmul.f32.vlgmr.msra.gmra.mxu2 %v4213_v21  ;;  %1345 = vmatmul.f32.vlgmr.msra.gmra.mxu3 %v4216_v22  ;;  %v1955_v26 = vrot.slane %v1954_v19, 1 }
  0xbe   : > { %1349 = vmatpush.msrb.mxu0 %v528_v17  ;;  %1369 = vmatpush.msrb.mxu1 %v928_v18  ;;  %v1959_v31 = vmax.f32 %v1957_v20, %v1958_v25  ;;  %v253_v18 = vld [vmem:[%s6389_s1 + $0x370] sm:$0xff] }
  0xbf   : > { %1389 = vmatpush.msrb.mxu2 %v529_v23  ;;  %1409 = vmatpush.msrb.mxu3 %v929_v24  ;;  %v1956_v32 = vmax.f32 %v1954_v19, %v1955_v26  ;;  %v653_v19 = vld [vmem:[%s6389_s1 + $0xff0] sm:$0xff]  ;;  %v254_v23 = vld [vmem:[%s6389_s1 + $0x378] sm:$0xff] }
  0xc0   : > { %1350 = vmatpush.msrb.mxu0 %v503_v27  ;;  %1370 = vmatpush.msrb.mxu1 %v903_v28  ;;  %v1960_v37 = vrot.slane %v1959_v31, 2  ;;  %v654_v24 = vld [vmem:[%s6389_s1 + $0xff8] sm:$0xff]  ;;  %v228_v27 = vld [vmem:[%s6389_s1 + $0x2a8] sm:$0xff] }
  0xc1   : > { %v2126_v38 = vsub.f32 %v4163_v61, %v1956_v32  ;;  %1390 = vmatpush.msrb.mxu2 %v504_v29  ;;  %1410 = vmatpush.msrb.mxu3 %v904_v30  ;;  %v753_v61 = vld [vmem:[%s6389_s1 + $0x1310] sm:$0xff]  ;;  %v628_v28 = vld [vmem:[%s6389_s1 + $0xf28] sm:$0xff] }
  0xc2   : > { %1351 = vmatpush.msrb.mxu0 %v478_v33  ;;  %1371 = vmatpush.msrb.mxu1 %v878_v34  ;;  %v1961_v43 = vmax.f32 %v1959_v31, %v1960_v37  ;;  %v229_v32 = vld [vmem:[%s6389_s1 + $0x2b0] sm:$0xff]  ;;  %v603_v37 = vld [vmem:[%s6389_s1 + $0xe60] sm:$0xff] }
  0xc3   : > { %v2151_v44 = vmul.f32 1.442695, %v2126_v38  ;;  %1391 = vmatpush.msrb.mxu2 %v479_v35  ;;  %1411 = vmatpush.msrb.mxu3 %v879_v36  ;;  %v629_v33 = vld [vmem:[%s6389_s1 + $0xf30] sm:$0xff]  ;;  %v203_v36 = vld [vmem:[%s6389_s1 + $0x1e0] sm:$0xff] }
  0xc4   : > { %1352 = vmatpush.msrb.mxu0 %v453_v39  ;;  %1372 = vmatpush.msrb.mxu1 %v853_v40  ;;  %v1962_v47 = vrot.slane %v1961_v43, 1  ;;  %v204_v39 = vld [vmem:[%s6389_s1 + $0x1e8] sm:$0xff] }
  0xc5   : > { %2976 = vpow2.f32 %v2151_v44  ;;  %1392 = vmatpush.msrb.mxu2 %v454_v41  ;;  %1412 = vmatpush.msrb.mxu3 %v854_v42  ;;  %v604_v40 = vld [vmem:[%s6389_s1 + $0xe68] sm:$0xff]  ;;  %v578_v44 = vld [vmem:[%s6389_s1 + $0xd98] sm:$0xff] }
  0xc6   : > { %v1963_v52 = vmax.f32 %v1961_v43, %v1962_v47  ;;  %1353 = vmatpush.msrb.mxu0 %v428_v45  ;;  %1373 = vmatpush.msrb.mxu1 %v828_v46  ;;  %v178_v43 = vld [vmem:[%s6389_s1 + $0x118] sm:$0xff]  ;;  %v179_v47 = vld [vmem:[%s6389_s1 + $0x120] sm:$0xff] }
  0xc7   : > { %1393 = vmatpush.msrb.mxu2 %v429_v48  ;;  %1413 = vmatpush.msrb.mxu3 %v829_v49  ;;  %v579_v48 = vld [vmem:[%s6389_s1 + $0xda0] sm:$0xff]  ;;  %v153_v49 = vld [vmem:[%s6389_s1 + $0x50] sm:$0xff] }
  0xc8   : > { %v2127_v57 = vsub.f32 %v4203_v16, %v1963_v52  ;;  %1354 = vmatpush.msrb.mxu0 %v403_v50  ;;  %1374 = vmatpush.msrb.mxu1 %v803_v51  ;;  %v679_v16 = vld [vmem:[%s6389_s1 + $0x10c0] sm:$0xff]  ;;  %v553_v50 = vld [vmem:[%s6389_s1 + $0xcd0] sm:$0xff]  ;;  %v154_v52 = vld [vmem:[%s6389_s1 + $0x58] sm:$0xff] }
  0xc9   : > { %1394 = vmatpush.msrb.mxu2 %v404_v53  ;;  %1414 = vmatpush.msrb.mxu3 %v804_v54  ;;  %v554_v53 = vld [vmem:[%s6389_s1 + $0xcd8] sm:$0xff] }
  0xca   : > { %v2153_v62 = vmul.f32 1.442695, %v2127_v57  ;;  %1355 = vmatpush.msrb.mxu0 %v378_v55  ;;  %1375 = vmatpush.msrb.mxu1 %v778_v56 }
  0xcb   : > { %v4313_v3 = vpop.eup %2976  ;;  %1395 = vmatpush.msrb.mxu2 %v379_v58  ;;  %1415 = vmatpush.msrb.mxu3 %v779_v59 }
  0xcc   : > { %v2201_v6 = vsel %vm1949_vm0, %v4313_v3, 0.0  ;;  %2978 = vpow2.f32 %v2153_v62  ;;  %1356 = vmatpush.msrb.mxu0 %v353_v60  ;;  %1376 = vmatpush.msrb.mxu1 %v753_v61  ;;  %v530_v60 = vld [vmem:[%s6389_s1 + $0xc18] sm:$0xff] }
  0xcd   : > { %v2202_v9 = vrot.slane %v2201_v6, 4  ;;  %1396 = vmatpush.msrb.mxu2 %v354_v63  ;;  %1416 = vmatpush.msrb.mxu3 %v754_v0  ;;  %v930_v61 = vld [vmem:[%s6389_s1 + $0x1898] sm:$0xff]  ;;  %v531_v0 = vld [vmem:[%s6389_s1 + $0xc20] sm:$0xff] }
  0xce   : > { %1357 = vmatpush.msrb.mxu0 %v328_v4  ;;  %1377 = vmatpush.msrb.mxu1 %v728_v5  ;;  %v931_v4 = vld [vmem:[%s6389_s1 + $0x18a0] sm:$0xff] }
  0xcf   : > { %v2203_v14 = vadd.f32 %v2202_v9, %v2201_v6  ;;  %1397 = vmatpush.msrb.mxu2 %v329_v7  ;;  %1417 = vmatpush.msrb.mxu3 %v729_v8  ;;  %v505_v8 = vld [vmem:[%s6389_s1 + $0xb50] sm:$0xff] }
  0xd0   : > { %1358 = vmatpush.msrb.mxu0 %v303_v10  ;;  %1378 = vmatpush.msrb.mxu1 %v703_v11  ;;  %v905_v9 = vld [vmem:[%s6389_s1 + $0x17d0] sm:$0xff]  ;;  %v506_v11 = vld [vmem:[%s6389_s1 + $0xb58] sm:$0xff] }
  0xd1   : > { %v2204_v17 = vrot.slane %v2203_v14, 2  ;;  %1398 = vmatpush.msrb.mxu2 %v304_v12  ;;  %1418 = vmatpush.msrb.mxu3 %v704_v13  ;;  %v906_v12 = vld [vmem:[%s6389_s1 + $0x17d8] sm:$0xff] }
  0xd2   : > { %v4359_v20 = vpop.eup %2978  ;;  %1359 = vmatpush.msrb.mxu0 %v278_v15  ;;  %1379 = vmatpush.msrb.mxu1 %v678_v1  ;;  %v880_v15 = vld [vmem:[%s6389_s1 + $0x1708] sm:$0xff] }
  0xd3   : > { %v2205_v25 = vadd.f32 %v2204_v17, %v2203_v14  ;;  %v2208_v26 = vsel %vm1949_vm0, %v4359_v20, 0.0  ;;  %1399 = vmatpush.msrb.mxu2 %v279_v2  ;;  %1419 = vmatpush.msrb.mxu3 %v679_v16  ;;  %v1046_v29 = vpop.f32.mrf.mxu0  ;;  %v1066_v30 = vpop.f32.mrf.mxu1  ;;  %v480_v14 = vld [vmem:[%s6389_s1 + $0xa88] sm:$0xff]  ;;  %v481_v16 = vld [vmem:[%s6389_s1 + $0xa90] sm:$0xff] }
  0xd4   : > { %v2209_v31 = vrot.slane %v2208_v26, 4  ;;  %1360 = vmatpush.msrb.mxu0 %v253_v18  ;;  %1380 = vmatpush.msrb.mxu1 %v653_v19  ;;  %v4381_v34 = vadd.f32 %v1066_v30, %v1046_v29  ;;  %v881_v17 = vld [vmem:[%s6389_s1 + $0x1710] sm:$0xff]  ;;  %v455_v19 = vld [vmem:[%s6389_s1 + $0x9c0] sm:$0xff]  ;;  %v430_v30 = vld [vmem:[%s6389_s1 + $0x8f8] sm:$0xff] }
  0xd5   : > { %v2206_v35 = vrot.slane %v2205_v25, 1  ;;  %1400 = vmatpush.msrb.mxu2 %v254_v23  ;;  %1420 = vmatpush.msrb.mxu3 %v654_v24  ;;  %v855_v23 = vld [vmem:[%s6389_s1 + $0x1640] sm:$0xff] }
  0xd6   : > { %v2210_v38 = vadd.f32 %v2209_v31, %v2208_v26  ;;  %1361 = vmatpush.msrb.mxu0 %v228_v27  ;;  %1381 = vmatpush.msrb.mxu1 %v628_v28  ;;  %v1964_v41 = vsel %vm1949_vm0, %v4381_v34, -inf  ;;  %v456_v26 = vld [vmem:[%s6389_s1 + $0x9c8] sm:$0xff]  ;;  %v830_v31 = vld [vmem:[%s6389_s1 + $0x1578] sm:$0xff] }
  0xd7   : > { %v4397_v42 = vadd.f32 %v2206_v35, %v2205_v25  ;;  %1401 = vmatpush.msrb.mxu2 %v229_v32  ;;  %1421 = vmatpush.msrb.mxu3 %v629_v33  ;;  %v1965_v45 = vrot.slane %v1964_v41, 4  ;;  %v856_v27 = vld [vmem:[%s6389_s1 + $0x1648] sm:$0xff] }
  0xd8   : > { %v2211_v46 = vrot.slane %v2210_v38, 2  ;;  %1362 = vmatpush.msrb.mxu0 %v203_v36  ;;  %1382 = vmatpush.msrb.mxu1 %v603_v37  ;;  %v831_v36 = vld [vmem:[%s6389_s1 + $0x1580] sm:$0xff] }
  0xd9   : > { %2980 = vrcp.f32 %v4397_v42  ;;  %1402 = vmatpush.msrb.mxu2 %v204_v39  ;;  %1422 = vmatpush.msrb.mxu3 %v604_v40  ;;  %v1966_v54 = vmax.f32 %v1964_v41, %v1965_v45  ;;  %vm2381_vm1 = vweird.f32 %v4397_v42  ;;  %v2385_v33 = vand.u32 2147483647, %v4397_v42  ;;  %v405_v40 = vld [vmem:[%s6389_s1 + $0x830] sm:$0xff] }
  0xda   : > { %v2212_v51 = vadd.f32 %v2211_v46, %v2210_v38  ;;  %1363 = vmatpush.msrb.mxu0 %v178_v43  ;;  %1383 = vmatpush.msrb.mxu1 %v578_v44  ;;  %v1086_v55 = vpop.f32.mrf.mxu2  ;;  %v1106_v56 = vpop.f32.mrf.mxu3  ;;  %v2387_v35 = vand.u32 2147483648, %v4397_v42  ;;  %v805_v41 = vld [vmem:[%s6389_s1 + $0x14b0] sm:$0xff]  ;;  %v406_v46 = vld [vmem:[%s6389_s1 + $0x838] sm:$0xff] }
  0xdb   : > { %1403 = vmatpush.msrb.mxu2 %v179_v47  ;;  %1423 = vmatpush.msrb.mxu3 %v579_v48  ;;  %v4424_v57 = vadd.f32 %v1106_v56, %v1086_v55  ;;  %v1967_v59 = vrot.slane %v1966_v54, 2  ;;  %v806_v47 = vld [vmem:[%s6389_s1 + $0x14b8] sm:$0xff]  ;;  %vm4554_vm6 = vcmp.eq.f32.partialorder %v2385_v33, 8.507059e+37 }
  0xdc   : > { %v2213_v58 = vrot.slane %v2212_v51, 1  ;;  %1364 = vmatpush.msrb.mxu0 %v153_v49  ;;  %1384 = vmatpush.msrb.mxu1 %v553_v50  ;;  %v380_v50 = vld [vmem:[%s6389_s1 + $0x768] sm:$0xff] }
  0xdd   : > { %1404 = vmatpush.msrb.mxu2 %v154_v52  ;;  %1424 = vmatpush.msrb.mxu3 %v554_v53  ;;  %v1971_v62 = vsel %vm1949_vm0, %v4424_v57, -inf  ;;  %v1968_v5 = vmax.f32 %v1966_v54, %v1967_v59  ;;  %v381_v53 = vld [vmem:[%s6389_s1 + $0x770] sm:$0xff] }
  0xde   : > { %v4434_v63 = vadd.f32 %v2213_v58, %v2212_v51  ;;  %1365 = vmatmul.f32.vlgmr.msrb.gmra.mxu0 %v4213_v21  ;;  %1385 = vmatmul.f32.vlgmr.msrb.gmra.mxu1 %v4216_v22  ;;  %v1972_v6 = vrot.slane %v1971_v62, 4  ;;  %v780_v51 = vld [vmem:[%s6389_s1 + $0x13e8] sm:$0xff]  ;;  %v781_v54 = vld [vmem:[%s6389_s1 + $0x13f0] sm:$0xff]  ;;  %v755_v58 = vld [vmem:[%s6389_s1 + $0x1320] sm:$0xff] }
  0xdf   : > { %v4444_v7 = vpop.eup %2980  ;;  %1405 = vmatmul.f32.vlgmr.msrb.gmra.mxu2 %v4213_v21  ;;  %1425 = vmatmul.f32.vlgmr.msrb.gmra.mxu3 %v4216_v22  ;;  %v1969_v13 = vrot.slane %v1968_v5, 1 }
  0xe0   : > { %v2377_v10 = vmul.f32 %v4444_v7, %v4397_v42  ;;  %2982 = vrcp.f32 %v4434_v63  ;;  %1429 = vmatpush.msra.mxu0 %v530_v60  ;;  %1449 = vmatpush.msra.mxu1 %v930_v61  ;;  %v1973_v1 = vmax.f32 %v1971_v62, %v1972_v6  ;;  %vm2382_vm2 = vweird.f32 %v4444_v7  ;;  %v355_v42 = vld [vmem:[%s6389_s1 + $0x6a0] sm:$0xff]  ;;  %v356_v62 = vld [vmem:[%s6389_s1 + $0x6a8] sm:$0xff] }
  0xe1   : > { %1469 = vmatpush.msra.mxu2 %v531_v0  ;;  %1489 = vmatpush.msra.mxu3 %v931_v4  ;;  %v1970_v18 = vmax.f32 %v1968_v5, %v1969_v13  ;;  %vm2396_vm3 = vweird.f32 %v4434_v63  ;;  %v2400_v44 = vand.u32 2147483647, %v4434_v63  ;;  %v2402_v45 = vand.u32 2147483648, %v4434_v63  ;;  %vm4536_vm5 = vmor %vm2381_vm1, %vm2382_vm2  ;;  %v756_v0 = vld [vmem:[%s6389_s1 + $0x1328] sm:$0xff]  ;;  %v305_v13 = vld [vmem:[%s6389_s1 + $0x510] sm:$0xff] }
  0xe2   : > { %v2378_v2 = vsub.f32 1.0, %v2377_v10  ;;  %1430 = vmatpush.msra.mxu0 %v505_v8  ;;  %1450 = vmatpush.msra.mxu1 %v905_v9  ;;  %v1974_v24 = vrot.slane %v1973_v1, 2  ;;  %v2388_v60 = vor.u32 1.1754944e-38, %v2387_v35  ;;  %v330_v8 = vld [vmem:[%s6389_s1 + $0x5d8] sm:$0xff]  ;;  %v731_v10 = vld [vmem:[%s6389_s1 + $0x1260] sm:$0xff] }
  0xe3   : > { %1470 = vmatpush.msra.mxu2 %v506_v11  ;;  %1490 = vmatpush.msra.mxu3 %v906_v12  ;;  %v2128_v28 = vsub.f32 %v4381_v34, %v1970_v18  ;;  %v431_v34 = vld [vmem:[%s6389_s1 + $0x900] sm:$0xff]  ;;  %v2403_v61 = vor.u32 1.1754944e-38, %v2402_v45  ;;  %vm4577_vm8 = vcmp.eq.f32.partialorder %v2400_v44, 8.507059e+37  ;;  %v730_v9 = vld [vmem:[%s6389_s1 + $0x1258] sm:$0xff] }
  0xe4   : > { %v2379_v25 = vmul.f32 %v4444_v7, %v2378_v2  ;;  %1431 = vmatpush.msra.mxu0 %v480_v14  ;;  %1451 = vmatpush.msra.mxu1 %v880_v15  ;;  %v1975_v29 = vmax.f32 %v1973_v1, %v1974_v24  ;;  %v705_v14 = vld [vmem:[%s6389_s1 + $0x1190] sm:$0xff]  ;;  %v680_v24 = vld [vmem:[%s6389_s1 + $0x10c8] sm:$0xff] }
  0xe5   : > { %1471 = vmatpush.msra.mxu2 %v481_v16  ;;  %1491 = vmatpush.msra.mxu3 %v881_v17  ;;  %v2155_v38 = vmul.f32 1.442695, %v2128_v28  ;;  %v306_v16 = vld [vmem:[%s6389_s1 + $0x518] sm:$0xff] }
  0xe6   : > { %v4495_v32 = vpop.eup %2982  ;;  %1432 = vmatpush.msra.mxu0 %v455_v19  ;;  %1452 = vmatpush.msra.mxu1 %v855_v23  ;;  %v1976_v39 = vrot.slane %v1975_v29, 1  ;;  %v2380_v43 = vadd.f32 %v4444_v7, %v2379_v25  ;;  %v706_v17 = vld [vmem:[%s6389_s1 + $0x1198] sm:$0xff]  ;;  %v280_v23 = vld [vmem:[%s6389_s1 + $0x448] sm:$0xff]  ;;  %v281_v25 = vld [vmem:[%s6389_s1 + $0x450] sm:$0xff] }
  0xe7   : > { %v2392_v37 = vmul.f32 %v4495_v32, %v4434_v63  ;;  %1472 = vmatpush.msra.mxu2 %v456_v26  ;;  %1492 = vmatpush.msra.mxu3 %v856_v27  ;;  %vm2397_vm4 = vweird.f32 %v4495_v32  ;;  %2984 = vpow2.f32 %v2155_v38 }
  0xe8   : > { %1433 = vmatpush.msra.mxu0 %v430_v30  ;;  %1453 = vmatpush.msra.mxu1 %v830_v31  ;;  %v1977_v49 = vmax.f32 %v1975_v29, %v1976_v39  ;;  %vm4563_vm7 = vmor %vm2396_vm3, %vm2397_vm4  ;;  %v2384_v63 = vsel %vm4536_vm5, %v4444_v7, %v2380_v43  ;;  %v331_v7 = vld [vmem:[%s6389_s1 + $0x5e0] sm:$0xff]  ;;  %v256_v31 = vld [vmem:[%s6389_s1 + $0x388] sm:$0xff] }
  0xe9   : > { %v2393_v48 = vsub.f32 1.0, %v2392_v37  ;;  %1473 = vmatpush.msra.mxu2 %v431_v34  ;;  %1493 = vmatpush.msra.mxu3 %v831_v36  ;;  %v2389_v15 = vsel %vm4554_vm6, %v2388_v60, %v2384_v63  ;;  %v255_v29 = vld [vmem:[%s6389_s1 + $0x380] sm:$0xff]  ;;  %v230_v34 = vld [vmem:[%s6389_s1 + $0x2b8] sm:$0xff] }
  0xea   : > { %1434 = vmatpush.msra.mxu0 %v405_v40  ;;  %1454 = vmatpush.msra.mxu1 %v805_v41  ;;  %v2129_v56 = vsub.f32 %v4424_v57, %v1977_v49  ;;  %v2751_v26 = vmul.f32 %v4313_v3, %v2389_v15  ;;  %v655_v30 = vld [vmem:[%s6389_s1 + $0x1000] sm:$0xff]  ;;  %v656_v3 = vld [vmem:[%s6389_s1 + $0x1008] sm:$0xff]  ;;  %v630_v36 = vld [vmem:[%s6389_s1 + $0xf38] sm:$0xff] }
  0xeb   : > { %v2394_v55 = vmul.f32 %v4495_v32, %v2393_v48  ;;  %1474 = vmatpush.msra.mxu2 %v406_v46  ;;  %1494 = vmatpush.msra.mxu3 %v806_v47  ;;  %v231_v40 = vld [vmem:[%s6389_s1 + $0x2c0] sm:$0xff]  ;;  %v205_v46 = vld [vmem:[%s6389_s1 + $0x1f0] sm:$0xff]  ;;  %v206_v48 = vld [vmem:[%s6389_s1 + $0x1f8] sm:$0xff] }
  0xec   : > { %1435 = vmatpush.msra.mxu0 %v380_v50  ;;  %1455 = vmatpush.msra.mxu1 %v780_v51  ;;  %v2157_v6 = vmul.f32 1.442695, %v2129_v56  ;;  %v631_v41 = vld [vmem:[%s6389_s1 + $0xf40] sm:$0xff]  ;;  %v605_v47 = vld [vmem:[%s6389_s1 + $0xe70] sm:$0xff]  ;;  %v606_v49 = vld [vmem:[%s6389_s1 + $0xe78] sm:$0xff] }
  0xed   : > { %v2395_v4 = vadd.f32 %v4495_v32, %v2394_v55  ;;  %1475 = vmatpush.msra.mxu2 %v381_v53  ;;  %1495 = vmatpush.msra.mxu3 %v781_v54  ;;  %v4593_v11 = vpop.eup %2984  ;;  %v180_v53 = vld [vmem:[%s6389_s1 + $0x128] sm:$0xff]  ;;  %v181_v56 = vld [vmem:[%s6389_s1 + $0x130] sm:$0xff]  ;;  %v155_v60 = vld [vmem:[%s6389_s1 + $0x60] sm:$0xff] }
  0xee   : > { %1436 = vmatpush.msra.mxu0 %v355_v42  ;;  %1456 = vmatpush.msra.mxu1 %v755_v58  ;;  %2986 = vpow2.f32 %v2157_v6  ;;  %v2215_v2 = vsel %vm1949_vm0, %v4593_v11, 0.0  ;;  %v580_v54 = vld [vmem:[%s6389_s1 + $0xda8] sm:$0xff]  ;;  %v581_v42 = vld [vmem:[%s6389_s1 + $0xdb0] sm:$0xff]  ;;  %v555_v57 = vld [vmem:[%s6389_s1 + $0xce0] sm:$0xff] }
  0xef   : > { %v2399_v12 = vsel %vm4563_vm7, %v4495_v32, %v2395_v4  ;;  %1476 = vmatpush.msra.mxu2 %v356_v62  ;;  %1496 = vmatpush.msra.mxu3 %v756_v0  ;;  %v2216_v19 = vrot.slane %v2215_v2, 4  ;;  %v156_v62 = vld [vmem:[%s6389_s1 + $0x68] sm:$0xff] }
  0xf0   : > { %v2404_v1 = vsel %vm4577_vm8, %v2403_v61, %v2399_v12  ;;  %1437 = vmatpush.msra.mxu0 %v330_v8  ;;  %1457 = vmatpush.msra.mxu1 %v730_v9  ;;  %v556_v0 = vld [vmem:[%s6389_s1 + $0xce8] sm:$0xff]  ;;  %v533_v12 = vld [vmem:[%s6389_s1 + $0xc30] sm:$0xff] }
  0xf1   : > { %v2752_v18 = vmul.f32 %v4359_v20, %v2404_v1  ;;  %1477 = vmatpush.msra.mxu2 %v331_v7  ;;  %1497 = vmatpush.msra.mxu3 %v731_v10  ;;  %v681_v20 = vld [vmem:[%s6389_s1 + $0x10d0] sm:$0xff]  ;;  %v2217_v28 = vadd.f32 %v2216_v19, %v2215_v2  ;;  %v532_v9 = vld [vmem:[%s6389_s1 + $0xc28] sm:$0xff]  ;;  %v507_v1 = vld [vmem:[%s6389_s1 + $0xb60] sm:$0xff] }
  0xf2   : > { %1438 = vmatpush.msra.mxu0 %v305_v13  ;;  %1458 = vmatpush.msra.mxu1 %v705_v14  ;;  %v932_v7 = vld [vmem:[%s6389_s1 + $0x18a8] sm:$0xff]  ;;  %v933_v13 = vld [vmem:[%s6389_s1 + $0x18b0] sm:$0xff]  ;;  %v907_v2 = vld [vmem:[%s6389_s1 + $0x17e0] sm:$0xff] }
  0xf3   : > { %v2800_v27 = vrot.slane %v2752_v18, 4  ;;  %1478 = vmatpush.msra.mxu2 %v306_v16  ;;  %1498 = vmatpush.msra.mxu3 %v706_v17  ;;  %v2218_v35 = vrot.slane %v2217_v28, 2 }
  0xf4   : > { %1439 = vmatpush.msra.mxu0 %v280_v23  ;;  %1459 = vmatpush.msra.mxu1 %v680_v24  ;;  %v4646_v32 = vpop.eup %2986  ;;  %v482_v23 = vld [vmem:[%s6389_s1 + $0xa98] sm:$0xff] }
  0xf5   : > { %v2812_v33 = vsel %vm1949_vm0, %v2751_v26, %v2800_v27  ;;  %1479 = vmatpush.msra.mxu2 %v281_v25  ;;  %1499 = vmatpush.msra.mxu3 %v681_v20  ;;  %v1126_v37 = vpop.f32.mrf.mxu0  ;;  %v1146_v38 = vpop.f32.mrf.mxu1  ;;  %v2222_v39 = vsel %vm1949_vm0, %v4646_v32, 0.0  ;;  %v2219_v44 = vadd.f32 %v2218_v35, %v2217_v28  ;;  %v882_v24 = vld [vmem:[%s6389_s1 + $0x1718] sm:$0xff]  ;;  %v483_v26 = vld [vmem:[%s6389_s1 + $0xaa0] sm:$0xff] }
  0xf6   : > { %2836 = vst [vmem:[%s4656_s26] sm:$0xff] %v2812_v33  ;;  %1440 = vmatpush.msra.mxu0 %v255_v29  ;;  %1460 = vmatpush.msra.mxu1 %v655_v30  ;;  %v4667_v43 = vadd.f32 %v1146_v38, %v1126_v37  ;;  %v2223_v45 = vrot.slane %v2222_v39, 4  ;;  %v883_v27 = vld [vmem:[%s6389_s1 + $0x1720] sm:$0xff]  ;;  %v457_v29 = vld [vmem:[%s6389_s1 + $0x9d0] sm:$0xff]  ;;  %v458_v33 = vld [vmem:[%s6389_s1 + $0x9d8] sm:$0xff] }
  0xf7   : > { %1480 = vmatpush.msra.mxu2 %v256_v31  ;;  %1500 = vmatpush.msra.mxu3 %v656_v3  ;;  %v2220_v51 = vrot.slane %v2219_v44, 1  ;;  %v857_v30 = vld [vmem:[%s6389_s1 + $0x1650] sm:$0xff]  ;;  %v858_v35 = vld [vmem:[%s6389_s1 + $0x1658] sm:$0xff]  ;;  %v432_v37 = vld [vmem:[%s6389_s1 + $0x908] sm:$0xff] }
  0xf8   : > { %1441 = vmatpush.msra.mxu0 %v230_v34  ;;  %1461 = vmatpush.msra.mxu1 %v630_v36  ;;  %v1978_v50 = vsel %vm1949_vm0, %v4667_v43, -inf  ;;  %v2224_v52 = vadd.f32 %v2223_v45, %v2222_v39  ;;  %v832_v38 = vld [vmem:[%s6389_s1 + $0x1588] sm:$0xff]  ;;  %v433_v39 = vld [vmem:[%s6389_s1 + $0x910] sm:$0xff]  ;;  %v407_v45 = vld [vmem:[%s6389_s1 + $0x840] sm:$0xff] }
  0xf9   : > { %1481 = vmatpush.msra.mxu2 %v231_v40  ;;  %1501 = vmatpush.msra.mxu3 %v631_v41  ;;  %v1979_v55 = vrot.slane %v1978_v50, 4  ;;  %v4695_v58 = vadd.f32 %v2220_v51, %v2219_v44  ;;  %v833_v40 = vld [vmem:[%s6389_s1 + $0x1590] sm:$0xff] }
  0xfa   : > { %1442 = vmatpush.msra.mxu0 %v205_v46  ;;  %1462 = vmatpush.msra.mxu1 %v605_v47  ;;  %v2225_v59 = vrot.slane %v2224_v52, 2  ;;  %v807_v46 = vld [vmem:[%s6389_s1 + $0x14c0] sm:$0xff] }
  0xfb   : > { %1482 = vmatpush.msra.mxu2 %v206_v48  ;;  %1502 = vmatpush.msra.mxu3 %v606_v49  ;;  %v1980_v61 = vmax.f32 %v1978_v50, %v1979_v55  ;;  %2988 = vrcp.f32 %v4695_v58  ;;  %vm2411_vm9 = vweird.f32 %v4695_v58  ;;  %v2415_v48 = vand.u32 2147483647, %v4695_v58  ;;  %v408_v49 = vld [vmem:[%s6389_s1 + $0x848] sm:$0xff] }
  0xfc   : > { %1443 = vmatpush.msra.mxu0 %v180_v53  ;;  %1463 = vmatpush.msra.mxu1 %v580_v54  ;;  %v1166_v63 = vpop.f32.mrf.mxu2  ;;  %v1186_v4 = vpop.f32.mrf.mxu3  ;;  %v2226_v5 = vadd.f32 %v2225_v59, %v2224_v52  ;;  %v808_v50 = vld [vmem:[%s6389_s1 + $0x14c8] sm:$0xff]  ;;  %v382_v53 = vld [vmem:[%s6389_s1 + $0x778] sm:$0xff]  ;;  %v2417_v55 = vand.u32 2147483648, %v4695_v58  ;;  %v383_v59 = vld [vmem:[%s6389_s1 + $0x780] sm:$0xff] }
  0xfd   : > { %1483 = vmatpush.msra.mxu2 %v181_v56  ;;  %1503 = vmatpush.msra.mxu3 %v581_v42  ;;  %v1981_v6 = vrot.slane %v1980_v61, 2  ;;  %v4710_v8 = vadd.f32 %v1186_v4, %v1166_v63  ;;  %v782_v54 = vld [vmem:[%s6389_s1 + $0x13f8] sm:$0xff]  ;;  %v757_v63 = vld [vmem:[%s6389_s1 + $0x1330] sm:$0xff]  ;;  %vm4852_vm14 = vcmp.eq.f32.partialorder %v2415_v48, 8.507059e+37 }
  0xfe   : > { %1444 = vmatpush.msra.mxu0 %v155_v60  ;;  %1464 = vmatpush.msra.mxu1 %v555_v57  ;;  %v2227_v10 = vrot.slane %v2226_v5, 1  ;;  %v783_v60 = vld [vmem:[%s6389_s1 + $0x1400] sm:$0xff] }
  0xff   : > { %1484 = vmatpush.msra.mxu2 %v156_v62  ;;  %1504 = vmatpush.msra.mxu3 %v556_v0  ;;  %v1982_v14 = vmax.f32 %v1980_v61, %v1981_v6  ;;  %v1985_v15 = vsel %vm1949_vm0, %v4710_v8, -inf  ;;  %v357_v0 = vld [vmem:[%s6389_s1 + $0x6b0] sm:$0xff]  ;;  %v758_v6 = vld [vmem:[%s6389_s1 + $0x1338] sm:$0xff] }
 0x100   : > { %1445 = vmatmul.f32.vlgmr.msra.gmra.mxu0 %v4213_v21  ;;  %1465 = vmatmul.f32.vlgmr.msra.gmra.mxu1 %v4216_v22  ;;  %v1986_v16 = vrot.slane %v1985_v15, 4  ;;  %v4736_v17 = vadd.f32 %v2227_v10, %v2226_v5  ;;  %v358_v5 = vld [vmem:[%s6389_s1 + $0x6b8] sm:$0xff] }
 0x101   : > { %1485 = vmatmul.f32.vlgmr.msra.gmra.mxu2 %v4213_v21  ;;  %1505 = vmatmul.f32.vlgmr.msra.gmra.mxu3 %v4216_v22  ;;  %v1983_v18 = vrot.slane %v1982_v14, 1  ;;  %v508_v21 = vld [vmem:[%s6389_s1 + $0xb68] sm:$0xff]  ;;  %v4744_v19 = vpop.eup %2988 }
 0x102   : > { %1509 = vmatpush.msrb.mxu0 %v532_v9  ;;  %1529 = vmatpush.msrb.mxu1 %v932_v7  ;;  %v908_v22 = vld [vmem:[%s6389_s1 + $0x17e8] sm:$0xff]  ;;  %v1987_v25 = vmax.f32 %v1985_v15, %v1986_v16  ;;  %v2407_v20 = vmul.f32 %v4744_v19, %v4695_v58  ;;  %2990 = vrcp.f32 %v4736_v17  ;;  %vm2412_vm10 = vweird.f32 %v4744_v19  ;;  %v333_v15 = vld [vmem:[%s6389_s1 + $0x5f0] sm:$0xff] }
 0x103   : > { %1549 = vmatpush.msrb.mxu2 %v533_v12  ;;  %1569 = vmatpush.msrb.mxu3 %v933_v13  ;;  %v1984_v28 = vmax.f32 %v1982_v14, %v1983_v18  ;;  %vm2426_vm11 = vweird.f32 %v4736_v17  ;;  %v2430_v56 = vand.u32 2147483647, %v4736_v17  ;;  %v2432_v42 = vand.u32 2147483648, %v4736_v17  ;;  %vm4835_vm13 = vmor %vm2411_vm9, %vm2412_vm10  ;;  %v332_v58 = vld [vmem:[%s6389_s1 + $0x5e8] sm:$0xff] }
 0x104   : > { %1510 = vmatpush.msrb.mxu0 %v507_v1  ;;  %1530 = vmatpush.msrb.mxu1 %v907_v2  ;;  %v1988_v31 = vrot.slane %v1987_v25, 2  ;;  %v2408_v3 = vsub.f32 1.0, %v2407_v20  ;;  %v732_v7 = vld [vmem:[%s6389_s1 + $0x1268] sm:$0xff]  ;;  %v2418_v12 = vor.u32 1.1754944e-38, %v2417_v55  ;;  %v733_v1 = vld [vmem:[%s6389_s1 + $0x1270] sm:$0xff] }
 0x105   : > { %1550 = vmatpush.msrb.mxu2 %v508_v21  ;;  %1570 = vmatpush.msrb.mxu3 %v908_v22  ;;  %v2130_v34 = vsub.f32 %v4667_v43, %v1984_v28  ;;  %v2433_v14 = vor.u32 1.1754944e-38, %v2432_v42  ;;  %vm4876_vm1 = vcmp.eq.f32.partialorder %v2430_v56, 8.507059e+37  ;;  %v307_v21 = vld [vmem:[%s6389_s1 + $0x520] sm:$0xff]  ;;  %v608_v55 = vld [vmem:[%s6389_s1 + $0xe88] sm:$0xff] }
 0x106   : > { %1511 = vmatpush.msrb.mxu0 %v482_v23  ;;  %1531 = vmatpush.msrb.mxu1 %v882_v24  ;;  %v1989_v36 = vmax.f32 %v1987_v25, %v1988_v31  ;;  %v2409_v41 = vmul.f32 %v4744_v19, %v2408_v3  ;;  %v707_v22 = vld [vmem:[%s6389_s1 + $0x11a0] sm:$0xff]  ;;  %v308_v23 = vld [vmem:[%s6389_s1 + $0x528] sm:$0xff] }
 0x107   : > { %1551 = vmatpush.msrb.mxu2 %v483_v26  ;;  %1571 = vmatpush.msrb.mxu3 %v883_v27  ;;  %v2159_v43 = vmul.f32 1.442695, %v2130_v34  ;;  %v708_v24 = vld [vmem:[%s6389_s1 + $0x11a8] sm:$0xff]  ;;  %v282_v26 = vld [vmem:[%s6389_s1 + $0x458] sm:$0xff]  ;;  %v683_v31 = vld [vmem:[%s6389_s1 + $0x10e0] sm:$0xff] }
 0x108   : > { %1512 = vmatpush.msrb.mxu0 %v457_v29  ;;  %1532 = vmatpush.msrb.mxu1 %v857_v30  ;;  %v1990_v44 = vrot.slane %v1989_v36, 1  ;;  %v4793_v47 = vpop.eup %2990  ;;  %v2410_v57 = vadd.f32 %v4744_v19, %v2409_v41  ;;  %v682_v27 = vld [vmem:[%s6389_s1 + $0x10d8] sm:$0xff]  ;;  %v283_v30 = vld [vmem:[%s6389_s1 + $0x460] sm:$0xff]  ;;  %v657_v34 = vld [vmem:[%s6389_s1 + $0x1010] sm:$0xff] }
 0x109   : > { %1552 = vmatpush.msrb.mxu2 %v458_v33  ;;  %1572 = vmatpush.msrb.mxu3 %v858_v35  ;;  %v2422_v51 = vmul.f32 %v4793_v47, %v4736_v17  ;;  %2992 = vpow2.f32 %v2159_v43  ;;  %vm2427_vm12 = vweird.f32 %v4793_v47  ;;  %v257_v35 = vld [vmem:[%s6389_s1 + $0x390] sm:$0xff]  ;;  %v232_v41 = vld [vmem:[%s6389_s1 + $0x2c8] sm:$0xff] }
 0x10a   : > { %1513 = vmatpush.msrb.mxu0 %v432_v37  ;;  %1533 = vmatpush.msrb.mxu1 %v832_v38  ;;  %v1991_v52 = vmax.f32 %v1989_v36, %v1990_v44  ;;  %vm4860_vm15 = vmor %vm2426_vm11, %vm2427_vm12  ;;  %v2414_v16 = vsel %vm4835_vm13, %v4744_v19, %v2410_v57  ;;  %v258_v36 = vld [vmem:[%s6389_s1 + $0x398] sm:$0xff]  ;;  %v632_v43 = vld [vmem:[%s6389_s1 + $0xf48] sm:$0xff] }
 0x10b   : > { %1553 = vmatpush.msrb.mxu2 %v433_v39  ;;  %1573 = vmatpush.msrb.mxu3 %v833_v40  ;;  %v2423_v61 = vsub.f32 1.0, %v2422_v51  ;;  %v2419_v28 = vsel %vm4852_vm14, %v2418_v12, %v2414_v16  ;;  %v582_v57 = vld [vmem:[%s6389_s1 + $0xdb8] sm:$0xff]  ;;  %v4999_v18 = vld.sshfl [vmem:[#allocation1 + $0x8] sm:$0xff pattern:$0x75316420] }
 0x10c   : > { %1514 = vmatpush.msrb.mxu0 %v407_v45  ;;  %1534 = vmatpush.msrb.mxu1 %v807_v46  ;;  %v2131_v62 = vsub.f32 %v4710_v8, %v1991_v52  ;;  %v2753_v38 = vmul.f32 %v4593_v11, %v2419_v28  ;;  %v233_v11 = vld [vmem:[%s6389_s1 + $0x2d0] sm:$0xff]  ;;  %v207_v52 = vld [vmem:[%s6389_s1 + $0x200] sm:$0xff]  ;;  %v510_v28 = vld [vmem:[%s6389_s1 + $0xb78] sm:$0xff] }
 0x10d   : > { %1554 = vmatpush.msrb.mxu2 %v408_v49  ;;  %1574 = vmatpush.msrb.mxu3 %v808_v50  ;;  %v2424_v8 = vmul.f32 %v4793_v47, %v2423_v61 }
 0x10e   : > { %1515 = vmatpush.msrb.mxu0 %v382_v53  ;;  %1535 = vmatpush.msrb.mxu1 %v782_v54  ;;  %v2161_v9 = vmul.f32 1.442695, %v2131_v62  ;;  %v607_v53 = vld [vmem:[%s6389_s1 + $0xe80] sm:$0xff]  ;;  %v208_v54 = vld [vmem:[%s6389_s1 + $0x208] sm:$0xff] }
 0x10f   : > { %1555 = vmatpush.msrb.mxu2 %v383_v59  ;;  %1575 = vmatpush.msrb.mxu3 %v783_v60  ;;  %v4870_v2 = vpop.eup %2992  ;;  %v2425_v17 = vadd.f32 %v4793_v47, %v2424_v8  ;;  %v182_v60 = vld [vmem:[%s6389_s1 + $0x138] sm:$0xff]  ;;  %v183_v62 = vld [vmem:[%s6389_s1 + $0x140] sm:$0xff] }
 0x110   : > { %1516 = vmatpush.msrb.mxu0 %v357_v0  ;;  %1536 = vmatpush.msrb.mxu1 %v757_v63  ;;  %2994 = vpow2.f32 %v2161_v9  ;;  %v2229_v19 = vsel %vm1949_vm0, %v4870_v2, 0.0  ;;  %v583_v0 = vld [vmem:[%s6389_s1 + $0xdc0] sm:$0xff]  ;;  %v158_v9 = vld [vmem:[%s6389_s1 + $0x78] sm:$0xff] }
 0x111   : > { %1556 = vmatpush.msrb.mxu2 %v358_v5  ;;  %1576 = vmatpush.msrb.mxu3 %v758_v6  ;;  %v2429_v25 = vsel %vm4860_vm15, %v4793_v47, %v2425_v17  ;;  %v2230_v20 = vrot.slane %v2229_v19, 4  ;;  %v633_v47 = vld [vmem:[%s6389_s1 + $0xf50] sm:$0xff]  ;;  %v4996_v17 = vld.sshfl [vmem:[#allocation1] sm:$0xff pattern:$0x75316420] }
 0x112   : > { %1517 = vmatpush.msrb.mxu0 %v332_v58  ;;  %1537 = vmatpush.msrb.mxu1 %v732_v7  ;;  %v2434_v29 = vsel %vm4876_vm1, %v2433_v14, %v2429_v25  ;;  %v157_v5 = vld [vmem:[%s6389_s1 + $0x70] sm:$0xff]  ;;  %v558_v58 = vld [vmem:[%s6389_s1 + $0xcf8] sm:$0xff] }
 0x113   : > { %1557 = vmatpush.msrb.mxu2 %v333_v15  ;;  %1577 = vmatpush.msrb.mxu3 %v733_v1  ;;  %v2754_v3 = vmul.f32 %v4646_v32, %v2434_v29  ;;  %v2231_v33 = vadd.f32 %v2230_v20, %v2229_v19  ;;  %v658_v32 = vld [vmem:[%s6389_s1 + $0x1018] sm:$0xff]  ;;  %v557_v6 = vld [vmem:[%s6389_s1 + $0xcf0] sm:$0xff] }
 0x114   : > { %1518 = vmatpush.msrb.mxu0 %v307_v21  ;;  %1538 = vmatpush.msrb.mxu1 %v707_v22  ;;  %v534_v15 = vld [vmem:[%s6389_s1 + $0xc38] sm:$0xff]  ;;  %v535_v21 = vld [vmem:[%s6389_s1 + $0xc40] sm:$0xff]  ;;  %v909_v25 = vld [vmem:[%s6389_s1 + $0x17f0] sm:$0xff] }
 0x115   : > { %1558 = vmatpush.msrb.mxu2 %v308_v23  ;;  %1578 = vmatpush.msrb.mxu3 %v708_v24  ;;  %v2801_v39 = vrot.slane %v2754_v3, 4  ;;  %v2232_v40 = vrot.slane %v2231_v33, 2  ;;  %v934_v1 = vld [vmem:[%s6389_s1 + $0x18b8] sm:$0xff]  ;;  %v935_v22 = vld [vmem:[%s6389_s1 + $0x18c0] sm:$0xff]  ;;  %v509_v24 = vld [vmem:[%s6389_s1 + $0xb70] sm:$0xff] }
 0x116   : > { %1519 = vmatpush.msrb.mxu0 %v282_v26  ;;  %1539 = vmatpush.msrb.mxu1 %v682_v27  ;;  %v4926_v37 = vpop.eup %2994  ;;  %v910_v29 = vld [vmem:[%s6389_s1 + $0x17f8] sm:$0xff]  ;;  %v884_v3 = vld [vmem:[%s6389_s1 + $0x1728] sm:$0xff] }
 0x117   : > { %1559 = vmatpush.msrb.mxu2 %v283_v30  ;;  %1579 = vmatpush.msrb.mxu3 %v683_v31  ;;  %v1206_v44 = vpop.f32.mrf.mxu0  ;;  %v1226_v45 = vpop.f32.mrf.mxu1  ;;  %v2236_v46 = vsel %vm1949_vm0, %v4926_v37, 0.0  ;;  %v2813_v49 = vsel %vm1949_vm0, %v2753_v38, %v2801_v39  ;;  %v2233_v50 = vadd.f32 %v2232_v40, %v2231_v33  ;;  %v484_v31 = vld [vmem:[%s6389_s1 + $0xaa8] sm:$0xff]  ;;  %v459_v38 = vld [vmem:[%s6389_s1 + $0x9e0] sm:$0xff] }
 0x118   : > { %1520 = vmatpush.msrb.mxu0 %v257_v35  ;;  %1540 = vmatpush.msrb.mxu1 %v657_v34  ;;  %v4943_v48 = vadd.f32 %v1226_v45, %v1206_v44  ;;  %v2237_v51 = vrot.slane %v2236_v46, 4  ;;  %2837 = vst [vmem:[%s4656_s26 + $0x8] sm:$0xff] %v2813_v49  ;;  %v485_v34 = vld [vmem:[%s6389_s1 + $0xab0] sm:$0xff]  ;;  %v859_v39 = vld [vmem:[%s6389_s1 + $0x1660] sm:$0xff]  ;;  %v860_v44 = vld [vmem:[%s6389_s1 + $0x1668] sm:$0xff] }
 0x119   : > { %1560 = vmatpush.msrb.mxu2 %v258_v36  ;;  %1580 = vmatpush.msrb.mxu3 %v658_v32  ;;  %v2234_v42 = vrot.slane %v2233_v50, 1  ;;  %v885_v36 = vld [vmem:[%s6389_s1 + $0x1730] sm:$0xff]  ;;  %v435_v49 = vld [vmem:[%s6389_s1 + $0x920] sm:$0xff] }
 0x11a   : > { %1521 = vmatpush.msrb.mxu0 %v232_v41  ;;  %1541 = vmatpush.msrb.mxu1 %v632_v43  ;;  %v1992_v56 = vsel %vm1949_vm0, %v4943_v48, -inf  ;;  %v2238_v59 = vadd.f32 %v2237_v51, %v2236_v46  ;;  %v460_v43 = vld [vmem:[%s6389_s1 + $0x9e8] sm:$0xff] }
 0x11b   : > { %1561 = vmatpush.msrb.mxu2 %v233_v11  ;;  %1581 = vmatpush.msrb.mxu3 %v633_v47  ;;  %v1993_v61 = vrot.slane %v1992_v56, 4  ;;  %v4973_v63 = vadd.f32 %v2234_v42, %v2233_v50  ;;  %v434_v11 = vld [vmem:[%s6389_s1 + $0x918] sm:$0xff] }
 0x11c   : > { %1522 = vmatpush.msrb.mxu0 %v207_v52  ;;  %1542 = vmatpush.msrb.mxu1 %v607_v53  ;;  %v2239_v4 = vrot.slane %v2238_v59, 2  ;;  %v834_v47 = vld [vmem:[%s6389_s1 + $0x1598] sm:$0xff]  ;;  %v409_v53 = vld [vmem:[%s6389_s1 + $0x850] sm:$0xff] }
 0x11d   : > { %1562 = vmatpush.msrb.mxu2 %v208_v54  ;;  %1582 = vmatpush.msrb.mxu3 %v608_v55  ;;  %v1994_v8 = vmax.f32 %v1992_v56, %v1993_v61  ;;  %2996 = vrcp.f32 %v4973_v63  ;;  %v809_v54 = vld [vmem:[%s6389_s1 + $0x14d0] sm:$0xff]  ;;  %vm2441_vm2 = vweird.f32 %v4973_v63  ;;  %v2445_v56 = vand.u32 2147483647, %v4973_v63  ;;  %v410_v42 = vld [vmem:[%s6389_s1 + $0x858] sm:$0xff]  ;;  %v384_v61 = vld [vmem:[%s6389_s1 + $0x788] sm:$0xff] }
 0x11e   : > { %1523 = vmatpush.msrb.mxu0 %v182_v60  ;;  %1543 = vmatpush.msrb.mxu1 %v582_v57  ;;  %v1246_v7 = vpop.f32.mrf.mxu2  ;;  %v1266_v10 = vpop.f32.mrf.mxu3  ;;  %v2240_v12 = vadd.f32 %v2239_v4, %v2238_v59  ;;  %v810_v59 = vld [vmem:[%s6389_s1 + $0x14d8] sm:$0xff] }
 0x11f   : > { %1563 = vmatpush.msrb.mxu2 %v183_v62  ;;  %1583 = vmatpush.msrb.mxu3 %v583_v0  ;;  %v1995_v13 = vrot.slane %v1994_v8, 2  ;;  %v4988_v14 = vadd.f32 %v1266_v10, %v1246_v7  ;;  %v784_v62 = vld [vmem:[%s6389_s1 + $0x1408] sm:$0xff]  ;;  %v2447_v0 = vand.u32 2147483648, %v4973_v63  ;;  %v359_v10 = vld [vmem:[%s6389_s1 + $0x6c0] sm:$0xff]  ;;  %vm5134_vm7 = vcmp.eq.f32.partialorder %v2445_v56, 8.507059e+37 }
 0x120   : > { %1524 = vmatpush.msrb.mxu0 %v157_v5  ;;  %1544 = vmatpush.msrb.mxu1 %v557_v6  ;;  %v2241_v16 = vrot.slane %v2240_v12, 1  ;;  %v385_v6 = vld [vmem:[%s6389_s1 + $0x790] sm:$0xff] }
 0x121   : > { %1564 = vmatpush.msrb.mxu2 %v158_v9  ;;  %1584 = vmatpush.msrb.mxu3 %v558_v58  ;;  %v1996_v19 = vmax.f32 %v1994_v8, %v1995_v13  ;;  %v1999_v23 = vsel %vm1949_vm0, %v4988_v14, -inf  ;;  %v785_v8 = vld [vmem:[%s6389_s1 + $0x1410] sm:$0xff] }
 0x122   : > { %1525 = vmatmul.f32.vlgmr.msrb.gmra.mxu0 %v4996_v17  ;;  %1545 = vmatmul.f32.vlgmr.msrb.gmra.mxu1 %v4999_v18  ;;  %v2000_v20 = vrot.slane %v1999_v23, 4  ;;  %v5018_v26 = vadd.f32 %v2241_v16, %v2240_v12  ;;  %v759_v12 = vld [vmem:[%s6389_s1 + $0x1340] sm:$0xff]  ;;  %v585_v13 = vld [vmem:[%s6389_s1 + $0xdd0] sm:$0xff] }
 0x123   : > { %1565 = vmatmul.f32.vlgmr.msrb.gmra.mxu2 %v4996_v17  ;;  %1585 = vmatmul.f32.vlgmr.msrb.gmra.mxu3 %v4999_v18  ;;  %v1997_v27 = vrot.slane %v1996_v19, 1  ;;  %v5026_v30 = vpop.eup %2996 }
 0x124   : > { %1589 = vmatpush.msra.mxu0 %v534_v15  ;;  %1609 = vmatpush.msra.mxu1 %v934_v1  ;;  %v2001_v33 = vmax.f32 %v1999_v23, %v2000_v20  ;;  %v2437_v35 = vmul.f32 %v5026_v30, %v4973_v63  ;;  %2998 = vrcp.f32 %v5018_v26  ;;  %vm2442_vm3 = vweird.f32 %v5026_v30  ;;  %v760_v15 = vld [vmem:[%s6389_s1 + $0x1348] sm:$0xff]  ;;  %v334_v63 = vld [vmem:[%s6389_s1 + $0x5f8] sm:$0xff]  ;;  %v735_v20 = vld [vmem:[%s6389_s1 + $0x1280] sm:$0xff] }
 0x125   : > { %1629 = vmatpush.msra.mxu2 %v535_v21  ;;  %1649 = vmatpush.msra.mxu3 %v935_v22  ;;  %v1998_v32 = vmax.f32 %v1996_v19, %v1997_v27  ;;  %vm2456_vm4 = vweird.f32 %v5018_v26  ;;  %v2460_v4 = vand.u32 2147483647, %v5018_v26  ;;  %v2462_v5 = vand.u32 2147483648, %v5018_v26  ;;  %vm5117_vm6 = vmor %vm2441_vm2, %vm2442_vm3  ;;  %v734_v21 = vld [vmem:[%s6389_s1 + $0x1278] sm:$0xff]  ;;  %v560_v22 = vld [vmem:[%s6389_s1 + $0xd08] sm:$0xff] }
 0x126   : > { %1590 = vmatpush.msra.mxu0 %v509_v24  ;;  %1610 = vmatpush.msra.mxu1 %v909_v25  ;;  %v2002_v40 = vrot.slane %v2001_v33, 2  ;;  %v2438_v41 = vsub.f32 1.0, %v2437_v35  ;;  %v2448_v19 = vor.u32 1.1754944e-38, %v2447_v0  ;;  %v335_v25 = vld [vmem:[%s6389_s1 + $0x600] sm:$0xff]  ;;  %v710_v35 = vld [vmem:[%s6389_s1 + $0x11b8] sm:$0xff]  ;;  %v609_v0 = vld [vmem:[%s6389_s1 + $0xe90] sm:$0xff] }
 0x127   : > { %1630 = vmatpush.msra.mxu2 %v510_v28  ;;  %1650 = vmatpush.msra.mxu3 %v910_v29  ;;  %v2132_v45 = vsub.f32 %v4943_v48, %v1998_v32  ;;  %v835_v48 = vld [vmem:[%s6389_s1 + $0x15a0] sm:$0xff]  ;;  %v2463_v24 = vor.u32 1.1754944e-38, %v2462_v5  ;;  %vm5158_vm9 = vcmp.eq.f32.partialorder %v2460_v4, 8.507059e+37  ;;  %v284_v32 = vld [vmem:[%s6389_s1 + $0x468] sm:$0xff]  ;;  %v210_v4 = vld [vmem:[%s6389_s1 + $0x218] sm:$0xff] }
 0x128   : > { %1591 = vmatpush.msra.mxu0 %v484_v31  ;;  %1611 = vmatpush.msra.mxu1 %v884_v3  ;;  %v2003_v46 = vmax.f32 %v2001_v33, %v2002_v40  ;;  %v2439_v50 = vmul.f32 %v5026_v30, %v2438_v41  ;;  %v309_v31 = vld [vmem:[%s6389_s1 + $0x530] sm:$0xff]  ;;  %v310_v33 = vld [vmem:[%s6389_s1 + $0x538] sm:$0xff] }
 0x129   : > { %1631 = vmatpush.msra.mxu2 %v485_v34  ;;  %1651 = vmatpush.msra.mxu3 %v885_v36  ;;  %v2163_v51 = vmul.f32 1.442695, %v2132_v45  ;;  %v709_v3 = vld [vmem:[%s6389_s1 + $0x11b0] sm:$0xff]  ;;  %v610_v5 = vld [vmem:[%s6389_s1 + $0xe98] sm:$0xff] }
 0x12a   : > { %1592 = vmatpush.msra.mxu0 %v459_v38  ;;  %1612 = vmatpush.msra.mxu1 %v859_v39  ;;  %v2004_v52 = vrot.slane %v2003_v46, 1  ;;  %v5075_v55 = vpop.eup %2998  ;;  %v2440_v9 = vadd.f32 %v5026_v30, %v2439_v50  ;;  %v684_v38 = vld [vmem:[%s6389_s1 + $0x10e8] sm:$0xff]  ;;  %v285_v41 = vld [vmem:[%s6389_s1 + $0x470] sm:$0xff] }
 0x12b   : > { %1632 = vmatpush.msra.mxu2 %v460_v43  ;;  %1652 = vmatpush.msra.mxu3 %v860_v44  ;;  %v2452_v60 = vmul.f32 %v5075_v55, %v5018_v26  ;;  %3000 = vpow2.f32 %v2163_v51  ;;  %vm2457_vm5 = vweird.f32 %v5075_v55  ;;  %v685_v43 = vld [vmem:[%s6389_s1 + $0x10f0] sm:$0xff] }
 0x12c   : > { %1593 = vmatpush.msra.mxu0 %v434_v11  ;;  %1613 = vmatpush.msra.mxu1 %v834_v47  ;;  %v2005_v57 = vmax.f32 %v2003_v46, %v2004_v52  ;;  %vm5142_vm8 = vmor %vm2456_vm4, %vm2457_vm5  ;;  %v2444_v26 = vsel %vm5117_vm6, %v5026_v30, %v2440_v9  ;;  %v259_v46 = vld [vmem:[%s6389_s1 + $0x3a0] sm:$0xff]  ;;  %v260_v47 = vld [vmem:[%s6389_s1 + $0x3a8] sm:$0xff] }
 0x12d   : > { %1633 = vmatpush.msra.mxu2 %v435_v49  ;;  %1653 = vmatpush.msra.mxu3 %v835_v48  ;;  %v2453_v58 = vsub.f32 1.0, %v2452_v60  ;;  %v2449_v39 = vsel %vm5134_vm7, %v2448_v19, %v2444_v26  ;;  %v659_v11 = vld [vmem:[%s6389_s1 + $0x1020] sm:$0xff]  ;;  %v234_v52 = vld [vmem:[%s6389_s1 + $0x2d8] sm:$0xff]  ;;  %v536_v26 = vld [vmem:[%s6389_s1 + $0xc48] sm:$0xff] }
 0x12e   : > { %1594 = vmatpush.msra.mxu0 %v409_v53  ;;  %1614 = vmatpush.msra.mxu1 %v809_v54  ;;  %v2133_v7 = vsub.f32 %v4988_v14, %v2005_v57  ;;  %v360_v14 = vld [vmem:[%s6389_s1 + $0x6c8] sm:$0xff]  ;;  %v2755_v48 = vmul.f32 %v4870_v2, %v2449_v39  ;;  %v634_v53 = vld [vmem:[%s6389_s1 + $0xf58] sm:$0xff]  ;;  %v235_v2 = vld [vmem:[%s6389_s1 + $0x2e0] sm:$0xff] }
 0x12f   : > { %1634 = vmatpush.msra.mxu2 %v410_v42  ;;  %1654 = vmatpush.msra.mxu3 %v810_v59  ;;  %v2454_v1 = vmul.f32 %v5075_v55, %v2453_v58  ;;  %v635_v42 = vld [vmem:[%s6389_s1 + $0xf60] sm:$0xff]  ;;  %v184_v58 = vld [vmem:[%s6389_s1 + $0x148] sm:$0xff] }
 0x130   : > { %1595 = vmatpush.msra.mxu0 %v384_v61  ;;  %1615 = vmatpush.msra.mxu1 %v784_v62  ;;  %v2165_v16 = vmul.f32 1.442695, %v2133_v7  ;;  %v209_v62 = vld [vmem:[%s6389_s1 + $0x210] sm:$0xff]  ;;  %v584_v7 = vld [vmem:[%s6389_s1 + $0xdc8] sm:$0xff] }
 0x131   : > { %1635 = vmatpush.msra.mxu2 %v385_v6  ;;  %1655 = vmatpush.msra.mxu3 %v785_v8  ;;  %v5152_v27 = vpop.eup %3000  ;;  %v2455_v28 = vadd.f32 %v5075_v55, %v2454_v1  ;;  %v159_v1 = vld [vmem:[%s6389_s1 + $0x80] sm:$0xff]  ;;  %v512_v39 = vld [vmem:[%s6389_s1 + $0xb88] sm:$0xff] }
 0x132   : > { %1596 = vmatpush.msra.mxu0 %v359_v10  ;;  %1616 = vmatpush.msra.mxu1 %v759_v12  ;;  %3002 = vpow2.f32 %v2165_v16  ;;  %v2243_v30 = vsel %vm1949_vm0, %v5152_v27, 0.0  ;;  %v185_v12 = vld [vmem:[%s6389_s1 + $0x150] sm:$0xff]  ;;  %v559_v16 = vld [vmem:[%s6389_s1 + $0xd00] sm:$0xff] }
 0x133   : > { %1636 = vmatpush.msra.mxu2 %v360_v14  ;;  %1656 = vmatpush.msra.mxu3 %v760_v15  ;;  %v2459_v34 = vsel %vm5142_vm8, %v5075_v55, %v2455_v28  ;;  %v2244_v36 = vrot.slane %v2243_v30, 4  ;;  %v936_v28 = vld [vmem:[%s6389_s1 + $0x18c8] sm:$0xff] }
 0x134   : > { %1597 = vmatpush.msra.mxu0 %v334_v63  ;;  %1617 = vmatpush.msra.mxu1 %v734_v21  ;;  %v2464_v40 = vsel %vm5158_vm9, %v2463_v24, %v2459_v34  ;;  %v160_v21 = vld [vmem:[%s6389_s1 + $0x88] sm:$0xff]  ;;  %v911_v34 = vld [vmem:[%s6389_s1 + $0x1800] sm:$0xff] }
 0x135   : > { %1637 = vmatpush.msra.mxu2 %v335_v25  ;;  %1657 = vmatpush.msra.mxu3 %v735_v20  ;;  %v2756_v44 = vmul.f32 %v4926_v37, %v2464_v40  ;;  %v2245_v45 = vadd.f32 %v2244_v36, %v2243_v30  ;;  %v660_v37 = vld [vmem:[%s6389_s1 + $0x1028] sm:$0xff] }
 0x136   : > { %1598 = vmatpush.msra.mxu0 %v309_v31  ;;  %1618 = vmatpush.msra.mxu1 %v709_v3  ;;  %v537_v31 = vld [vmem:[%s6389_s1 + $0xc50] sm:$0xff]  ;;  %v912_v40 = vld [vmem:[%s6389_s1 + $0x1808] sm:$0xff] }
 0x137   : > { %1638 = vmatpush.msra.mxu2 %v310_v33  ;;  %1658 = vmatpush.msra.mxu3 %v710_v35  ;;  %v2802_v50 = vrot.slane %v2756_v44, 4  ;;  %v2246_v51 = vrot.slane %v2245_v45, 2  ;;  %v937_v3 = vld [vmem:[%s6389_s1 + $0x18d0] sm:$0xff]  ;;  %v511_v35 = vld [vmem:[%s6389_s1 + $0xb80] sm:$0xff]  ;;  %v886_v44 = vld [vmem:[%s6389_s1 + $0x1738] sm:$0xff] }
 0x138   : > { %1599 = vmatpush.msra.mxu0 %v284_v32  ;;  %1619 = vmatpush.msra.mxu1 %v684_v38  ;;  %v5208_v49 = vpop.eup %3002 }
 0x139   : > { %1639 = vmatpush.msra.mxu2 %v285_v41  ;;  %1659 = vmatpush.msra.mxu3 %v685_v43  ;;  %v1286_v54 = vpop.f32.mrf.mxu0  ;;  %v1306_v55 = vpop.f32.mrf.mxu1  ;;  %v2250_v56 = vsel %vm1949_vm0, %v5208_v49, 0.0  ;;  %v2814_v60 = vsel %vm1949_vm0, %v2755_v48, %v2802_v50  ;;  %v2247_v57 = vadd.f32 %v2246_v51, %v2245_v45  ;;  %v486_v43 = vld [vmem:[%s6389_s1 + $0xab8] sm:$0xff]  ;;  %v461_v48 = vld [vmem:[%s6389_s1 + $0x9f0] sm:$0xff] }
 0x13a   : > { %1600 = vmatpush.msra.mxu0 %v259_v46  ;;  %1620 = vmatpush.msra.mxu1 %v659_v11  ;;  %v5225_v59 = vadd.f32 %v1306_v55, %v1286_v54  ;;  %v2251_v61 = vrot.slane %v2250_v56, 4  ;;  %2838 = vst [vmem:[%s4656_s26 + $0x10] sm:$0xff] %v2814_v60  ;;  %v487_v11 = vld [vmem:[%s6389_s1 + $0xac0] sm:$0xff]  ;;  %v861_v50 = vld [vmem:[%s6389_s1 + $0x1670] sm:$0xff]  ;;  %v862_v54 = vld [vmem:[%s6389_s1 + $0x1678] sm:$0xff] }
 0x13b   : > { %1640 = vmatpush.msra.mxu2 %v260_v47  ;;  %1660 = vmatpush.msra.mxu3 %v660_v37  ;;  %v2248_v8 = vrot.slane %v2247_v57, 1  ;;  %v887_v47 = vld [vmem:[%s6389_s1 + $0x1740] sm:$0xff]  ;;  %v437_v60 = vld [vmem:[%s6389_s1 + $0x930] sm:$0xff] }
 0x13c   : > { %1601 = vmatpush.msra.mxu0 %v234_v52  ;;  %1621 = vmatpush.msra.mxu1 %v634_v53  ;;  %v2006_v6 = vsel %vm1949_vm0, %v5225_v59, -inf  ;;  %v2252_v9 = vadd.f32 %v2251_v61, %v2250_v56  ;;  %v462_v53 = vld [vmem:[%s6389_s1 + $0x9f8] sm:$0xff] }
 0x13d   : > { %1641 = vmatpush.msra.mxu2 %v235_v2  ;;  %1661 = vmatpush.msra.mxu3 %v635_v42  ;;  %v2007_v10 = vrot.slane %v2006_v6, 4  ;;  %v5255_v14 = vadd.f32 %v2248_v8, %v2247_v57  ;;  %v436_v2 = vld [vmem:[%s6389_s1 + $0x928] sm:$0xff] }
 0x13e   : > { %1602 = vmatpush.msra.mxu0 %v209_v62  ;;  %1622 = vmatpush.msra.mxu1 %v609_v0  ;;  %v2253_v15 = vrot.slane %v2252_v9, 2  ;;  %v836_v42 = vld [vmem:[%s6389_s1 + $0x15a8] sm:$0xff]  ;;  %v411_v0 = vld [vmem:[%s6389_s1 + $0x860] sm:$0xff] }
 0x13f   : > { %1642 = vmatpush.msra.mxu2 %v210_v4  ;;  %1662 = vmatpush.msra.mxu3 %v610_v5  ;;  %v2008_v63 = vmax.f32 %v2006_v6, %v2007_v10  ;;  %3004 = vrcp.f32 %v5255_v14  ;;  %v811_v4 = vld [vmem:[%s6389_s1 + $0x14e0] sm:$0xff]  ;;  %vm2471_vm10 = vweird.f32 %v5255_v14  ;;  %v2475_v6 = vand.u32 2147483647, %v5255_v14  ;;  %v412_v8 = vld [vmem:[%s6389_s1 + $0x868] sm:$0xff]  ;;  %v386_v10 = vld [vmem:[%s6389_s1 + $0x798] sm:$0xff] }
 0x140   : > { %1603 = vmatpush.msra.mxu0 %v184_v58  ;;  %1623 = vmatpush.msra.mxu1 %v584_v7  ;;  %v1326_v19 = vpop.f32.mrf.mxu2  ;;  %v1346_v23 = vpop.f32.mrf.mxu3  ;;  %v2254_v24 = vadd.f32 %v2253_v15, %v2252_v9  ;;  %v812_v9 = vld [vmem:[%s6389_s1 + $0x14e8] sm:$0xff] }
 0x141   : > { %1643 = vmatpush.msra.mxu2 %v185_v12  ;;  %1663 = vmatpush.msra.mxu3 %v585_v13  ;;  %v2009_v25 = vrot.slane %v2008_v63, 2  ;;  %v5270_v20 = vadd.f32 %v1346_v23, %v1326_v19  ;;  %v786_v12 = vld [vmem:[%s6389_s1 + $0x1418] sm:$0xff]  ;;  %v2477_v13 = vand.u32 2147483648, %v5255_v14  ;;  %v361_v23 = vld [vmem:[%s6389_s1 + $0x6d0] sm:$0xff]  ;;  %vm5412_vm15 = vcmp.eq.f32.partialorder %v2475_v6, 8.507059e+37 }
 0x142   : > { %1604 = vmatpush.msra.mxu0 %v159_v1  ;;  %1624 = vmatpush.msra.mxu1 %v559_v16  ;;  %v2255_v29 = vrot.slane %v2254_v24, 1  ;;  %v387_v16 = vld [vmem:[%s6389_s1 + $0x7a0] sm:$0xff] }
 0x143   : > { %1644 = vmatpush.msra.mxu2 %v160_v21  ;;  %1664 = vmatpush.msra.mxu3 %v560_v22  ;;  %v2010_v30 = vmax.f32 %v2008_v63, %v2009_v25  ;;  %v2013_v33 = vsel %vm1949_vm0, %v5270_v20, -inf  ;;  %v787_v63 = vld [vmem:[%s6389_s1 + $0x1420] sm:$0xff] }
 0x144   : > { %1605 = vmatmul.f32.vlgmr.msra.gmra.mxu0 %v4996_v17  ;;  %1625 = vmatmul.f32.vlgmr.msra.gmra.mxu1 %v4999_v18  ;;  %v2014_v36 = vrot.slane %v2013_v33, 4  ;;  %v5296_v32 = vadd.f32 %v2255_v29, %v2254_v24  ;;  %v761_v24 = vld [vmem:[%s6389_s1 + $0x1350] sm:$0xff]  ;;  %v587_v25 = vld [vmem:[%s6389_s1 + $0xde0] sm:$0xff] }
 0x145   : > { %1645 = vmatmul.f32.vlgmr.msra.gmra.mxu2 %v4996_v17  ;;  %1665 = vmatmul.f32.vlgmr.msra.gmra.mxu3 %v4999_v18  ;;  %v2011_v38 = vrot.slane %v2010_v30, 1  ;;  %v5304_v41 = vpop.eup %3004 }
 0x146   : > { %1669 = vmatpush.msrb.mxu0 %v536_v26  ;;  %1689 = vmatpush.msrb.mxu1 %v936_v28  ;;  %v2015_v45 = vmax.f32 %v2013_v33, %v2014_v36  ;;  %v2467_v46 = vmul.f32 %v5304_v41, %v5255_v14  ;;  %3006 = vrcp.f32 %v5296_v32  ;;  %vm2472_vm11 = vweird.f32 %v5304_v41  ;;  %v762_v26 = vld [vmem:[%s6389_s1 + $0x1358] sm:$0xff]  ;;  %v336_v14 = vld [vmem:[%s6389_s1 + $0x608] sm:$0xff]  ;;  %v737_v36 = vld [vmem:[%s6389_s1 + $0x1290] sm:$0xff] }
 0x147   : > { %1709 = vmatpush.msrb.mxu2 %v537_v31  ;;  %1729 = vmatpush.msrb.mxu3 %v937_v3  ;;  %v2012_v37 = vmax.f32 %v2010_v30, %v2011_v38  ;;  %vm2486_vm12 = vweird.f32 %v5296_v32  ;;  %v2490_v15 = vand.u32 2147483647, %v5296_v32  ;;  %v2492_v1 = vand.u32 2147483648, %v5296_v32  ;;  %vm5395_vm14 = vmor %vm2471_vm10, %vm2472_vm11  ;;  %v736_v31 = vld [vmem:[%s6389_s1 + $0x1288] sm:$0xff]  ;;  %v562_v3 = vld [vmem:[%s6389_s1 + $0xd18] sm:$0xff] }
 0x148   : > { %1670 = vmatpush.msrb.mxu0 %v511_v35  ;;  %1690 = vmatpush.msrb.mxu1 %v911_v34  ;;  %v2016_v51 = vrot.slane %v2015_v45, 2  ;;  %v2468_v52 = vsub.f32 1.0, %v2467_v46  ;;  %v2478_v30 = vor.u32 1.1754944e-38, %v2477_v13  ;;  %v337_v34 = vld [vmem:[%s6389_s1 + $0x610] sm:$0xff]  ;;  %v712_v46 = vld [vmem:[%s6389_s1 + $0x11c8] sm:$0xff]  ;;  %v611_v13 = vld [vmem:[%s6389_s1 + $0xea0] sm:$0xff] }
 0x149   : > { %1710 = vmatpush.msrb.mxu2 %v512_v39  ;;  %1730 = vmatpush.msrb.mxu3 %v912_v40  ;;  %v2134_v55 = vsub.f32 %v5225_v59, %v2012_v37  ;;  %v837_v59 = vld [vmem:[%s6389_s1 + $0x15b0] sm:$0xff]  ;;  %v2493_v35 = vor.u32 1.1754944e-38, %v2492_v1  ;;  %vm5436_vm2 = vcmp.eq.f32.partialorder %v2490_v15, 8.507059e+37  ;;  %v286_v37 = vld [vmem:[%s6389_s1 + $0x478] sm:$0xff]  ;;  %v212_v15 = vld [vmem:[%s6389_s1 + $0x228] sm:$0xff] }
 0x14a   : > { %1671 = vmatpush.msrb.mxu0 %v486_v43  ;;  %1691 = vmatpush.msrb.mxu1 %v886_v44  ;;  %v2017_v56 = vmax.f32 %v2015_v45, %v2016_v51  ;;  %v2469_v57 = vmul.f32 %v5304_v41, %v2468_v52  ;;  %v311_v43 = vld [vmem:[%s6389_s1 + $0x540] sm:$0xff]  ;;  %v312_v45 = vld [vmem:[%s6389_s1 + $0x548] sm:$0xff] }
 0x14b   : > { %1711 = vmatpush.msrb.mxu2 %v487_v11  ;;  %1731 = vmatpush.msrb.mxu3 %v887_v47  ;;  %v2167_v61 = vmul.f32 1.442695, %v2134_v55  ;;  %v711_v44 = vld [vmem:[%s6389_s1 + $0x11c0] sm:$0xff]  ;;  %v612_v1 = vld [vmem:[%s6389_s1 + $0xea8] sm:$0xff] }
 0x14c   : > { %1672 = vmatpush.msrb.mxu0 %v461_v48  ;;  %1692 = vmatpush.msrb.mxu1 %v861_v50  ;;  %v2018_v62 = vrot.slane %v2017_v56, 1  ;;  %v5353_v5 = vpop.eup %3006  ;;  %v2470_v21 = vadd.f32 %v5304_v41, %v2469_v57  ;;  %v686_v48 = vld [vmem:[%s6389_s1 + $0x10f8] sm:$0xff]  ;;  %v287_v52 = vld [vmem:[%s6389_s1 + $0x480] sm:$0xff] }
 0x14d   : > { %1712 = vmatpush.msrb.mxu2 %v462_v53  ;;  %1732 = vmatpush.msrb.mxu3 %v862_v54  ;;  %v2482_v58 = vmul.f32 %v5353_v5, %v5296_v32  ;;  %3008 = vpow2.f32 %v2167_v61  ;;  %vm2487_vm13 = vweird.f32 %v5353_v5  ;;  %v687_v53 = vld [vmem:[%s6389_s1 + $0x1100] sm:$0xff] }
 0x14e   : > { %1673 = vmatpush.msrb.mxu0 %v436_v2  ;;  %1693 = vmatpush.msrb.mxu1 %v836_v42  ;;  %v2019_v7 = vmax.f32 %v2017_v56, %v2018_v62  ;;  %vm5420_vm1 = vmor %vm2486_vm12, %vm2487_vm13  ;;  %v2474_v32 = vsel %vm5395_vm14, %v5304_v41, %v2470_v21  ;;  %v261_v56 = vld [vmem:[%s6389_s1 + $0x3b0] sm:$0xff]  ;;  %v262_v42 = vld [vmem:[%s6389_s1 + $0x3b8] sm:$0xff] }
 0x14f   : > { %1713 = vmatpush.msrb.mxu2 %v437_v60  ;;  %1733 = vmatpush.msrb.mxu3 %v837_v59  ;;  %v2483_v22 = vsub.f32 1.0, %v2482_v58  ;;  %v2479_v50 = vsel %vm5412_vm15, %v2478_v30, %v2474_v32  ;;  %v661_v2 = vld [vmem:[%s6389_s1 + $0x1030] sm:$0xff]  ;;  %v236_v62 = vld [vmem:[%s6389_s1 + $0x2e8] sm:$0xff]  ;;  %v538_v32 = vld [vmem:[%s6389_s1 + $0xc58] sm:$0xff] }
 0x150   : > { %1674 = vmatpush.msrb.mxu0 %v411_v0  ;;  %1694 = vmatpush.msrb.mxu1 %v811_v4  ;;  %v2135_v19 = vsub.f32 %v5270_v20, %v2019_v7  ;;  %v362_v20 = vld [vmem:[%s6389_s1 + $0x6d8] sm:$0xff]  ;;  %v2757_v59 = vmul.f32 %v5152_v27, %v2479_v50  ;;  %v636_v0 = vld [vmem:[%s6389_s1 + $0xf68] sm:$0xff]  ;;  %v237_v27 = vld [vmem:[%s6389_s1 + $0x2f0] sm:$0xff] }
 0x151   : > { %1714 = vmatpush.msrb.mxu2 %v412_v8  ;;  %1734 = vmatpush.msrb.mxu3 %v812_v9  ;;  %v2484_v28 = vmul.f32 %v5353_v5, %v2483_v22  ;;  %v637_v8 = vld [vmem:[%s6389_s1 + $0xf70] sm:$0xff]  ;;  %v186_v22 = vld [vmem:[%s6389_s1 + $0x158] sm:$0xff] }
 0x152   : > { %1675 = vmatpush.msrb.mxu0 %v386_v10  ;;  %1695 = vmatpush.msrb.mxu1 %v786_v12  ;;  %v2169_v29 = vmul.f32 1.442695, %v2135_v19  ;;  %v211_v12 = vld [vmem:[%s6389_s1 + $0x220] sm:$0xff]  ;;  %v586_v19 = vld [vmem:[%s6389_s1 + $0xdd8] sm:$0xff] }
 0x153   : > { %1715 = vmatpush.msrb.mxu2 %v387_v16  ;;  %1735 = vmatpush.msrb.mxu3 %v787_v63  ;;  %v5430_v38 = vpop.eup %3008  ;;  %v2485_v39 = vadd.f32 %v5353_v5, %v2484_v28  ;;  %v161_v28 = vld [vmem:[%s6389_s1 + $0x90] sm:$0xff] }
 0x154   : > { %1676 = vmatpush.msrb.mxu0 %v361_v23  ;;  %1696 = vmatpush.msrb.mxu1 %v761_v24  ;;  %3010 = vpow2.f32 %v2169_v29  ;;  %v2257_v41 = vsel %vm1949_vm0, %v5430_v38, 0.0  ;;  %v187_v24 = vld [vmem:[%s6389_s1 + $0x160] sm:$0xff]  ;;  %v561_v29 = vld [vmem:[%s6389_s1 + $0xd10] sm:$0xff] }
 0x155   : > { %1716 = vmatpush.msrb.mxu2 %v362_v20  ;;  %1736 = vmatpush.msrb.mxu3 %v762_v26  ;;  %v2489_v11 = vsel %vm5420_vm1, %v5353_v5, %v2485_v39  ;;  %v2258_v47 = vrot.slane %v2257_v41, 4  ;;  %v938_v39 = vld [vmem:[%s6389_s1 + $0x18d8] sm:$0xff] }
 0x156   : > { %1677 = vmatpush.msrb.mxu0 %v336_v14  ;;  %1697 = vmatpush.msrb.mxu1 %v736_v31  ;;  %v2494_v51 = vsel %vm5436_vm2, %v2493_v35, %v2489_v11  ;;  %v162_v31 = vld [vmem:[%s6389_s1 + $0x98] sm:$0xff]  ;;  %v913_v11 = vld [vmem:[%s6389_s1 + $0x1810] sm:$0xff] }
 0x157   : > { %1717 = vmatpush.msrb.mxu2 %v337_v34  ;;  %1737 = vmatpush.msrb.mxu3 %v737_v36  ;;  %v2758_v54 = vmul.f32 %v5208_v49, %v2494_v51  ;;  %v2259_v55 = vadd.f32 %v2258_v47, %v2257_v41  ;;  %v662_v49 = vld [vmem:[%s6389_s1 + $0x1038] sm:$0xff]  ;;  %v488_v51 = vld [vmem:[%s6389_s1 + $0xac8] sm:$0xff] }
 0x158   : > { %1678 = vmatpush.msrb.mxu0 %v311_v43  ;;  %1698 = vmatpush.msrb.mxu1 %v711_v44  ;;  %v539_v43 = vld [vmem:[%s6389_s1 + $0xc60] sm:$0xff] }
 0x159   : > { %1718 = vmatpush.msrb.mxu2 %v312_v45  ;;  %1738 = vmatpush.msrb.mxu3 %v712_v46  ;;  %v2803_v57 = vrot.slane %v2758_v54, 4  ;;  %v2260_v61 = vrot.slane %v2259_v55, 2  ;;  %v939_v44 = vld [vmem:[%s6389_s1 + $0x18e0] sm:$0xff]  ;;  %v513_v46 = vld [vmem:[%s6389_s1 + $0xb90] sm:$0xff] }
 0x15a   : > { %1679 = vmatpush.msrb.mxu0 %v286_v37  ;;  %1699 = vmatpush.msrb.mxu1 %v686_v48  ;;  %v5486_v60 = vpop.eup %3010 }
 0x15b   : > { %1719 = vmatpush.msrb.mxu2 %v287_v52  ;;  %1739 = vmatpush.msrb.mxu3 %v687_v53  ;;  %v1366_v4 = vpop.f32.mrf.mxu0  ;;  %v1386_v5 = vpop.f32.mrf.mxu1  ;;  %v2264_v6 = vsel %vm1949_vm0, %v5486_v60, 0.0  ;;  %v2815_v58 = vsel %vm1949_vm0, %v2757_v59, %v2803_v57  ;;  %v2261_v7 = vadd.f32 %v2260_v61, %v2259_v55  ;;  %v888_v52 = vld [vmem:[%s6389_s1 + $0x1748] sm:$0xff]  ;;  %v489_v55 = vld [vmem:[%s6389_s1 + $0xad0] sm:$0xff] }
 0x15c   : > { %1680 = vmatpush.msrb.mxu0 %v261_v56  ;;  %1700 = vmatpush.msrb.mxu1 %v661_v2  ;;  %v5503_v9 = vadd.f32 %v1386_v5, %v1366_v4  ;;  %v2265_v10 = vrot.slane %v2264_v6, 4  ;;  %2839 = vst [vmem:[%s4656_s26 + $0x18] sm:$0xff] %v2815_v58  ;;  %v889_v56 = vld [vmem:[%s6389_s1 + $0x1750] sm:$0xff]  ;;  %v464_v61 = vld [vmem:[%s6389_s1 + $0xa08] sm:$0xff]  ;;  %v438_v5 = vld [vmem:[%s6389_s1 + $0x938] sm:$0xff] }
 0x15d   : > { %1720 = vmatpush.msrb.mxu2 %v262_v42  ;;  %1740 = vmatpush.msrb.mxu3 %v662_v49  ;;  %v2262_v63 = vrot.slane %v2261_v7, 1  ;;  %v463_v42 = vld [vmem:[%s6389_s1 + $0xa00] sm:$0xff] }
 0x15e   : > { %1681 = vmatpush.msrb.mxu0 %v236_v62  ;;  %1701 = vmatpush.msrb.mxu1 %v636_v0  ;;  %v2020_v16 = vsel %vm1949_vm0, %v5503_v9, -inf  ;;  %v2266_v21 = vadd.f32 %v2265_v10, %v2264_v6  ;;  %v863_v49 = vld [vmem:[%s6389_s1 + $0x1680] sm:$0xff]  ;;  %v864_v62 = vld [vmem:[%s6389_s1 + $0x1688] sm:$0xff]  ;;  %v838_v6 = vld [vmem:[%s6389_s1 + $0x15b8] sm:$0xff] }
 0x15f   : > { %1721 = vmatpush.msrb.mxu2 %v237_v27  ;;  %1741 = vmatpush.msrb.mxu3 %v637_v8  ;;  %v2021_v23 = vrot.slane %v2020_v16, 4  ;;  %v5533_v20 = vadd.f32 %v2262_v63, %v2261_v7  ;;  %v439_v27 = vld [vmem:[%s6389_s1 + $0x940] sm:$0xff]  ;;  %v413_v10 = vld [vmem:[%s6389_s1 + $0x870] sm:$0xff] }
 0x160   : > { %1682 = vmatpush.msrb.mxu0 %v211_v12  ;;  %1702 = vmatpush.msrb.mxu1 %v611_v13  ;;  %v2267_v26 = vrot.slane %v2266_v21, 2  ;;  %v839_v8 = vld [vmem:[%s6389_s1 + $0x15c0] sm:$0xff]  ;;  %v813_v12 = vld [vmem:[%s6389_s1 + $0x14f0] sm:$0xff] }
 0x161   : > { %1722 = vmatpush.msrb.mxu2 %v212_v15  ;;  %1742 = vmatpush.msrb.mxu3 %v612_v1  ;;  %v2022_v14 = vmax.f32 %v2020_v16, %v2021_v23  ;;  %3012 = vrcp.f32 %v5533_v20  ;;  %vm2501_vm3 = vweird.f32 %v5533_v20  ;;  %v2505_v15 = vand.u32 2147483647, %v5533_v20  ;;  %v414_v1 = vld [vmem:[%s6389_s1 + $0x878] sm:$0xff] }
 0x162   : > { %1683 = vmatpush.msrb.mxu0 %v186_v22  ;;  %1703 = vmatpush.msrb.mxu1 %v586_v19  ;;  %v1406_v30 = vpop.f32.mrf.mxu2  ;;  %v1426_v33 = vpop.f32.mrf.mxu3  ;;  %v2268_v35 = vadd.f32 %v2267_v26, %v2266_v21  ;;  %v814_v16 = vld [vmem:[%s6389_s1 + $0x14f8] sm:$0xff]  ;;  %v388_v22 = vld [vmem:[%s6389_s1 + $0x7a8] sm:$0xff]  ;;  %v2507_v23 = vand.u32 2147483648, %v5533_v20  ;;  %v389_v26 = vld [vmem:[%s6389_s1 + $0x7b0] sm:$0xff] }
 0x163   : > { %1723 = vmatpush.msrb.mxu2 %v187_v24  ;;  %1743 = vmatpush.msrb.mxu3 %v587_v25  ;;  %v2023_v34 = vrot.slane %v2022_v14, 2  ;;  %v5548_v36 = vadd.f32 %v1426_v33, %v1406_v30  ;;  %v788_v19 = vld [vmem:[%s6389_s1 + $0x1428] sm:$0xff]  ;;  %v763_v30 = vld [vmem:[%s6389_s1 + $0x1360] sm:$0xff]  ;;  %vm5690_vm8 = vcmp.eq.f32.partialorder %v2505_v15, 8.507059e+37 }
 0x164   : > { %1684 = vmatpush.msrb.mxu0 %v161_v28  ;;  %1704 = vmatpush.msrb.mxu1 %v561_v29  ;;  %v2269_v40 = vrot.slane %v2268_v35, 1  ;;  %v789_v28 = vld [vmem:[%s6389_s1 + $0x1430] sm:$0xff] }
 0x165   : > { %1724 = vmatpush.msrb.mxu2 %v162_v31  ;;  %1744 = vmatpush.msrb.mxu3 %v562_v3  ;;  %v2024_v41 = vmax.f32 %v2022_v14, %v2023_v34  ;;  %v2027_v45 = vsel %vm1949_vm0, %v5548_v36, -inf  ;;  %v363_v3 = vld [vmem:[%s6389_s1 + $0x6e0] sm:$0xff]  ;;  %v764_v34 = vld [vmem:[%s6389_s1 + $0x1368] sm:$0xff] }
 0x166   : > { %1685 = vmatmul.f32.vlgmr.msrb.gmra.mxu0 %v4996_v17  ;;  %1705 = vmatmul.f32.vlgmr.msrb.gmra.mxu1 %v4999_v18  ;;  %v2028_v47 = vrot.slane %v2027_v45, 4  ;;  %v5574_v37 = vadd.f32 %v2269_v40, %v2268_v35  ;;  %v364_v35 = vld [vmem:[%s6389_s1 + $0x6e8] sm:$0xff] }
 0x167   : > { %1725 = vmatmul.f32.vlgmr.msrb.gmra.mxu2 %v4996_v17  ;;  %1745 = vmatmul.f32.vlgmr.msrb.gmra.mxu3 %v4999_v18  ;;  %v2025_v48 = vrot.slane %v2024_v41, 1  ;;  %v514_v17 = vld [vmem:[%s6389_s1 + $0xb98] sm:$0xff]  ;;  %v5582_v50 = vpop.eup %3012 }
 0x168   : > { %1749 = vmatpush.msra.mxu0 %v538_v32  ;;  %1769 = vmatpush.msra.mxu1 %v938_v39  ;;  %v914_v18 = vld [vmem:[%s6389_s1 + $0x1818] sm:$0xff]  ;;  %v2029_v53 = vmax.f32 %v2027_v45, %v2028_v47  ;;  %v2497_v54 = vmul.f32 %v5582_v50, %v5533_v20  ;;  %3014 = vrcp.f32 %v5574_v37  ;;  %vm2502_vm4 = vweird.f32 %v5582_v50  ;;  %v339_v45 = vld [vmem:[%s6389_s1 + $0x620] sm:$0xff] }
 0x169   : > { %1789 = vmatpush.msra.mxu2 %v539_v43  ;;  %1809 = vmatpush.msra.mxu3 %v939_v44  ;;  %v2026_v2 = vmax.f32 %v2024_v41, %v2025_v48  ;;  %vm2516_vm5 = vweird.f32 %v5574_v37  ;;  %v2520_v24 = vand.u32 2147483647, %v5574_v37  ;;  %v2522_v25 = vand.u32 2147483648, %v5574_v37  ;;  %vm5673_vm7 = vmor %vm2501_vm3, %vm2502_vm4  ;;  %v338_v20 = vld [vmem:[%s6389_s1 + $0x618] sm:$0xff] }
 0x16a   : > { %1750 = vmatpush.msra.mxu0 %v513_v46  ;;  %1770 = vmatpush.msra.mxu1 %v913_v11  ;;  %v2030_v59 = vrot.slane %v2029_v53, 2  ;;  %v2498_v57 = vsub.f32 1.0, %v2497_v54  ;;  %v738_v39 = vld [vmem:[%s6389_s1 + $0x1298] sm:$0xff]  ;;  %v2508_v43 = vor.u32 1.1754944e-38, %v2507_v23  ;;  %v739_v46 = vld [vmem:[%s6389_s1 + $0x12a0] sm:$0xff] }
 0x16b   : > { %1790 = vmatpush.msra.mxu2 %v514_v17  ;;  %1810 = vmatpush.msra.mxu3 %v914_v18  ;;  %v2136_v0 = vsub.f32 %v5503_v9, %v2026_v2  ;;  %v2523_v41 = vor.u32 1.1754944e-38, %v2522_v25  ;;  %vm5714_vm10 = vcmp.eq.f32.partialorder %v2520_v24, 8.507059e+37  ;;  %v313_v17 = vld [vmem:[%s6389_s1 + $0x550] sm:$0xff]  ;;  %v614_v23 = vld [vmem:[%s6389_s1 + $0xeb8] sm:$0xff] }
 0x16c   : > { %1751 = vmatpush.msra.mxu0 %v488_v51  ;;  %1771 = vmatpush.msra.mxu1 %v888_v52  ;;  %v2031_v4 = vmax.f32 %v2029_v53, %v2030_v59  ;;  %v2499_v9 = vmul.f32 %v5582_v50, %v2498_v57  ;;  %v713_v18 = vld [vmem:[%s6389_s1 + $0x11d0] sm:$0xff]  ;;  %v314_v51 = vld [vmem:[%s6389_s1 + $0x558] sm:$0xff]  ;;  %v5837_v48 = vld.sshfl [vmem:[#allocation1 + $0x8] sm:$0xff pattern:$0x75316420] }
 0x16d   : > { %1791 = vmatpush.msra.mxu2 %v489_v55  ;;  %1811 = vmatpush.msra.mxu3 %v889_v56  ;;  %v2171_v58 = vmul.f32 1.442695, %v2136_v0  ;;  %v714_v52 = vld [vmem:[%s6389_s1 + $0x11d8] sm:$0xff]  ;;  %v288_v55 = vld [vmem:[%s6389_s1 + $0x488] sm:$0xff]  ;;  %v689_v59 = vld [vmem:[%s6389_s1 + $0x1110] sm:$0xff] }
 0x16e   : > { %1752 = vmatpush.msra.mxu0 %v463_v42  ;;  %1772 = vmatpush.msra.mxu1 %v863_v49  ;;  %v2032_v7 = vrot.slane %v2031_v4, 1  ;;  %v5631_v13 = vpop.eup %3014  ;;  %v2500_v29 = vadd.f32 %v5582_v50, %v2499_v9  ;;  %v688_v56 = vld [vmem:[%s6389_s1 + $0x1108] sm:$0xff]  ;;  %v289_v49 = vld [vmem:[%s6389_s1 + $0x490] sm:$0xff]  ;;  %v663_v0 = vld [vmem:[%s6389_s1 + $0x1040] sm:$0xff] }
 0x16f   : > { %1792 = vmatpush.msra.mxu2 %v464_v61  ;;  %1812 = vmatpush.msra.mxu3 %v864_v62  ;;  %v2512_v63 = vmul.f32 %v5631_v13, %v5574_v37  ;;  %3016 = vpow2.f32 %v2171_v58  ;;  %vm2517_vm6 = vweird.f32 %v5631_v13  ;;  %v263_v62 = vld [vmem:[%s6389_s1 + $0x3c0] sm:$0xff]  ;;  %v238_v9 = vld [vmem:[%s6389_s1 + $0x2f8] sm:$0xff] }
 0x170   : > { %1753 = vmatpush.msra.mxu0 %v438_v5  ;;  %1773 = vmatpush.msra.mxu1 %v838_v6  ;;  %v2033_v21 = vmax.f32 %v2031_v4, %v2032_v7  ;;  %vm5698_vm9 = vmor %vm2516_vm5, %vm2517_vm6  ;;  %v2504_v47 = vsel %vm5673_vm7, %v5582_v50, %v2500_v29  ;;  %v264_v4 = vld [vmem:[%s6389_s1 + $0x3c8] sm:$0xff]  ;;  %v638_v58 = vld [vmem:[%s6389_s1 + $0xf78] sm:$0xff] }
 0x171   : > { %1793 = vmatpush.msra.mxu2 %v439_v27  ;;  %1813 = vmatpush.msra.mxu3 %v839_v8  ;;  %v2513_v14 = vsub.f32 1.0, %v2512_v63  ;;  %v2509_v2 = vsel %vm5690_vm8, %v2508_v43, %v2504_v47  ;;  %v588_v29 = vld [vmem:[%s6389_s1 + $0xde8] sm:$0xff] }
 0x172   : > { %1754 = vmatpush.msra.mxu0 %v413_v10  ;;  %1774 = vmatpush.msra.mxu1 %v813_v12  ;;  %v2137_v31 = vsub.f32 %v5548_v36, %v2033_v21  ;;  %v2759_v6 = vmul.f32 %v5430_v38, %v2509_v2  ;;  %v239_v38 = vld [vmem:[%s6389_s1 + $0x300] sm:$0xff]  ;;  %v213_v21 = vld [vmem:[%s6389_s1 + $0x230] sm:$0xff]  ;;  %v516_v2 = vld [vmem:[%s6389_s1 + $0xba8] sm:$0xff] }
 0x173   : > { %1794 = vmatpush.msra.mxu2 %v414_v1  ;;  %1814 = vmatpush.msra.mxu3 %v814_v16  ;;  %v2514_v36 = vmul.f32 %v5631_v13, %v2513_v14 }
 0x174   : > { %1755 = vmatpush.msra.mxu0 %v388_v22  ;;  %1775 = vmatpush.msra.mxu1 %v788_v19  ;;  %v2173_v32 = vmul.f32 1.442695, %v2137_v31  ;;  %v613_v22 = vld [vmem:[%s6389_s1 + $0xeb0] sm:$0xff]  ;;  %v214_v19 = vld [vmem:[%s6389_s1 + $0x238] sm:$0xff] }
 0x175   : > { %1795 = vmatpush.msra.mxu2 %v389_v26  ;;  %1815 = vmatpush.msra.mxu3 %v789_v28  ;;  %v5708_v11 = vpop.eup %3016  ;;  %v2515_v37 = vadd.f32 %v5631_v13, %v2514_v36  ;;  %v188_v28 = vld [vmem:[%s6389_s1 + $0x168] sm:$0xff]  ;;  %v189_v31 = vld [vmem:[%s6389_s1 + $0x170] sm:$0xff] }
 0x176   : > { %1756 = vmatpush.msra.mxu0 %v363_v3  ;;  %1776 = vmatpush.msra.mxu1 %v763_v30  ;;  %3018 = vpow2.f32 %v2173_v32  ;;  %v2271_v50 = vsel %vm1949_vm0, %v5708_v11, 0.0  ;;  %v589_v3 = vld [vmem:[%s6389_s1 + $0xdf0] sm:$0xff]  ;;  %v164_v32 = vld [vmem:[%s6389_s1 + $0xa8] sm:$0xff] }
 0x177   : > { %1796 = vmatpush.msra.mxu2 %v364_v35  ;;  %1816 = vmatpush.msra.mxu3 %v764_v34  ;;  %v2519_v53 = vsel %vm5698_vm9, %v5631_v13, %v2515_v37  ;;  %v2272_v54 = vrot.slane %v2271_v50, 4  ;;  %v639_v13 = vld [vmem:[%s6389_s1 + $0xf80] sm:$0xff] }
 0x178   : > { %1757 = vmatpush.msra.mxu0 %v338_v20  ;;  %1777 = vmatpush.msra.mxu1 %v738_v39  ;;  %v2524_v42 = vsel %vm5714_vm10, %v2523_v41, %v2519_v53  ;;  %v163_v35 = vld [vmem:[%s6389_s1 + $0xa0] sm:$0xff]  ;;  %v564_v20 = vld [vmem:[%s6389_s1 + $0xd28] sm:$0xff] }
 0x179   : > { %1797 = vmatpush.msra.mxu2 %v339_v45  ;;  %1817 = vmatpush.msra.mxu3 %v739_v46  ;;  %v2760_v57 = vmul.f32 %v5486_v60, %v2524_v42  ;;  %v2273_v61 = vadd.f32 %v2272_v54, %v2271_v50  ;;  %v664_v60 = vld [vmem:[%s6389_s1 + $0x1048] sm:$0xff]  ;;  %v563_v34 = vld [vmem:[%s6389_s1 + $0xd20] sm:$0xff] }
 0x17a   : > { %1758 = vmatpush.msra.mxu0 %v313_v17  ;;  %1778 = vmatpush.msra.mxu1 %v713_v18  ;;  %v540_v45 = vld [vmem:[%s6389_s1 + $0xc68] sm:$0xff]  ;;  %v5834_v37 = vld.sshfl [vmem:[#allocation1] sm:$0xff pattern:$0x75316420]  ;;  %v541_v17 = vld [vmem:[%s6389_s1 + $0xc70] sm:$0xff] }
 0x17b   : > { %1798 = vmatpush.msra.mxu2 %v314_v51  ;;  %1818 = vmatpush.msra.mxu3 %v714_v52  ;;  %v2804_v27 = vrot.slane %v2760_v57, 4  ;;  %v2274_v8 = vrot.slane %v2273_v61, 2  ;;  %v940_v46 = vld [vmem:[%s6389_s1 + $0x18e8] sm:$0xff]  ;;  %v941_v18 = vld [vmem:[%s6389_s1 + $0x18f0] sm:$0xff]  ;;  %v515_v52 = vld [vmem:[%s6389_s1 + $0xba0] sm:$0xff] }
 0x17c   : > { %1759 = vmatpush.msra.mxu0 %v288_v55  ;;  %1779 = vmatpush.msra.mxu1 %v688_v56  ;;  %v5764_v5 = vpop.eup %3018  ;;  %v915_v53 = vld [vmem:[%s6389_s1 + $0x1820] sm:$0xff]  ;;  %v916_v42 = vld [vmem:[%s6389_s1 + $0x1828] sm:$0xff]  ;;  %v890_v57 = vld [vmem:[%s6389_s1 + $0x1758] sm:$0xff] }
 0x17d   : > { %1799 = vmatpush.msra.mxu2 %v289_v49  ;;  %1819 = vmatpush.msra.mxu3 %v689_v59  ;;  %v1446_v7 = vpop.f32.mrf.mxu0  ;;  %v1466_v10 = vpop.f32.mrf.mxu1  ;;  %v2278_v12 = vsel %vm1949_vm0, %v5764_v5, 0.0  ;;  %v2816_v1 = vsel %vm1949_vm0, %v2759_v6, %v2804_v27  ;;  %v2275_v16 = vadd.f32 %v2274_v8, %v2273_v61  ;;  %v490_v59 = vld [vmem:[%s6389_s1 + $0xad8] sm:$0xff]  ;;  %v465_v6 = vld [vmem:[%s6389_s1 + $0xa10] sm:$0xff] }
 0x17e   : > { %1760 = vmatpush.msra.mxu0 %v263_v62  ;;  %1780 = vmatpush.msra.mxu1 %v663_v0  ;;  %v5781_v15 = vadd.f32 %v1466_v10, %v1446_v7  ;;  %v2279_v63 = vrot.slane %v2278_v12, 4  ;;  %2840 = vst [vmem:[%s4656_s26 + $0x20] sm:$0xff] %v2816_v1  ;;  %v491_v0 = vld [vmem:[%s6389_s1 + $0xae0] sm:$0xff]  ;;  %v865_v27 = vld [vmem:[%s6389_s1 + $0x1690] sm:$0xff]  ;;  %v866_v7 = vld [vmem:[%s6389_s1 + $0x1698] sm:$0xff] }
 0x17f   : > { %1800 = vmatpush.msra.mxu2 %v264_v4  ;;  %1820 = vmatpush.msra.mxu3 %v664_v60  ;;  %v2276_v25 = vrot.slane %v2275_v16, 1  ;;  %v891_v4 = vld [vmem:[%s6389_s1 + $0x1760] sm:$0xff]  ;;  %v441_v1 = vld [vmem:[%s6389_s1 + $0x950] sm:$0xff] }
 0x180   : > { %1761 = vmatpush.msra.mxu0 %v238_v9  ;;  %1781 = vmatpush.msra.mxu1 %v638_v58  ;;  %v2034_v24 = vsel %vm1949_vm0, %v5781_v15, -inf  ;;  %v2280_v26 = vadd.f32 %v2279_v63, %v2278_v12  ;;  %v466_v58 = vld [vmem:[%s6389_s1 + $0xa18] sm:$0xff] }
 0x181   : > { %1801 = vmatpush.msra.mxu2 %v239_v38  ;;  %1821 = vmatpush.msra.mxu3 %v639_v13  ;;  %v2035_v14 = vrot.slane %v2034_v24, 4  ;;  %v5811_v30 = vadd.f32 %v2276_v25, %v2275_v16  ;;  %v440_v38 = vld [vmem:[%s6389_s1 + $0x948] sm:$0xff] }
 0x182   : > { %1762 = vmatpush.msra.mxu0 %v213_v21  ;;  %1782 = vmatpush.msra.mxu1 %v613_v22  ;;  %v2281_v33 = vrot.slane %v2280_v26, 2  ;;  %v840_v13 = vld [vmem:[%s6389_s1 + $0x15c8] sm:$0xff]  ;;  %v415_v22 = vld [vmem:[%s6389_s1 + $0x880] sm:$0xff] }
 0x183   : > { %1802 = vmatpush.msra.mxu2 %v214_v19  ;;  %1822 = vmatpush.msra.mxu3 %v614_v23  ;;  %v2036_v36 = vmax.f32 %v2034_v24, %v2035_v14  ;;  %3020 = vrcp.f32 %v5811_v30  ;;  %v815_v19 = vld [vmem:[%s6389_s1 + $0x1500] sm:$0xff]  ;;  %vm2531_vm11 = vweird.f32 %v5811_v30  ;;  %v2535_v24 = vand.u32 2147483647, %v5811_v30  ;;  %v416_v25 = vld [vmem:[%s6389_s1 + $0x888] sm:$0xff]  ;;  %v390_v14 = vld [vmem:[%s6389_s1 + $0x7b8] sm:$0xff] }
 0x184   : > { %1763 = vmatpush.msra.mxu0 %v188_v28  ;;  %1783 = vmatpush.msra.mxu1 %v588_v29  ;;  %v1486_v39 = vpop.f32.mrf.mxu2  ;;  %v1506_v40 = vpop.f32.mrf.mxu3  ;;  %v2282_v43 = vadd.f32 %v2281_v33, %v2280_v26  ;;  %v816_v26 = vld [vmem:[%s6389_s1 + $0x1508] sm:$0xff] }
 0x185   : > { %1803 = vmatpush.msra.mxu2 %v189_v31  ;;  %1823 = vmatpush.msra.mxu3 %v589_v3  ;;  %v2037_v44 = vrot.slane %v2036_v36, 2  ;;  %v5826_v41 = vadd.f32 %v1506_v40, %v1486_v39  ;;  %v790_v31 = vld [vmem:[%s6389_s1 + $0x1438] sm:$0xff]  ;;  %v2537_v3 = vand.u32 2147483648, %v5811_v30  ;;  %v365_v40 = vld [vmem:[%s6389_s1 + $0x6f0] sm:$0xff]  ;;  %vm5972_vm1 = vcmp.eq.f32.partialorder %v2535_v24, 8.507059e+37 }
 0x186   : > { %1764 = vmatpush.msra.mxu0 %v163_v35  ;;  %1784 = vmatpush.msra.mxu1 %v563_v34  ;;  %v2283_v47 = vrot.slane %v2282_v43, 1  ;;  %v391_v34 = vld [vmem:[%s6389_s1 + $0x7c0] sm:$0xff] }
 0x187   : > { %1804 = vmatpush.msra.mxu2 %v164_v32  ;;  %1824 = vmatpush.msra.mxu3 %v564_v20  ;;  %v2038_v50 = vmax.f32 %v2036_v36, %v2037_v44  ;;  %v2041_v51 = vsel %vm1949_vm0, %v5826_v41, -inf  ;;  %v791_v36 = vld [vmem:[%s6389_s1 + $0x1440] sm:$0xff] }
 0x188   : > { %1765 = vmatmul.f32.vlgmr.msra.gmra.mxu0 %v5834_v37  ;;  %1785 = vmatmul.f32.vlgmr.msra.gmra.mxu1 %v5837_v48  ;;  %v2042_v54 = vrot.slane %v2041_v51, 4  ;;  %v5856_v55 = vadd.f32 %v2283_v47, %v2282_v43  ;;  %v765_v43 = vld [vmem:[%s6389_s1 + $0x1370] sm:$0xff]  ;;  %v591_v44 = vld [vmem:[%s6389_s1 + $0xe00] sm:$0xff] }
 0x189   : > { %1805 = vmatmul.f32.vlgmr.msra.gmra.mxu2 %v5834_v37  ;;  %1825 = vmatmul.f32.vlgmr.msra.gmra.mxu3 %v5837_v48  ;;  %v2039_v56 = vrot.slane %v2038_v50, 1  ;;  %v5864_v49 = vpop.eup %3020 }
 0x18a   : > { %1829 = vmatpush.msrb.mxu0 %v540_v45  ;;  %1849 = vmatpush.msrb.mxu1 %v940_v46  ;;  %v2043_v61 = vmax.f32 %v2041_v51, %v2042_v54  ;;  %v2527_v62 = vmul.f32 %v5864_v49, %v5811_v30  ;;  %3022 = vrcp.f32 %v5856_v55  ;;  %vm2532_vm12 = vweird.f32 %v5864_v49  ;;  %v766_v45 = vld [vmem:[%s6389_s1 + $0x1378] sm:$0xff]  ;;  %v340_v30 = vld [vmem:[%s6389_s1 + $0x628] sm:$0xff]  ;;  %v741_v54 = vld [vmem:[%s6389_s1 + $0x12b0] sm:$0xff] }
 0x18b   : > { %1869 = vmatpush.msrb.mxu2 %v541_v17  ;;  %1889 = vmatpush.msrb.mxu3 %v941_v18  ;;  %v2040_v60 = vmax.f32 %v2038_v50, %v2039_v56  ;;  %vm2546_vm13 = vweird.f32 %v5856_v55  ;;  %v2550_v33 = vand.u32 2147483647, %v5856_v55  ;;  %v2552_v35 = vand.u32 2147483648, %v5856_v55  ;;  %vm5955_vm15 = vmor %vm2531_vm11, %vm2532_vm12  ;;  %v740_v17 = vld [vmem:[%s6389_s1 + $0x12a8] sm:$0xff]  ;;  %v566_v18 = vld [vmem:[%s6389_s1 + $0xd38] sm:$0xff] }
 0x18c   : > { %1830 = vmatpush.msrb.mxu0 %v515_v52  ;;  %1850 = vmatpush.msrb.mxu1 %v915_v53  ;;  %v2044_v8 = vrot.slane %v2043_v61, 2  ;;  %v2528_v9 = vsub.f32 1.0, %v2527_v62  ;;  %v2538_v50 = vor.u32 1.1754944e-38, %v2537_v3  ;;  %v341_v53 = vld [vmem:[%s6389_s1 + $0x630] sm:$0xff]  ;;  %v716_v62 = vld [vmem:[%s6389_s1 + $0x11e8] sm:$0xff]  ;;  %v615_v3 = vld [vmem:[%s6389_s1 + $0xec0] sm:$0xff] }
 0x18d   : > { %1870 = vmatpush.msrb.mxu2 %v516_v2  ;;  %1890 = vmatpush.msrb.mxu3 %v916_v42  ;;  %v2138_v10 = vsub.f32 %v5781_v15, %v2040_v60  ;;  %v841_v15 = vld [vmem:[%s6389_s1 + $0x15d0] sm:$0xff]  ;;  %v2553_v52 = vor.u32 1.1754944e-38, %v2552_v35  ;;  %vm5996_vm3 = vcmp.eq.f32.partialorder %v2550_v33, 8.507059e+37  ;;  %v290_v60 = vld [vmem:[%s6389_s1 + $0x498] sm:$0xff]  ;;  %v216_v33 = vld [vmem:[%s6389_s1 + $0x248] sm:$0xff] }
 0x18e   : > { %1831 = vmatpush.msrb.mxu0 %v490_v59  ;;  %1851 = vmatpush.msrb.mxu1 %v890_v57  ;;  %v2045_v12 = vmax.f32 %v2043_v61, %v2044_v8  ;;  %v2529_v16 = vmul.f32 %v5864_v49, %v2528_v9  ;;  %v315_v59 = vld [vmem:[%s6389_s1 + $0x560] sm:$0xff]  ;;  %v316_v61 = vld [vmem:[%s6389_s1 + $0x568] sm:$0xff] }
 0x18f   : > { %1871 = vmatpush.msrb.mxu2 %v491_v0  ;;  %1891 = vmatpush.msrb.mxu3 %v891_v4  ;;  %v2175_v63 = vmul.f32 1.442695, %v2138_v10  ;;  %v715_v57 = vld [vmem:[%s6389_s1 + $0x11e0] sm:$0xff]  ;;  %v616_v35 = vld [vmem:[%s6389_s1 + $0xec8] sm:$0xff] }
 0x190   : > { %1832 = vmatpush.msrb.mxu0 %v465_v6  ;;  %1852 = vmatpush.msrb.mxu1 %v865_v27  ;;  %v2046_v21 = vrot.slane %v2045_v12, 1  ;;  %v5913_v23 = vpop.eup %3022  ;;  %v2530_v32 = vadd.f32 %v5864_v49, %v2529_v16  ;;  %v690_v6 = vld [vmem:[%s6389_s1 + $0x1118] sm:$0xff]  ;;  %v291_v9 = vld [vmem:[%s6389_s1 + $0x4a0] sm:$0xff] }
 0x191   : > { %1872 = vmatpush.msrb.mxu2 %v466_v58  ;;  %1892 = vmatpush.msrb.mxu3 %v866_v7  ;;  %v2542_v28 = vmul.f32 %v5913_v23, %v5856_v55  ;;  %3024 = vpow2.f32 %v2175_v63  ;;  %vm2547_vm14 = vweird.f32 %v5913_v23  ;;  %v691_v58 = vld [vmem:[%s6389_s1 + $0x1120] sm:$0xff] }
 0x192   : > { %1833 = vmatpush.msrb.mxu0 %v440_v38  ;;  %1853 = vmatpush.msrb.mxu1 %v840_v13  ;;  %v2047_v29 = vmax.f32 %v2045_v12, %v2046_v21  ;;  %vm5980_vm2 = vmor %vm2546_vm13, %vm2547_vm14  ;;  %v2534_v55 = vsel %vm5955_vm15, %v5864_v49, %v2530_v32  ;;  %v265_v12 = vld [vmem:[%s6389_s1 + $0x3d0] sm:$0xff]  ;;  %v266_v13 = vld [vmem:[%s6389_s1 + $0x3d8] sm:$0xff] }
 0x193   : > { %1873 = vmatpush.msrb.mxu2 %v441_v1  ;;  %1893 = vmatpush.msrb.mxu3 %v841_v15  ;;  %v2543_v20 = vsub.f32 1.0, %v2542_v28  ;;  %v2539_v27 = vsel %vm5972_vm1, %v2538_v50, %v2534_v55  ;;  %v665_v38 = vld [vmem:[%s6389_s1 + $0x1050] sm:$0xff]  ;;  %v240_v21 = vld [vmem:[%s6389_s1 + $0x308] sm:$0xff]  ;;  %v542_v55 = vld [vmem:[%s6389_s1 + $0xc78] sm:$0xff] }
 0x194   : > { %1834 = vmatpush.msrb.mxu0 %v415_v22  ;;  %1854 = vmatpush.msrb.mxu1 %v815_v19  ;;  %v2139_v39 = vsub.f32 %v5826_v41, %v2047_v29  ;;  %v366_v41 = vld [vmem:[%s6389_s1 + $0x6f8] sm:$0xff]  ;;  %v2761_v15 = vmul.f32 %v5708_v11, %v2539_v27  ;;  %v640_v22 = vld [vmem:[%s6389_s1 + $0xf88] sm:$0xff]  ;;  %v241_v11 = vld [vmem:[%s6389_s1 + $0x310] sm:$0xff] }
 0x195   : > { %1874 = vmatpush.msrb.mxu2 %v416_v25  ;;  %1894 = vmatpush.msrb.mxu3 %v816_v26  ;;  %v2544_v46 = vmul.f32 %v5913_v23, %v2543_v20  ;;  %v641_v25 = vld [vmem:[%s6389_s1 + $0xf90] sm:$0xff]  ;;  %v190_v20 = vld [vmem:[%s6389_s1 + $0x178] sm:$0xff]  ;;  %v892_v27 = vld [vmem:[%s6389_s1 + $0x1768] sm:$0xff] }
 0x196   : > { %1835 = vmatpush.msrb.mxu0 %v390_v14  ;;  %1855 = vmatpush.msrb.mxu1 %v790_v31  ;;  %v2177_v47 = vmul.f32 1.442695, %v2139_v39  ;;  %v215_v31 = vld [vmem:[%s6389_s1 + $0x240] sm:$0xff]  ;;  %v590_v39 = vld [vmem:[%s6389_s1 + $0xdf8] sm:$0xff] }
 0x197   : > { %1875 = vmatpush.msrb.mxu2 %v391_v34  ;;  %1895 = vmatpush.msrb.mxu3 %v791_v36  ;;  %v5990_v56 = vpop.eup %3024  ;;  %v2545_v2 = vadd.f32 %v5913_v23, %v2544_v46  ;;  %v165_v46 = vld [vmem:[%s6389_s1 + $0xb0] sm:$0xff] }
 0x198   : > { %1836 = vmatpush.msrb.mxu0 %v365_v40  ;;  %1856 = vmatpush.msrb.mxu1 %v765_v43  ;;  %3026 = vpow2.f32 %v2177_v47  ;;  %v2285_v49 = vsel %vm1949_vm0, %v5990_v56, 0.0  ;;  %v191_v43 = vld [vmem:[%s6389_s1 + $0x180] sm:$0xff]  ;;  %v565_v47 = vld [vmem:[%s6389_s1 + $0xd30] sm:$0xff] }
 0x199   : > { %1876 = vmatpush.msrb.mxu2 %v366_v41  ;;  %1896 = vmatpush.msrb.mxu3 %v766_v45  ;;  %v2549_v0 = vsel %vm5980_vm2, %v5913_v23, %v2545_v2  ;;  %v2286_v4 = vrot.slane %v2285_v49, 4  ;;  %v942_v2 = vld [vmem:[%s6389_s1 + $0x18f8] sm:$0xff] }
 0x19a   : > { %1837 = vmatpush.msrb.mxu0 %v340_v30  ;;  %1857 = vmatpush.msrb.mxu1 %v740_v17  ;;  %v2554_v8 = vsel %vm5996_vm3, %v2553_v52, %v2549_v0  ;;  %v166_v17 = vld [vmem:[%s6389_s1 + $0xb8] sm:$0xff] }
 0x19b   : > { %1877 = vmatpush.msrb.mxu2 %v341_v53  ;;  %1897 = vmatpush.msrb.mxu3 %v741_v54  ;;  %v2762_v7 = vmul.f32 %v5764_v5, %v2554_v8  ;;  %v2287_v10 = vadd.f32 %v2286_v4, %v2285_v49  ;;  %v666_v5 = vld [vmem:[%s6389_s1 + $0x1058] sm:$0xff]  ;;  %v517_v49 = vld [vmem:[%s6389_s1 + $0xbb0] sm:$0xff] }
 0x19c   : > { %1838 = vmatpush.msrb.mxu0 %v315_v59  ;;  %1858 = vmatpush.msrb.mxu1 %v715_v57 }
 0x19d   : > { %1878 = vmatpush.msrb.mxu2 %v316_v61  ;;  %1898 = vmatpush.msrb.mxu3 %v716_v62  ;;  %v2805_v16 = vrot.slane %v2762_v7, 4  ;;  %v2288_v63 = vrot.slane %v2287_v10, 2  ;;  %v917_v61 = vld [vmem:[%s6389_s1 + $0x1830] sm:$0xff]  ;;  %v467_v7 = vld [vmem:[%s6389_s1 + $0xa20] sm:$0xff] }
 0x19e   : > { %1839 = vmatpush.msrb.mxu0 %v290_v60  ;;  %1859 = vmatpush.msrb.mxu1 %v690_v6  ;;  %v6046_v1 = vpop.eup %3026  ;;  %v492_v6 = vld [vmem:[%s6389_s1 + $0xae8] sm:$0xff] }
 0x19f   : > { %1879 = vmatpush.msrb.mxu2 %v291_v9  ;;  %1899 = vmatpush.msrb.mxu3 %v691_v58  ;;  %v1526_v19 = vpop.f32.mrf.mxu0  ;;  %v1546_v23 = vpop.f32.mrf.mxu1  ;;  %v2292_v24 = vsel %vm1949_vm0, %v6046_v1, 0.0  ;;  %v2817_v28 = vsel %vm1949_vm0, %v2761_v15, %v2805_v16  ;;  %v2289_v29 = vadd.f32 %v2288_v63, %v2287_v10  ;;  %v867_v10 = vld [vmem:[%s6389_s1 + $0x16a0] sm:$0xff]  ;;  %v442_v15 = vld [vmem:[%s6389_s1 + $0x958] sm:$0xff] }
 0x1a0   : > { %1840 = vmatpush.msrb.mxu0 %v265_v12  ;;  %1860 = vmatpush.msrb.mxu1 %v665_v38  ;;  %v6063_v26 = vadd.f32 %v1546_v23, %v1526_v19  ;;  %v2293_v14 = vrot.slane %v2292_v24, 4  ;;  %2841 = vst [vmem:[%s4656_s26 + $0x28] sm:$0xff] %v2817_v28  ;;  %v842_v16 = vld [vmem:[%s6389_s1 + $0x15d8] sm:$0xff]  ;;  %v417_v19 = vld [vmem:[%s6389_s1 + $0x890] sm:$0xff]  ;;  %v392_v28 = vld [vmem:[%s6389_s1 + $0x7c8] sm:$0xff] }
 0x1a1   : > { %1880 = vmatpush.msrb.mxu2 %v266_v13  ;;  %1900 = vmatpush.msrb.mxu3 %v666_v5  ;;  %v2290_v36 = vrot.slane %v2289_v29, 1  ;;  %v817_v23 = vld [vmem:[%s6389_s1 + $0x1510] sm:$0xff] }
 0x1a2   : > { %1841 = vmatpush.msrb.mxu0 %v240_v21  ;;  %1861 = vmatpush.msrb.mxu1 %v640_v22  ;;  %v2048_v34 = vsel %vm1949_vm0, %v6063_v26, -inf  ;;  %v2294_v32 = vadd.f32 %v2293_v14, %v2292_v24 }
 0x1a3   : > { %1881 = vmatpush.msrb.mxu2 %v241_v11  ;;  %1901 = vmatpush.msrb.mxu3 %v641_v25  ;;  %v2049_v40 = vrot.slane %v2048_v34, 4  ;;  %v6093_v41 = vadd.f32 %v2290_v36, %v2289_v29  ;;  %v792_v29 = vld [vmem:[%s6389_s1 + $0x1448] sm:$0xff]  ;;  %v367_v36 = vld [vmem:[%s6389_s1 + $0x700] sm:$0xff] }
 0x1a4   : > { %1842 = vmatpush.msrb.mxu0 %v215_v31  ;;  %1862 = vmatpush.msrb.mxu1 %v615_v3  ;;  %v2295_v45 = vrot.slane %v2294_v32, 2 }
 0x1a5   : > { %1882 = vmatpush.msrb.mxu2 %v216_v33  ;;  %1902 = vmatpush.msrb.mxu3 %v616_v35  ;;  %v2050_v30 = vmax.f32 %v2048_v34, %v2049_v40  ;;  %3028 = vrcp.f32 %v6093_v41  ;;  %vm2561_vm4 = vweird.f32 %v6093_v41  ;;  %v2565_v11 = vand.u32 2147483647, %v6093_v41 }
 0x1a6   : > { %1843 = vmatpush.msrb.mxu0 %v190_v20  ;;  %1863 = vmatpush.msrb.mxu1 %v590_v39  ;;  %v1566_v50 = vpop.f32.mrf.mxu2  ;;  %v1586_v51 = vpop.f32.mrf.mxu3  ;;  %v2296_v52 = vadd.f32 %v2295_v45, %v2294_v32  ;;  %v2567_v14 = vand.u32 2147483648, %v6093_v41  ;;  %v767_v32 = vld [vmem:[%s6389_s1 + $0x1380] sm:$0xff] }
 0x1a7   : > { %1883 = vmatpush.msrb.mxu2 %v191_v43  ;;  %1903 = vmatpush.msrb.mxu3 %v591_v44  ;;  %v2051_v53 = vrot.slane %v2050_v30, 2  ;;  %v6108_v54 = vadd.f32 %v1586_v51, %v1566_v50  ;;  %v342_v43 = vld [vmem:[%s6389_s1 + $0x638] sm:$0xff]  ;;  %vm6197_vm9 = vcmp.eq.f32.partialorder %v2565_v11, 8.507059e+37  ;;  %v317_v50 = vld [vmem:[%s6389_s1 + $0x570] sm:$0xff]  ;;  %v567_v11 = vld [vmem:[%s6389_s1 + $0xd40] sm:$0xff] }
 0x1a8   : > { %1844 = vmatpush.msrb.mxu0 %v165_v46  ;;  %1864 = vmatpush.msrb.mxu1 %v565_v47  ;;  %v2297_v42 = vrot.slane %v2296_v52, 1  ;;  %v742_v44 = vld [vmem:[%s6389_s1 + $0x12b8] sm:$0xff]  ;;  %v717_v51 = vld [vmem:[%s6389_s1 + $0x11f0] sm:$0xff] }
 0x1a9   : > { %1884 = vmatpush.msrb.mxu2 %v166_v17  ;;  %1904 = vmatpush.msrb.mxu3 %v566_v18  ;;  %v2052_v59 = vmax.f32 %v2050_v30, %v2051_v53  ;;  %v2055_v57 = vsel %vm1949_vm0, %v6108_v54, -inf }
 0x1aa   : > { %1845 = vmatmul.f32.vlgmr.msrb.gmra.mxu0 %v5834_v37  ;;  %1865 = vmatmul.f32.vlgmr.msrb.gmra.mxu1 %v5837_v48  ;;  %v2056_v62 = vrot.slane %v2055_v57, 4  ;;  %v6128_v0 = vadd.f32 %v2297_v42, %v2296_v52 }
 0x1ab   : > { %1885 = vmatmul.f32.vlgmr.msrb.gmra.mxu2 %v5834_v37  ;;  %1905 = vmatmul.f32.vlgmr.msrb.gmra.mxu3 %v5837_v48  ;;  %v2053_v4 = vrot.slane %v2052_v59, 1  ;;  %v6130_v60 = vpop.eup %3028 }
 0x1ac   : > { %1909 = vmatpush.msra.mxu0 %v542_v55  ;;  %1929 = vmatpush.msra.mxu1 %v942_v2  ;;  %v2057_v8 = vmax.f32 %v2055_v57, %v2056_v62  ;;  %v2557_v9 = vmul.f32 %v6130_v60, %v6093_v41  ;;  %3030 = vrcp.f32 %v6128_v0  ;;  %vm2562_vm5 = vweird.f32 %v6130_v60  ;;  %v292_v55 = vld [vmem:[%s6389_s1 + $0x4a8] sm:$0xff]  ;;  %v667_v62 = vld [vmem:[%s6389_s1 + $0x1060] sm:$0xff] }
 0x1ad   : > { %v2054_v58 = vmax.f32 %v2052_v59, %v2053_v4  ;;  %vm2576_vm6 = vweird.f32 %v6128_v0  ;;  %v2580_v31 = vand.u32 2147483647, %v6128_v0  ;;  %v2582_v3 = vand.u32 2147483648, %v6128_v0  ;;  %vm6187_vm8 = vmor %vm2561_vm4, %vm2562_vm5  ;;  %v692_v2 = vld [vmem:[%s6389_s1 + $0x1128] sm:$0xff] }
 0x1ae   : > { %1910 = vmatpush.msra.mxu0 %v517_v49  ;;  %1930 = vmatpush.msra.mxu1 %v917_v61  ;;  %v2058_v12 = vrot.slane %v2057_v8, 2  ;;  %v2558_v38 = vsub.f32 1.0, %v2557_v9  ;;  %v2568_v41 = vor.u32 1.1754944e-38, %v2567_v14  ;;  %v267_v61 = vld [vmem:[%s6389_s1 + $0x3e0] sm:$0xff] }
 0x1af   : > { %v2140_v13 = vsub.f32 %v6063_v26, %v2054_v58  ;;  %v2583_v47 = vor.u32 1.1754944e-38, %v2582_v3  ;;  %vm2581_vm11 = vcmp.eq.f32.partialorder %v2580_v31, 8.507059e+37 }
 0x1b0   : > { %1911 = vmatpush.msra.mxu0 %v492_v6  ;;  %1931 = vmatpush.msra.mxu1 %v892_v27  ;;  %v2059_v5 = vmax.f32 %v2057_v8, %v2058_v12  ;;  %v2559_v63 = vmul.f32 %v6130_v60, %v2558_v38  ;;  %v642_v27 = vld [vmem:[%s6389_s1 + $0xf98] sm:$0xff]  ;;  %v217_v38 = vld [vmem:[%s6389_s1 + $0x250] sm:$0xff] }
 0x1b1   : > { %v2179_v21 = vmul.f32 1.442695, %v2140_v13  ;;  %v617_v13 = vld [vmem:[%s6389_s1 + $0xed0] sm:$0xff] }
 0x1b2   : > { %1912 = vmatpush.msra.mxu0 %v467_v7  ;;  %1932 = vmatpush.msra.mxu1 %v867_v10  ;;  %v2060_v22 = vrot.slane %v2059_v5, 1  ;;  %v3031_v24 = vpop.eup %3030  ;;  %v2560_v33 = vadd.f32 %v6130_v60, %v2559_v63  ;;  %v192_v63 = vld [vmem:[%s6389_s1 + $0x188] sm:$0xff] }
 0x1b3   : > { %v2572_v25 = vmul.f32 %v3031_v24, %v6128_v0  ;;  %3032 = vpow2.f32 %v2179_v21  ;;  %vm2577_vm7 = vweird.f32 %v3031_v24  ;;  %v592_v21 = vld [vmem:[%s6389_s1 + $0xe08] sm:$0xff] }
 0x1b4   : > { %1913 = vmatpush.msra.mxu0 %v442_v15  ;;  %1933 = vmatpush.msra.mxu1 %v842_v16  ;;  %v2061_v26 = vmax.f32 %v2059_v5, %v2060_v22  ;;  %vm6203_vm10 = vmor %vm2576_vm6, %vm2577_vm7  ;;  %v2564_v17 = vsel %vm6187_vm8, %v6130_v60, %v2560_v33 }
 0x1b5   : > { %v2573_v35 = vsub.f32 1.0, %v2572_v25  ;;  %v2569_v42 = vsel %vm6197_vm9, %v2568_v41, %v2564_v17 }
 0x1b6   : > { %1914 = vmatpush.msra.mxu0 %v417_v19  ;;  %1934 = vmatpush.msra.mxu1 %v817_v23  ;;  %v2141_v34 = vsub.f32 %v6108_v54, %v2061_v26  ;;  %v2763_v4 = vmul.f32 %v5990_v56, %v2569_v42 }
 0x1b7   : > { %v2574_v39 = vmul.f32 %v3031_v24, %v2573_v35 }
 0x1b8   : > { %1915 = vmatpush.msra.mxu0 %v392_v28  ;;  %1935 = vmatpush.msra.mxu1 %v792_v29  ;;  %v2181_v40 = vmul.f32 1.442695, %v2141_v34 }
 0x1b9   : > { %v6207_v30 = vpop.eup %3032  ;;  %v2575_v18 = vadd.f32 %v3031_v24, %v2574_v39 }
 0x1ba   : > { %1916 = vmatpush.msra.mxu0 %v367_v36  ;;  %1936 = vmatpush.msra.mxu1 %v767_v32  ;;  %3034 = vpow2.f32 %v2181_v40  ;;  %v2299_v52 = vsel %vm1949_vm0, %v6207_v30, 0.0 }
 0x1bb   : > { %v2579_v53 = vsel %vm6203_vm10, %v3031_v24, %v2575_v18  ;;  %v2300_v54 = vrot.slane %v2299_v52, 4  ;;  %v167_v24 = vld [vmem:[%s6389_s1 + $0xc0] sm:$0xff] }
 0x1bc   : > { %1917 = vmatpush.msra.mxu0 %v342_v43  ;;  %1937 = vmatpush.msra.mxu1 %v742_v44  ;;  %v2584_v59 = vsel %vm2581_vm11, %v2583_v47, %v2579_v53 }
 0x1bd   : > { %v2764_v57 = vmul.f32 %v6046_v1, %v2584_v59  ;;  %v2301_v49 = vadd.f32 %v2300_v54, %v2299_v52  ;;  %v242_v1 = vld [vmem:[%s6389_s1 + $0x318] sm:$0xff] }
 0x1be   : > { %1918 = vmatpush.msra.mxu0 %v317_v50  ;;  %1938 = vmatpush.msra.mxu1 %v717_v51 }
 0x1bf   : > { %v2806_v60 = vrot.slane %v2764_v57, 4  ;;  %v2302_v6 = vrot.slane %v2301_v49, 2 }
 0x1c0   : > { %1919 = vmatpush.msra.mxu0 %v292_v55  ;;  %1939 = vmatpush.msra.mxu1 %v692_v2  ;;  %v6237_v0 = vpop.eup %3034 }
 0x1c1   : > { %v1606_v8 = vpop.f32.mrf.mxu0  ;;  %v1626_v9 = vpop.f32.mrf.mxu1  ;;  %v2306_v58 = vsel %vm1949_vm0, %v6237_v0, 0.0  ;;  %v2818_v56 = vsel %vm1949_vm0, %v2763_v4, %v2806_v60  ;;  %v2303_v10 = vadd.f32 %v2302_v6, %v2301_v49 }
 0x1c2   : > { %1920 = vmatpush.msra.mxu0 %v267_v61  ;;  %1940 = vmatpush.msra.mxu1 %v667_v62  ;;  %v1627_v7 = vadd.f32 %v1626_v9, %v1606_v8  ;;  %v2307_v12 = vrot.slane %v2306_v58, 4  ;;  %2842 = vst [vmem:[%s4656_s26 + $0x30] sm:$0xff] %v2818_v56 }
 0x1c3   : > { %v2304_v15 = vrot.slane %v2303_v10, 1 }
 0x1c4   : > { %1921 = vmatpush.msra.mxu0 %v242_v1  ;;  %1941 = vmatpush.msra.mxu1 %v642_v27  ;;  %v2062_v5 = vsel %vm1949_vm0, %v1627_v7, -inf  ;;  %v2308_v16 = vadd.f32 %v2307_v12, %v2306_v58 }
 0x1c5   : > { %v2063_v22 = vrot.slane %v2062_v5, 4  ;;  %v2305_v19 = vadd.f32 %v2304_v15, %v2303_v10 }
 0x1c6   : > { %1922 = vmatpush.msra.mxu0 %v217_v38  ;;  %1942 = vmatpush.msra.mxu1 %v617_v13  ;;  %v2309_v23 = vrot.slane %v2308_v16, 2 }
 0x1c7   : > { %v2064_v25 = vmax.f32 %v2062_v5, %v2063_v22  ;;  %3036 = vrcp.f32 %v2305_v19  ;;  %vm2591_vm12 = vweird.f32 %v2305_v19  ;;  %v2595_v18 = vand.u32 2147483647, %v2305_v19 }
 0x1c8   : > { %1923 = vmatpush.msra.mxu0 %v192_v63  ;;  %1943 = vmatpush.msra.mxu1 %v592_v21  ;;  %v1646_v26 = vpop.f32.mrf.mxu2  ;;  %v1666_v28 = vpop.f32.mrf.mxu3  ;;  %v2310_v29 = vadd.f32 %v2309_v23, %v2308_v16  ;;  %v2597_v52 = vand.u32 2147483648, %v2305_v19 }
 0x1c9   : > { %v2065_v14 = vrot.slane %v2064_v25, 2  ;;  %v1667_v31 = vadd.f32 %v1666_v28, %v1646_v26  ;;  %vm2596_vm2 = vcmp.eq.f32.partialorder %v2595_v18, 8.507059e+37 }
 0x1ca   : > { %1924 = vmatpush.msra.mxu0 %v167_v24  ;;  %1944 = vmatpush.msra.mxu1 %v567_v11  ;;  %v2311_v3 = vrot.slane %v2310_v29, 1  ;;  %v2598_v61 = vor.u32 1.1754944e-38, %v2597_v52 }
 0x1cb   : > { %1925 = vmatmul.f32.vlgmr.msra.gmra.mxu0 %v5834_v37  ;;  %1945 = vmatmul.f32.vlgmr.msra.gmra.mxu1 %v5837_v48  ;;  %v2066_v33 = vmax.f32 %v2064_v25, %v2065_v14  ;;  %v2069_v35 = vsel %vm1949_vm0, %v1667_v31, -inf }
 0x1cc   : > { %v2070_v34 = vrot.slane %v2069_v35, 4  ;;  %v2312_v36 = vadd.f32 %v2311_v3, %v2310_v29 }
 0x1cd   : > { %v2067_v32 = vrot.slane %v2066_v33, 1  ;;  %v3037_v20 = vpop.eup %3036 }
 0x1ce   : > { %v2071_v39 = vmax.f32 %v2069_v35, %v2070_v34  ;;  %v2587_v40 = vmul.f32 %v3037_v20, %v2305_v19  ;;  %3038 = vrcp.f32 %v2312_v36  ;;  %vm2592_vm13 = vweird.f32 %v3037_v20 }
 0x1cf   : > { %v2068_v43 = vmax.f32 %v2066_v33, %v2067_v32  ;;  %vm2606_vm14 = vweird.f32 %v2312_v36  ;;  %v2610_v53 = vand.u32 2147483647, %v2312_v36  ;;  %v2612_v54 = vand.u32 2147483648, %v2312_v36  ;;  %vm6272_vm1 = vmor %vm2591_vm12, %vm2592_vm13 }
 0x1d0   : > { %v2072_v44 = vrot.slane %v2071_v39, 2  ;;  %v2588_v45 = vsub.f32 1.0, %v2587_v40 }
 0x1d1   : > { %v2142_v41 = vsub.f32 %v1627_v7, %v2068_v43  ;;  %v2613_v62 = vor.u32 1.1754944e-38, %v2612_v54  ;;  %vm2611_vm4 = vcmp.eq.f32.partialorder %v2610_v53, 8.507059e+37 }
 0x1d2   : > { %v2073_v46 = vmax.f32 %v2071_v39, %v2072_v44  ;;  %v2589_v47 = vmul.f32 %v3037_v20, %v2588_v45 }
 0x1d3   : > { %v2183_v37 = vmul.f32 1.442695, %v2142_v41 }
 0x1d4   : > { %v2074_v17 = vrot.slane %v2073_v46, 1  ;;  %v3039_v48 = vpop.eup %3038  ;;  %v2590_v55 = vadd.f32 %v3037_v20, %v2589_v47 }
 0x1d5   : > { %v2602_v50 = vmul.f32 %v3039_v48, %v2312_v36  ;;  %3040 = vpow2.f32 %v2183_v37  ;;  %vm2607_vm15 = vweird.f32 %v3039_v48 }
 0x1d6   : > { %v2075_v51 = vmax.f32 %v2073_v46, %v2074_v17  ;;  %vm2608_vm3 = vmor %vm2606_vm14, %vm2607_vm15  ;;  %v2594_v60 = vsel %vm6272_vm1, %v3037_v20, %v2590_v55 }
 0x1d7   : > { %v2603_v2 = vsub.f32 1.0, %v2602_v50  ;;  %v2599_v9 = vsel %vm2596_vm2, %v2598_v61, %v2594_v60 }
 0x1d8   : > { %v2143_v42 = vsub.f32 %v1667_v31, %v2075_v51  ;;  %v2765_v12 = vmul.f32 %v6207_v30, %v2599_v9 }
 0x1d9   : > { %v2604_v57 = vmul.f32 %v3039_v48, %v2603_v2 }
 0x1da   : > { %v2185_v49 = vmul.f32 1.442695, %v2143_v42 }
 0x1db   : > { %v6276_v4 = vpop.eup %3040  ;;  %v2605_v6 = vadd.f32 %v3039_v48, %v2604_v57 }
 0x1dc   : > { %3042 = vpow2.f32 %v2185_v49  ;;  %v2313_v1 = vsel %vm1949_vm0, %v6276_v4, 0.0 }
 0x1dd   : > { %v2609_v27 = vsel %vm2608_vm3, %v3039_v48, %v2605_v6  ;;  %v2314_v8 = vrot.slane %v2313_v1, 4 }
 0x1de   : > { %v2614_v58 = vsel %vm2611_vm4, %v2613_v62, %v2609_v27 }
 0x1df   : > { %v2766_v7 = vmul.f32 %v6237_v0, %v2614_v58  ;;  %v2315_v56 = vadd.f32 %v2314_v8, %v2313_v1 }
 0x1e1   : > { %v2807_v38 = vrot.slane %v2766_v7, 4  ;;  %v2316_v13 = vrot.slane %v2315_v56, 2 }
 0x1e2   : > { %v6283_v10 = vpop.eup %3042 }
 0x1e3   : > { %v1686_v5 = vpop.f32.mrf.mxu0  ;;  %v1706_v15 = vpop.f32.mrf.mxu1  ;;  %v2320_v16 = vsel %vm1949_vm0, %v6283_v10, 0.0  ;;  %v2819_v21 = vsel %vm1949_vm0, %v2765_v12, %v2807_v38  ;;  %v2317_v22 = vadd.f32 %v2316_v13, %v2315_v56 }
 0x1e4   : > { %v1707_v63 = vadd.f32 %v1706_v15, %v1686_v5  ;;  %v2321_v19 = vrot.slane %v2320_v16, 4  ;;  %2843 = vst [vmem:[%s4656_s26 + $0x38] sm:$0xff] %v2819_v21 }
 0x1e5   : > { %v2318_v23 = vrot.slane %v2317_v22, 1 }
 0x1e6   : > { %v2076_v0 = vsel %vm1949_vm0, %v1707_v63, -inf  ;;  %v2322_v24 = vadd.f32 %v2321_v19, %v2320_v16 }
 0x1e7   : > { %v2077_v11 = vrot.slane %v2076_v0, 4  ;;  %v2319_v25 = vadd.f32 %v2318_v23, %v2317_v22 }
 0x1e8   : > { %v2323_v30 = vrot.slane %v2322_v24, 2 }
 0x1e9   : > { %v2078_v26 = vmax.f32 %v2076_v0, %v2077_v11  ;;  %3044 = vrcp.f32 %v2319_v25  ;;  %vm2621_vm5 = vweird.f32 %v2319_v25  ;;  %v2625_v50 = vand.u32 2147483647, %v2319_v25 }
 0x1ea   : > { %v1726_v28 = vpop.f32.mrf.mxu2  ;;  %v1746_v29 = vpop.f32.mrf.mxu3  ;;  %v2324_v14 = vadd.f32 %v2323_v30, %v2322_v24  ;;  %v2627_v53 = vand.u32 2147483648, %v2319_v25 }
 0x1eb   : > { %v2079_v31 = vrot.slane %v2078_v26, 2  ;;  %v1747_v3 = vadd.f32 %v1746_v29, %v1726_v28  ;;  %vm2626_vm10 = vcmp.eq.f32.partialorder %v2625_v50, 8.507059e+37 }
 0x1ec   : > { %v2325_v33 = vrot.slane %v2324_v14, 1  ;;  %v2628_v62 = vor.u32 1.1754944e-38, %v2627_v53 }
 0x1ed   : > { %v2080_v35 = vmax.f32 %v2078_v26, %v2079_v31  ;;  %v2083_v34 = vsel %vm1949_vm0, %v1747_v3, -inf }
 0x1ee   : > { %v2084_v36 = vrot.slane %v2083_v34, 4  ;;  %v2326_v32 = vadd.f32 %v2325_v33, %v2324_v14 }
 0x1ef   : > { %v2081_v20 = vrot.slane %v2080_v35, 1  ;;  %v3045_v39 = vpop.eup %3044 }
 0x1f0   : > { %v2085_v40 = vmax.f32 %v2083_v34, %v2084_v36  ;;  %v2617_v43 = vmul.f32 %v3045_v39, %v2319_v25  ;;  %3046 = vrcp.f32 %v2326_v32  ;;  %vm2622_vm6 = vweird.f32 %v3045_v39 }
 0x1f1   : > { %v2082_v44 = vmax.f32 %v2080_v35, %v2081_v20  ;;  %vm2636_vm7 = vweird.f32 %v2326_v32  ;;  %v2640_v54 = vand.u32 2147483647, %v2326_v32  ;;  %v2642_v55 = vand.u32 2147483648, %v2326_v32  ;;  %vm6292_vm9 = vmor %vm2621_vm5, %vm2622_vm6 }
 0x1f2   : > { %v2086_v45 = vrot.slane %v2085_v40, 2  ;;  %v2618_v41 = vsub.f32 1.0, %v2617_v43 }
 0x1f3   : > { %v2144_v46 = vsub.f32 %v1707_v63, %v2082_v44  ;;  %v2643_v60 = vor.u32 1.1754944e-38, %v2642_v55  ;;  %vm2641_vm12 = vcmp.eq.f32.partialorder %v2640_v54, 8.507059e+37 }
 0x1f4   : > { %v2087_v47 = vmax.f32 %v2085_v40, %v2086_v45  ;;  %v2619_v37 = vmul.f32 %v3045_v39, %v2618_v41 }
 0x1f5   : > { %v2187_v17 = vmul.f32 1.442695, %v2144_v46 }
 0x1f6   : > { %v2088_v48 = vrot.slane %v2087_v47, 1  ;;  %v3047_v18 = vpop.eup %3046  ;;  %v2620_v2 = vadd.f32 %v3045_v39, %v2619_v37 }
 0x1f7   : > { %v2632_v51 = vmul.f32 %v3047_v18, %v2326_v32  ;;  %3048 = vpow2.f32 %v2187_v17  ;;  %vm2637_vm8 = vweird.f32 %v3047_v18 }
 0x1f8   : > { %v2089_v52 = vmax.f32 %v2087_v47, %v2088_v48  ;;  %vm2638_vm11 = vmor %vm2636_vm7, %vm2637_vm8  ;;  %v2624_v1 = vsel %vm6292_vm9, %v3045_v39, %v2620_v2 }
 0x1f9   : > { %v2633_v42 = vsub.f32 1.0, %v2632_v51  ;;  %v2629_v7 = vsel %vm2626_vm10, %v2628_v62, %v2624_v1 }
 0x1fa   : > { %v2145_v59 = vsub.f32 %v1747_v3, %v2089_v52  ;;  %v2767_v5 = vmul.f32 %v6276_v4, %v2629_v7 }
 0x1fb   : > { %v2634_v49 = vmul.f32 %v3047_v18, %v2633_v42 }
 0x1fc   : > { %v2189_v61 = vmul.f32 1.442695, %v2145_v59 }
 0x1fd   : > { %v6296_v6 = vpop.eup %3048  ;;  %v2635_v27 = vadd.f32 %v3047_v18, %v2634_v49 }
 0x1fe   : > { %3050 = vpow2.f32 %v2189_v61  ;;  %v2327_v8 = vsel %vm1949_vm0, %v6296_v6, 0.0 }
 0x1ff   : > { %v2639_v9 = vsel %vm2638_vm11, %v3047_v18, %v2635_v27  ;;  %v2328_v58 = vrot.slane %v2327_v8, 4 }
 0x200   : > { %v2644_v56 = vsel %vm2641_vm12, %v2643_v60, %v2639_v9 }
 0x201   : > { %v2768_v12 = vmul.f32 %v6283_v10, %v2644_v56  ;;  %v2329_v38 = vadd.f32 %v2328_v58, %v2327_v8 }
 0x203   : > { %v2808_v15 = vrot.slane %v2768_v12, 4  ;;  %v2330_v16 = vrot.slane %v2329_v38, 2 }
 0x204   : > { %v6303_v13 = vpop.eup %3050 }
 0x205   : > { %v1766_v63 = vpop.f32.mrf.mxu0  ;;  %v1786_v21 = vpop.f32.mrf.mxu1  ;;  %v2334_v22 = vsel %vm1949_vm0, %v6303_v13, 0.0  ;;  %v2820_v0 = vsel %vm1949_vm0, %v2767_v5, %v2808_v15  ;;  %v2331_v23 = vadd.f32 %v2330_v16, %v2329_v38 }
 0x206   : > { %v1787_v19 = vadd.f32 %v1786_v21, %v1766_v63  ;;  %v2335_v24 = vrot.slane %v2334_v22, 4  ;;  %2844 = vst [vmem:[%s4656_s26 + $0x40] sm:$0xff] %v2820_v0 }
 0x207   : > { %v2332_v11 = vrot.slane %v2331_v23, 1 }
 0x208   : > { %v2090_v10 = vsel %vm1949_vm0, %v1787_v19, -inf  ;;  %v2336_v25 = vadd.f32 %v2335_v24, %v2334_v22 }
 0x209   : > { %v2091_v30 = vrot.slane %v2090_v10, 4  ;;  %v2333_v26 = vadd.f32 %v2332_v11, %v2331_v23 }
 0x20a   : > { %v2337_v4 = vrot.slane %v2336_v25, 2 }
 0x20b   : > { %v2092_v28 = vmax.f32 %v2090_v10, %v2091_v30  ;;  %3052 = vrcp.f32 %v2333_v26  ;;  %vm2651_vm13 = vweird.f32 %v2333_v26  ;;  %v2655_v51 = vand.u32 2147483647, %v2333_v26 }
 0x20c   : > { %v1806_v29 = vpop.f32.mrf.mxu2  ;;  %v1826_v14 = vpop.f32.mrf.mxu3  ;;  %v2338_v31 = vadd.f32 %v2337_v4, %v2336_v25  ;;  %v2657_v54 = vand.u32 2147483648, %v2333_v26 }
 0x20d   : > { %v2093_v3 = vrot.slane %v2092_v28, 2  ;;  %v1827_v33 = vadd.f32 %v1826_v14, %v1806_v29  ;;  %vm2656_vm3 = vcmp.eq.f32.partialorder %v2655_v51, 8.507059e+37 }
 0x20e   : > { %v2339_v35 = vrot.slane %v2338_v31, 1  ;;  %v2658_v60 = vor.u32 1.1754944e-38, %v2657_v54 }
 0x20f   : > { %v2094_v34 = vmax.f32 %v2092_v28, %v2093_v3  ;;  %v2097_v36 = vsel %vm1949_vm0, %v1827_v33, -inf }
 0x210   : > { %v2098_v32 = vrot.slane %v2097_v36, 4  ;;  %v2340_v20 = vadd.f32 %v2339_v35, %v2338_v31 }
 0x211   : > { %v2095_v39 = vrot.slane %v2094_v34, 1  ;;  %v3053_v40 = vpop.eup %3052 }
 0x212   : > { %v2099_v43 = vmax.f32 %v2097_v36, %v2098_v32  ;;  %v2647_v44 = vmul.f32 %v3053_v40, %v2333_v26  ;;  %3054 = vrcp.f32 %v2340_v20  ;;  %vm2652_vm14 = vweird.f32 %v3053_v40 }
 0x213   : > { %v2096_v45 = vmax.f32 %v2094_v34, %v2095_v39  ;;  %vm2666_vm15 = vweird.f32 %v2340_v20  ;;  %v2670_v55 = vand.u32 2147483647, %v2340_v20  ;;  %v2672_v2 = vand.u32 2147483648, %v2340_v20  ;;  %vm6312_vm2 = vmor %vm2651_vm13, %vm2652_vm14 }
 0x214   : > { %v2100_v41 = vrot.slane %v2099_v43, 2  ;;  %v2648_v46 = vsub.f32 1.0, %v2647_v44  ;;  %vm2118_vm14 = vcmask 519168  }
 0x215   : > { %v2146_v47 = vsub.f32 %v1787_v19, %v2096_v45  ;;  %v2673_v1 = vor.u32 1.1754944e-38, %v2672_v2  ;;  %vm2671_vm5 = vcmp.eq.f32.partialorder %v2670_v55, 8.507059e+37 }
 0x216   : > { %v2101_v37 = vmax.f32 %v2099_v43, %v2100_v41  ;;  %v2649_v17 = vmul.f32 %v3053_v40, %v2648_v46 }
 0x217   : > { %v2191_v48 = vmul.f32 1.442695, %v2146_v47 }
 0x218   : > { %v2102_v18 = vrot.slane %v2101_v37, 1  ;;  %v3055_v50 = vpop.eup %3054  ;;  %v2650_v42 = vadd.f32 %v3053_v40, %v2649_v17 }
 0x219   : > { %v2662_v52 = vmul.f32 %v3055_v50, %v2340_v20  ;;  %3056 = vpow2.f32 %v2191_v48  ;;  %vm2667_vm1 = vweird.f32 %v3055_v50 }
 0x21a   : > { %v2103_v53 = vmax.f32 %v2101_v37, %v2102_v18  ;;  %vm2668_vm4 = vmor %vm2666_vm15, %vm2667_vm1  ;;  %v2654_v8 = vsel %vm6312_vm2, %v3053_v40, %v2650_v42 }
 0x21b   : > { %v2663_v59 = vsub.f32 1.0, %v2662_v52  ;;  %v2659_v12 = vsel %vm2656_vm3, %v2658_v60, %v2654_v8 }
 0x21c   : > { %v2147_v57 = vsub.f32 %v1827_v33, %v2103_v53  ;;  %v2769_v63 = vmul.f32 %v6296_v6, %v2659_v12 }
 0x21d   : > { %v2664_v61 = vmul.f32 %v3055_v50, %v2663_v59 }
 0x21e   : > { %v2193_v62 = vmul.f32 1.442695, %v2147_v57 }
 0x21f   : > { %v6316_v27 = vpop.eup %3056  ;;  %v2665_v9 = vadd.f32 %v3055_v50, %v2664_v61 }
 0x220   : > { %3058 = vpow2.f32 %v2193_v62  ;;  %v2341_v58 = vsel %vm1949_vm0, %v6316_v27, 0.0 }
 0x221   : > { %v2669_v7 = vsel %vm2668_vm4, %v3055_v50, %v2665_v9  ;;  %v2342_v56 = vrot.slane %v2341_v58, 4 }
 0x222   : > { %v2674_v38 = vsel %vm2671_vm5, %v2673_v1, %v2669_v7 }
 0x223   : > { %v2770_v5 = vmul.f32 %v6303_v13, %v2674_v38  ;;  %v2343_v15 = vadd.f32 %v2342_v56, %v2341_v58 }
 0x225   : > { %v2809_v21 = vrot.slane %v2770_v5, 4  ;;  %v2344_v22 = vrot.slane %v2343_v15, 2 }
 0x226   : > { %v6323_v16 = vpop.eup %3058 }
 0x227   : > { %v1846_v19 = vpop.f32.mrf.mxu0  ;;  %v1866_v0 = vpop.f32.mrf.mxu1  ;;  %v2348_v23 = vsel %vm1949_vm0, %v6323_v16, 0.0  ;;  %v2821_v10 = vsel %vm1949_vm0, %v2769_v63, %v2809_v21  ;;  %v2345_v11 = vadd.f32 %v2344_v22, %v2343_v15 }
 0x228   : > { %v1867_v24 = vadd.f32 %v1866_v0, %v1846_v19  ;;  %v2349_v25 = vrot.slane %v2348_v23, 4  ;;  %2845 = vst [vmem:[%s4656_s26 + $0x48] sm:$0xff] %v2821_v10 }
 0x229   : > { %v2346_v30 = vrot.slane %v2345_v11, 1 }
 0x22a   : > { %v2104_v13 = vsel %vm1949_vm0, %v1867_v24, -inf  ;;  %v2350_v26 = vadd.f32 %v2349_v25, %v2348_v23 }
 0x22b   : > { %v2105_v4 = vrot.slane %v2104_v13, 4  ;;  %v2347_v28 = vadd.f32 %v2346_v30, %v2345_v11 }
 0x22c   : > { %v2351_v6 = vrot.slane %v2350_v26, 2 }
 0x22d   : > { %v2106_v29 = vmax.f32 %v2104_v13, %v2105_v4  ;;  %3060 = vrcp.f32 %v2347_v28  ;;  %vm2681_vm6 = vweird.f32 %v2347_v28  ;;  %v2685_v52 = vand.u32 2147483647, %v2347_v28 }
 0x22e   : > { %v1886_v14 = vpop.f32.mrf.mxu2  ;;  %v1906_v31 = vpop.f32.mrf.mxu3  ;;  %v2352_v3 = vadd.f32 %v2351_v6, %v2350_v26  ;;  %v2687_v55 = vand.u32 2147483648, %v2347_v28 }
 0x22f   : > { %v2107_v33 = vrot.slane %v2106_v29, 2  ;;  %v1907_v35 = vadd.f32 %v1906_v31, %v1886_v14  ;;  %vm2686_vm11 = vcmp.eq.f32.partialorder %v2685_v52, 8.507059e+37 }
 0x230   : > { %v2353_v34 = vrot.slane %v2352_v3, 1  ;;  %v2688_v1 = vor.u32 1.1754944e-38, %v2687_v55 }
 0x231   : > { %v2108_v36 = vmax.f32 %v2106_v29, %v2107_v33  ;;  %v2111_v32 = vsel %vm1949_vm0, %v1907_v35, -inf }
 0x232   : > { %v2112_v20 = vrot.slane %v2111_v32, 4  ;;  %v2354_v39 = vadd.f32 %v2353_v34, %v2352_v3 }
 0x233   : > { %v2109_v40 = vrot.slane %v2108_v36, 1  ;;  %v3061_v43 = vpop.eup %3060 }
 0x234   : > { %v2113_v44 = vmax.f32 %v2111_v32, %v2112_v20  ;;  %v2677_v45 = vmul.f32 %v3061_v43, %v2347_v28  ;;  %3062 = vrcp.f32 %v2354_v39  ;;  %vm2682_vm7 = vweird.f32 %v3061_v43 }
 0x235   : > { %v2110_v41 = vmax.f32 %v2108_v36, %v2109_v40  ;;  %vm2696_vm8 = vweird.f32 %v2354_v39  ;;  %v2700_v2 = vand.u32 2147483647, %v2354_v39  ;;  %v2702_v42 = vand.u32 2147483648, %v2354_v39  ;;  %vm6332_vm10 = vmor %vm2681_vm6, %vm2682_vm7 }
 0x236   : > { %v2114_v46 = vrot.slane %v2113_v44, 2  ;;  %v2678_v47 = vsub.f32 1.0, %v2677_v45 }
 0x237   : > { %v2148_v37 = vsub.f32 %v1867_v24, %v2110_v41  ;;  %v2703_v8 = vor.u32 1.1754944e-38, %v2702_v42  ;;  %vm2701_vm13 = vcmp.eq.f32.partialorder %v2700_v2, 8.507059e+37 }
 0x238   : > { %v2115_v17 = vmax.f32 %v2113_v44, %v2114_v46  ;;  %v2679_v48 = vmul.f32 %v3061_v43, %v2678_v47 }
 0x239   : > { %v2195_v18 = vmul.f32 1.442695, %v2148_v37 }
 0x23a   : > { %v2116_v50 = vrot.slane %v2115_v17, 1  ;;  %v3063_v51 = vpop.eup %3062  ;;  %v2680_v59 = vadd.f32 %v3061_v43, %v2679_v48 }
 0x23b   : > { %v2692_v53 = vmul.f32 %v3063_v51, %v2354_v39  ;;  %3064 = vpow2.f32 %v2195_v18  ;;  %vm2697_vm9 = vweird.f32 %v3063_v51 }
 0x23c   : > { %v2117_v54 = vmax.f32 %v2115_v17, %v2116_v50  ;;  %vm2698_vm12 = vmor %vm2696_vm8, %vm2697_vm9  ;;  %v2684_v58 = vsel %vm6332_vm10, %v3061_v43, %v2680_v59 }
 0x23d   : > { %v2693_v57 = vsub.f32 1.0, %v2692_v53  ;;  %v2689_v5 = vsel %vm2686_vm11, %v2688_v1, %v2684_v58 }
 0x23e   : > { %v2149_v49 = vsub.f32 %v1907_v35, %v2117_v54  ;;  %v2771_v23 = vmul.f32 %v6316_v27, %v2689_v5 }
 0x23f   : > { %v2694_v62 = vmul.f32 %v3063_v51, %v2693_v57 }
 0x240   : > { %v2197_v60 = vmul.f32 1.442695, %v2149_v49 }
 0x241   : > { %v6336_v9 = vpop.eup %3064  ;;  %v2695_v7 = vadd.f32 %v3063_v51, %v2694_v62 }
 0x242   : > { %3066 = vpow2.f32 %v2197_v60  ;;  %v2355_v56 = vsel %vm1949_vm0, %v6336_v9, 0.0 }
 0x243   : > { %v2699_v12 = vsel %vm2698_vm12, %v3063_v51, %v2695_v7  ;;  %v2356_v38 = vrot.slane %v2355_v56, 4 }
 0x244   : > { %v2704_v15 = vsel %vm2701_vm13, %v2703_v8, %v2699_v12 }
 0x245   : > { %v2772_v63 = vmul.f32 %v6323_v16, %v2704_v15  ;;  %v2357_v21 = vadd.f32 %v2356_v38, %v2355_v56 }
 0x247   : > { %v2810_v24 = vrot.slane %v2772_v63, 4  ;;  %v2358_v10 = vrot.slane %v2357_v21, 2 }
 0x248   : > { %v1926_v22 = vpop.f32.mrf.mxu0  ;;  %v1946_v19 = vpop.f32.mrf.mxu1 }
 0x249   : > { %v3067_v0 = vpop.eup %3066  ;;  %v1947_v11 = vadd.f32 %v1946_v19, %v1926_v22  ;;  %v2822_v13 = vsel %vm1949_vm0, %v2771_v23, %v2810_v24  ;;  %v2359_v30 = vadd.f32 %v2358_v10, %v2357_v21 }
 0x24a   : > { %v2362_v25 = vsel %vm1949_vm0, %v3067_v0, 0.0  ;;  %2846 = vst [vmem:[%s4656_s26 + $0x50] sm:$0xff] %v2822_v13 }
 0x24b   : > { %v2363_v26 = vrot.slane %v2362_v25, 4  ;;  %v2119_v4 = vsel %vm2118_vm14, %v1947_v11, -inf  ;;  %v2360_v28 = vrot.slane %v2359_v30, 1 }
 0x24c   : > { %v2120_v16 = vrot.slane %v2119_v4, 4 }
 0x24d   : > { %v2364_v6 = vadd.f32 %v2363_v26, %v2362_v25  ;;  %v2361_v14 = vadd.f32 %v2360_v28, %v2359_v30 }
 0x24e   : > { %v2121_v29 = vmax.f32 %v2119_v4, %v2120_v16 }
 0x24f   : > { %v2365_v31 = vrot.slane %v2364_v6, 2  ;;  %3068 = vrcp.f32 %v2361_v14  ;;  %vm2711_vm1 = vweird.f32 %v2361_v14  ;;  %v2717_v17 = vand.u32 2147483648, %v2361_v14 }
 0x250   : > { %v2122_v3 = vrot.slane %v2121_v29, 2  ;;  %v2715_v50 = vand.u32 2147483647, %v2361_v14 }
 0x251   : > { %v2366_v27 = vadd.f32 %v2365_v31, %v2364_v6  ;;  %v2718_v42 = vor.u32 1.1754944e-38, %v2717_v17 }
 0x252   : > { %v2123_v33 = vmax.f32 %v2121_v29, %v2122_v3  ;;  %vm2716_vm6 = vcmp.eq.f32.partialorder %v2715_v50, 8.507059e+37 }
 0x253   : > { %v2367_v35 = vrot.slane %v2366_v27, 1 }
 0x254   : > { %v2124_v34 = vrot.slane %v2123_v33, 1 }
 0x255   : > { %v2368_v36 = vadd.f32 %v2367_v35, %v2366_v27  ;;  %v3069_v20 = vpop.eup %3068 }
 0x256   : > { %v2125_v32 = vmax.f32 %v2123_v33, %v2124_v34  ;;  %v2707_v39 = vmul.f32 %v3069_v20, %v2361_v14  ;;  %vm2712_vm15 = vweird.f32 %v3069_v20 }
 0x257   : > { %3070 = vrcp.f32 %v2368_v36  ;;  %v2732_v48 = vand.u32 2147483648, %v2368_v36  ;;  %v2730_v52 = vand.u32 2147483647, %v2368_v36  ;;  %vm2713_vm3 = vmor %vm2711_vm1, %vm2712_vm15  ;;  %vm2726_vm4 = vweird.f32 %v2368_v36 }
 0x258   : > { %v2150_v40 = vsub.f32 %v1947_v11, %v2125_v32  ;;  %v2708_v43 = vsub.f32 1.0, %v2707_v39 }
 0x259   : > { %v2733_v59 = vor.u32 1.1754944e-38, %v2732_v48  ;;  %vm2731_vm7 = vcmp.eq.f32.partialorder %v2730_v52, 8.507059e+37 }
 0x25a   : > { %v2199_v44 = vmul.f32 1.442695, %v2150_v40  ;;  %v2709_v45 = vmul.f32 %v3069_v20, %v2708_v43 }
 0x25c   : > { %3072 = vpow2.f32 %v2199_v44  ;;  %v2710_v47 = vadd.f32 %v3069_v20, %v2709_v45 }
 0x25d   : > { %v3071_v41 = vpop.eup %3070 }
 0x25e   : > { %v2722_v46 = vmul.f32 %v3071_v41, %v2368_v36  ;;  %vm2727_vm2 = vweird.f32 %v3071_v41  ;;  %v2714_v54 = vsel %vm2713_vm3, %v3069_v20, %v2710_v47 }
 0x25f   : > { %vm2728_vm5 = vmor %vm2726_vm4, %vm2727_vm2  ;;  %v2719_v61 = vsel %vm2716_vm6, %v2718_v42, %v2714_v54 }
 0x260   : > { %v2723_v37 = vsub.f32 1.0, %v2722_v46  ;;  %v2773_v8 = vmul.f32 %v6336_v9, %v2719_v61 }
 0x262   : > { %v3073_v18 = vpop.eup %3072  ;;  %v2724_v51 = vmul.f32 %v3071_v41, %v2723_v37 }
 0x263   : > { %v2369_v53 = vsel %vm2118_vm14, %v3073_v18, 0.0 }
 0x264   : > { %v2725_v55 = vadd.f32 %v3071_v41, %v2724_v51  ;;  %v2370_v2 = vrot.slane %v2369_v53, 4 }
 0x266   : > { %v2729_v57 = vsel %vm2728_vm5, %v3071_v41, %v2725_v55  ;;  %v2371_v49 = vadd.f32 %v2370_v2, %v2369_v53 }
 0x267   : > { %v2734_v62 = vsel %vm2731_vm7, %v2733_v59, %v2729_v57 }
 0x268   : > { %v2774_v60 = vmul.f32 %v3067_v0, %v2734_v62  ;;  %v2372_v1 = vrot.slane %v2371_v49, 2 }
 0x26a   : > { %v2811_v58 = vrot.slane %v2774_v60, 4  ;;  %v2373_v7 = vadd.f32 %v2372_v1, %v2371_v49 }
 0x26c   : > { %v2823_v56 = vsel %vm1949_vm0, %v2773_v8, %v2811_v58  ;;  %v2374_v12 = vrot.slane %v2373_v7, 1 }
 0x26d   : > { %2847 = vst [vmem:[%s4656_s26 + $0x58] sm:$0xff] %v2823_v56 }
 0x26e   : > { %v2375_v38 = vadd.f32 %v2374_v12, %v2373_v7 }
 0x270   : > { %3074 = vrcp.f32 %v2375_v38  ;;  %v2747_v21 = vand.u32 2147483648, %v2375_v38  ;;  %v2745_v19 = vand.u32 2147483647, %v2375_v38  ;;  %vm2741_vm0 = vweird.f32 %v2375_v38 }
 0x272   : > { %v2748_v0 = vor.u32 1.1754944e-38, %v2747_v21  ;;  %vm2746_vm10 = vcmp.eq.f32.partialorder %v2745_v19, 8.507059e+37 }
 0x276   : > { %v3075_v5 = vpop.eup %3074 }
 0x277   : > { %v2737_v15 = vmul.f32 %v3075_v5, %v2375_v38  ;;  %vm2742_vm8 = vweird.f32 %v3075_v5 }
 0x278   : > { %vm2743_vm9 = vmor %vm2741_vm0, %vm2742_vm8 }
 0x279   : > { %v2738_v63 = vsub.f32 1.0, %v2737_v15 }
 0x27b   : > { %v2739_v22 = vmul.f32 %v3075_v5, %v2738_v63 }
 0x27d   : > { %v2740_v9 = vadd.f32 %v3075_v5, %v2739_v22 }
 0x27f   : > { %v2744_v23 = vsel %vm2743_vm9, %v3075_v5, %v2740_v9 }
 0x280   : > { %v2749_v24 = vsel %vm2746_vm10, %v2748_v0, %v2744_v23 }
 0x281   : > { %v2775_v10 = vmul.f32 %v3073_v18, %v2749_v24 }
 0x283   : > { %2848 = vst.msk [vmem:[%s4656_s26 + $0x60] sm:$0xf] %vm2118_vm14, %v2775_v10 }
 0x284   : > { %3109 = shalt.err (!%p3106_p3)
}
 0x285   : > { %2937 = dma.vmem_to_hbm [thread:$0]  (%p3199_p5), %s2864_s30, 1600, %s2866_s4, %s2850_s13  }
 0x286 PF: > { %p2943_p4 = scmp.ge.s32.totalorder %s3144_s12, 2  ;;  %s2877_s16 = sand.u32 1, %s3132_s9  }
 0x287   : > { %s2878_s26 = scalar_lea.sflag [#allocation3], %s2877_s16 }
 0x288   : > { %p2940_p7 = pnand %p2943_p4, %p3203_p6 }
 0x28a   : > { %p2941_p8 = pneg %p2940_p7 }
 0x28c   : > { %3127 = dma.done.wait (%p2941_p8), %s2878_s26, 1600  }
 0x28d   : > { %3129 = vsyncadd (%p2941_p8), %s2878_s26, 4294965696  ;;  %p12_p9 = scmp.ge.s32.totalorder %s3186_s15, 4   ;;  %s6455_s9 = smov %s3136_s10 }
 0x28e   : > { %s6456_s10 = smov %s3140_s11  ;;  %s6457_s11 = smov %s3197_s18 }
 0x28f   : > { %s6458_s12 = smov %s3186_s15  ;;  %14 = sbr.rel (!%p12_p9) target bundleno = 3 (0x3), region = 63 }
 0x294   :  { %2884 = vsyncpa [#allocation3], 1 }
 0x295   :  { %2886 = vsyncpa [#allocation3 + $0x1], 1 }

</bundles_post_ra>
